<compile_context>
chip_gen: v5e
topology: v5e:2x2
jax: 0.10.0
libtpu: 0.0.40
codegen_flags: <defaults>
</compile_context>

<pallas_src>
import functools

import jax
import jax.numpy as jnp
import numpy as np
from jax import lax
from jax.experimental import pallas as pl
from jax.experimental.pallas import tpu as pltpu

EPS = 1e-5


def _down_kernel(x_ref, w1_ref, s1_ref, c1_ref, w2_ref, s2_ref, c2_ref,
                 o_ref, pad1_ref, pad2_ref, acc_ref):
    """One (batch, row-block) step: MaxPool2d(2) -> Conv3x3+BN+ReLU -> Conv3x3+BN+ReLU.

    x_ref   : (H+8, Wp, 2*Cin) bf16  raw rows, 4 zero rows of host padding top/bottom,
                                     W-pooling pairs folded onto the lane axis.
    w*_ref  : (9, C, Cout)     bf16  per-tap matmul RHS.
    s*/c*   : (1, Cout)        f32   folded conv-bias + BatchNorm scale / shift.
    o_ref   : (R*Wp, Cout)     bf16  this row block's output rows, flattened.
    pad1_ref: (R+4, Wp+2, Cin) bf16  pooled rows rb-2 .. rb+R+1, column-zero-padded.
    pad2_ref: (R+2, Wp+2, Cout)bf16  h1 rows rb-1 .. rb+R, column-zero-padded.
    acc_ref : ((R+2)*Wp, Cout) f32   shared matmul accumulator (conv2 uses rows [0,R*Wp)).
    """
    Rp4, Wp2, Cin = pad1_ref.shape
    R, Wp = Rp4 - 4, Wp2 - 2
    Cout = pad2_ref.shape[2]
    r = pl.program_id(1)

    # ---- MaxPool2d(2) on this block's rows (incl. a 2-pooled-row halo each side) ----
    row0 = pl.multiple_of(r * (2 * R), 2 * R)
    xw = x_ref[pl.ds(row0, 2 * R + 8), :, :]                  # (2R+8, Wp, 2Cin)
    wmax = jnp.maximum(xw[:, :, :Cin], xw[:, :, Cin:])        # pool along W (lane halves)
    xh = wmax.reshape(R + 4, 2, Wp, Cin)
    pooled = jnp.maximum(xh[:, 0], xh[:, 1])                  # (R+4, Wp, Cin) pool along H

    pad1_ref[:, 1:Wp + 1, :] = pooled
    pad1_ref[:, 0:1, :] = jnp.zeros((R + 4, 1, Cin), jnp.bfloat16)
    pad1_ref[:, Wp + 1:Wp + 2, :] = jnp.zeros((R + 4, 1, Cin), jnp.bfloat16)

    # ---- Conv1 (3x3, pad=1): 9 tap-wise MXU matmuls, f32 accumulation ---------------
    n1 = (R + 2) * Wp
    for k in range(9):
        dy, dx = divmod(k, 3)
        lhs = pad1_ref[dy:dy + R + 2, dx:dx + Wp, :].reshape(n1, Cin)
        t = jnp.dot(lhs, w1_ref[k], preferred_element_type=jnp.float32)
        if k == 0:
            acc_ref[...] = t
        else:
            acc_ref[...] += t

    h1 = jnp.maximum(acc_ref[...] * s1_ref[...] + c1_ref[...], 0.0).astype(jnp.bfloat16)

    pad2_ref[:, 1:Wp + 1, :] = h1.reshape(R + 2, Wp, Cout)
    pad2_ref[:, 0:1, :] = jnp.zeros((R + 2, 1, Cout), jnp.bfloat16)
    pad2_ref[:, Wp + 1:Wp + 2, :] = jnp.zeros((R + 2, 1, Cout), jnp.bfloat16)

    # conv2's zero padding in H: h1 rows outside the image are zero; only the first
    # and last row block touch the image boundary.
    @pl.when(r == 0)
    def _():
        pad2_ref[0:1, :, :] = jnp.zeros((1, Wp + 2, Cout), jnp.bfloat16)

    @pl.when(r == pl.num_programs(1) - 1)
    def _():
        pad2_ref[R + 1:R + 2, :, :] = jnp.zeros((1, Wp + 2, Cout), jnp.bfloat16)

    # ---- Conv2 (3x3, pad=1) on this block's R output rows ---------------------------
    n2 = R * Wp
    for k in range(9):
        dy, dx = divmod(k, 3)
        lhs = pad2_ref[dy:dy + R, dx:dx + Wp, :].reshape(n2, Cout)
        t = jnp.dot(lhs, w2_ref[k], preferred_element_type=jnp.float32)
        if k == 0:
            acc_ref[0:n2, :] = t
        else:
            acc_ref[0:n2, :] += t

    o_ref[...] = jnp.maximum(acc_ref[0:n2, :] * s2_ref[...] + c2_ref[...],
                             0.0).astype(o_ref.dtype)


def _vmem_capacity_bytes():
    try:
        info = pltpu.get_tpu_info()
        cap = getattr(info, "vmem_capacity_bytes", None)
        if cap:
            return int(cap)
    except Exception:
        pass
    return 64 * 1024 * 1024          # conservative (v7x-sized) fallback


def _vmem_estimate(R, H, Wp, Cin, Cout):
    """Rough per-step VMEM footprint in bytes (incl. implicit temporaries)."""
    bf2, f4 = 2, 4
    inp = 2 * (H + 8) * Wp * 2 * Cin * bf2            # resident input block, 2 buffers
    pads = (R + 4) * (Wp + 2) * Cin * bf2 + (R + 2) * (Wp + 2) * Cout * bf2
    acc = (R + 2) * Wp * Cout * f4
    outb = 2 * R * Wp * Cout * bf2
    wts = 9 * Cin * Cout * bf2 + 9 * Cout * Cout * bf2
    # pooling + matmul operand/result temporaries the compiler must also place
    tmp = (2 * R + 8) * Wp * 2 * Cin * bf2 + (R + 2) * Wp * max(Cin, Cout) * (bf2 + f4)
    return inp + pads + acc + outb + wts + tmp


def _pick_row_block(Hp, H, Wp, Cin, Cout, budget):
    divisors = sorted((d for d in range(1, Hp + 1) if Hp % d == 0), reverse=True)
    for d in divisors:
        if _vmem_estimate(d, H, Wp, Cin, Cout) <= budget:
            return d
    return divisors[-1]              # == 1


def _run(x, w1k, s1, c1, w2k, s2, c2, *, Hp, R, vmem_limit, single_buffer_consts):
    N, Hpad, Wp, C2 = x.shape
    Cin = C2 // 2
    Cout = w1k.shape[2]
    n_rb = Hp // R

    const_kw = dict(pipeline_mode=pl.Buffered(1)) if single_buffer_consts else {}
    vec_spec = pl.BlockSpec((1, Cout), lambda n, r: (0, 0), **const_kw)

    flops = 2 * N * Hp * Wp * 9 * Cout * (Cin + Cout)
    bytes_accessed = (x.size * 2 + w1k.size * 2 + w2k.size * 2
                      + 4 * Cout * 4 + N * Hp * Wp * Cout * 2)

    return pl.pallas_call(
        _down_kernel,
        out_shape=jax.ShapeDtypeStruct((N, Hp * Wp, Cout), jnp.bfloat16),
        grid_spec=pltpu.PrefetchScalarGridSpec(
            num_scalar_prefetch=0,
            grid=(N, n_rb),
            in_specs=[
                # whole (padded) image; block index ignores r -> resident across rows
                pl.BlockSpec((None, Hpad, Wp, 2 * Cin), lambda n, r: (n, 0, 0, 0)),
                pl.BlockSpec((9, Cin, Cout), lambda n, r: (0, 0, 0), **const_kw),
                vec_spec, vec_spec,
                pl.BlockSpec((9, Cout, Cout), lambda n, r: (0, 0, 0), **const_kw),
                vec_spec, vec_spec,
            ],
            out_specs=pl.BlockSpec((None, R * Wp, Cout), lambda n, r: (n, r, 0)),
            scratch_shapes=[
                pltpu.VMEM((R + 4, Wp + 2, Cin), jnp.bfloat16),    # conv1 halo pad
                pltpu.VMEM((R + 2, Wp + 2, Cout), jnp.bfloat16),   # conv2 halo pad (h1)
                pltpu.VMEM(((R + 2) * Wp, Cout), jnp.float32),     # shared accumulator
            ]),
        compiler_params=pltpu.CompilerParams(
            dimension_semantics=("parallel", "parallel"),
            vmem_limit_bytes=vmem_limit),
        cost_estimate=pl.CostEstimate(flops=flops, transcendentals=0,
                                      bytes_accessed=bytes_accessed),
    )(x, w1k, s1, c1, w2k, s2, c2)


def down_pallas(x_nchw, params, *, row_block=None, nchw_out=False):
    """Fused MaxPool2d(2)+DoubleConv.  Returns bf16 NHWC (default) or f32 NCHW."""
    (w1, b1, g1, be1, m1, v1, w2, b2, g2, be2, m2, v2) = params
    N, Cin, H, W = x_nchw.shape
    Cout = w1.shape[0]
    assert H % 2 == 0 and W % 2 == 0, "MaxPool2d(2) path assumes even H, W"
    Hp, Wp = H // 2, W // 2

    vmem_limit = int(0.85 * _vmem_capacity_bytes())         # per-generation cap
    if row_block is None:
        R = _pick_row_block(Hp, H, Wp, Cin, Cout, budget=vmem_limit // 2)
    else:
        assert Hp % row_block == 0, "row_block must divide H // 2"
        R = int(row_block)

    # NCHW -> NHWC bf16; fold the W-pooling pair onto the channel (lane) axis.
    x = jnp.transpose(x_nchw, (0, 2, 3, 1)).astype(jnp.bfloat16)   # (N, H, W, Cin)
    x = x.reshape(N, H, Wp, 2 * Cin)
    # 4 zero raw rows top/bottom == 2 zero *pooled* rows == the convs' zero padding,
    # so every row block uses identical in-kernel indexing (no boundary special cases).
    x = jnp.pad(x, ((0, 0), (4, 4), (0, 0), (0, 0)))

    # OIHW -> (9, Cin, Cout): per-tap matmul RHS (bf16).
    w1k = jnp.transpose(w1, (2, 3, 1, 0)).reshape(9, Cin, Cout).astype(jnp.bfloat16)
    w2k = jnp.transpose(w2, (2, 3, 1, 0)).reshape(9, Cout, Cout).astype(jnp.bfloat16)

    # Fold conv bias + BatchNorm (running stats, eval semantics) into scale/shift (f32).
    s1 = (g1 / jnp.sqrt(v1 + EPS)).reshape(1, Cout).astype(jnp.float32)
    c1 = ((b1 - m1) * s1[0] + be1).reshape(1, Cout).astype(jnp.float32)
    s2 = (g2 / jnp.sqrt(v2 + EPS)).reshape(1, Cout).astype(jnp.float32)
    c2 = ((b2 - m2) * s2[0] + be2).reshape(1, Cout).astype(jnp.float32)

    run = functools.partial(_run, x, w1k, s1, c1, w2k, s2, c2,
                            Hp=Hp, R=R, vmem_limit=vmem_limit)
    try:
        out = run(single_buffer_consts=True)
    except Exception:
        # Fallback for jax builds without BlockSpec(pipeline_mode=pl.Buffered(1)).
        out = run(single_buffer_consts=False)

    out = out.reshape(N, Hp, Wp, Cout)        # bf16 NHWC (free reshape)
    if nchw_out:
        # Only for drop-in PyTorch (NCHW, f32) semantics / reference checking.
        return jnp.transpose(out.astype(jnp.float32), (0, 3, 1, 2))
    return out


def down_ref(x, params):
    """Pure-JAX f32 reference (NCHW), mirrors the PyTorch module in eval mode."""
    (w1, b1, g1, be1, m1, v1, w2, b2, g2, be2, m2, v2) = params
    y = lax.reduce_window(x, -jnp.inf, lax.max, (1, 1, 2, 2), (1, 1, 2, 2), 'VALID')

    def block(y, w, b, g, be, m, v):
        y = lax.conv_general_dilated(
            y, w, window_strides=(1, 1), padding=((1, 1), (1, 1)),
            dimension_numbers=('NCHW', 'OIHW', 'NCHW'))
        y = y + b[None, :, None, None]
        y = ((y - m[None, :, None, None])
             / jnp.sqrt(v[None, :, None, None] + EPS)
             * g[None, :, None, None] + be[None, :, None, None])
        return jnp.maximum(y, 0.0)

    y = block(y, w1, b1, g1, be1, m1, v1)
    y = block(y, w2, b2, g2, be2, m2, v2)
    return y


def make_params(key, in_channels, out_channels):
    ks = jax.random.split(key, 8)
    k1 = 1.0 / np.sqrt(in_channels * 9)
    k2 = 1.0 / np.sqrt(out_channels * 9)
    w1 = jax.random.uniform(ks[0], (out_channels, in_channels, 3, 3),
                            jnp.float32, -k1, k1)
    b1 = jax.random.uniform(ks[1], (out_channels,), jnp.float32, -k1, k1)
    g1 = 1.0 + 0.1 * jax.random.normal(ks[2], (out_channels,), jnp.float32)
    be1 = 0.1 * jax.random.normal(ks[3], (out_channels,), jnp.float32)
    m1 = 0.1 * jax.random.normal(ks[2], (out_channels,), jnp.float32)
    v1 = 0.5 + jnp.abs(jax.random.normal(ks[3], (out_channels,), jnp.float32))

    w2 = jax.random.uniform(ks[4], (out_channels, out_channels, 3, 3),
                            jnp.float32, -k2, k2)
    b2 = jax.random.uniform(ks[5], (out_channels,), jnp.float32, -k2, k2)
    g2 = 1.0 + 0.1 * jax.random.normal(ks[6], (out_channels,), jnp.float32)
    be2 = 0.1 * jax.random.normal(ks[7], (out_channels,), jnp.float32)
    m2 = 0.1 * jax.random.normal(ks[6], (out_channels,), jnp.float32)
    v2 = 0.5 + jnp.abs(jax.random.normal(ks[7], (out_channels,), jnp.float32))
    return (w1, b1, g1, be1, m1, v1, w2, b2, g2, be2, m2, v2)


if __name__ == "__main__":
    N, Cin, Cout, H, W = 2, 4, 8, 16, 16
    key = jax.random.PRNGKey(0)
    kx, kp = jax.random.split(key)
    x = jax.random.normal(kx, (N, Cin, H, W), jnp.float32)
    params = make_params(kp, Cin, Cout)

    # Quantize x / conv weights to bf16-representable values so the kernel's bf16 MXU
    # operands are exact and the check against the f32 reference stays tight.
    def q(a):
        return a.astype(jnp.bfloat16).astype(jnp.float32)

    (w1, b1, g1, be1, m1, v1, w2, b2, g2, be2, m2, v2) = params
    x_q = q(x)
    params_q = (q(w1), b1, g1, be1, m1, v1, q(w2), b2, g2, be2, m2, v2)

    ref = jax.block_until_ready(down_ref(x_q, params_q))

    # 1) Multi-row-block path (exercises the recomputed conv halo across blocks).
    out_blocked = jax.block_until_ready(
        down_pallas(x_q, params_q, row_block=2, nchw_out=True))
    # 2) Auto-sized row block, native bf16 NHWC output (layout used to chain stages).
    out_auto = jax.block_until_ready(down_pallas(x_q, params_q))
    out_auto = jnp.transpose(out_auto.astype(jnp.float32), (0, 3, 1, 2))

    np.testing.assert_allclose(np.asarray(out_blocked), np.asarray(ref),
                               rtol=2e-2, atol=2e-2)
    np.testing.assert_allclose(np.asarray(out_auto), np.asarray(ref),
                               rtol=2e-2, atol=2e-2)
    assert out_blocked.shape == (N, Cout, H // 2, W // 2)
    print("KERNEL_OK")
</pallas_src>

<mosaic_0001>
module attributes {stable_mosaic.version = 11 : i64} {
  func.func @_down_kernel(%arg0: i32, %arg1: i32, %arg2: memref<1x24x8x8xbf16, #tpu.memory_space<vmem>>, %arg3: memref<9x4x8xbf16, #tpu.memory_space<vmem>>, %arg4: memref<1x8xf32, #tpu.memory_space<vmem>>, %arg5: memref<1x8xf32, #tpu.memory_space<vmem>>, %arg6: memref<9x8x8xbf16, #tpu.memory_space<vmem>>, %arg7: memref<1x8xf32, #tpu.memory_space<vmem>>, %arg8: memref<1x8xf32, #tpu.memory_space<vmem>>, %arg9: memref<1x16x8xbf16, #tpu.memory_space<vmem>>, %arg10: memref<6x10x4xbf16, #tpu.memory_space<vmem>>, %arg11: memref<4x10x8xbf16, #tpu.memory_space<vmem>>, %arg12: memref<32x8xf32, #tpu.memory_space<vmem>>) attributes {dimension_semantics = [#tpu.dimension_semantics<parallel>, #tpu.dimension_semantics<parallel>], iteration_bounds = array<i64: 2, 4>, scalar_prefetch = 0 : i64, scratch_operands = 3 : i64, tpu.core_type = #tpu.core_type<tc>, window_params = [{transform_indices = @transform_0, window_bounds = array<i64: 1, 24, 8, 8>}, {pipeline_mode = #tpu.pipeline_mode<synchronous>, transform_indices = @transform_1, window_bounds = array<i64: 9, 4, 8>}, {pipeline_mode = #tpu.pipeline_mode<synchronous>, transform_indices = @transform_2, window_bounds = array<i64: 1, 8>}, {pipeline_mode = #tpu.pipeline_mode<synchronous>, transform_indices = @transform_3, window_bounds = array<i64: 1, 8>}, {pipeline_mode = #tpu.pipeline_mode<synchronous>, transform_indices = @transform_4, window_bounds = array<i64: 9, 8, 8>}, {pipeline_mode = #tpu.pipeline_mode<synchronous>, transform_indices = @transform_5, window_bounds = array<i64: 1, 8>}, {pipeline_mode = #tpu.pipeline_mode<synchronous>, transform_indices = @transform_6, window_bounds = array<i64: 1, 8>}, {transform_indices = @transform_7, window_bounds = array<i64: 1, 16, 8>}]} {
    %c4_i32 = arith.constant 4 : i32
    %0 = arith.muli %arg1, %c4_i32 : i32
    %1 = tpu.assume_multiple %0, 4 : i32
    %c0 = arith.constant 0 : index
    %2 = arith.index_cast %1 : i32 to index
    %c0_0 = arith.constant 0 : index
    %c0_1 = arith.constant 0 : index
    %3 = vector.load %arg2[%c0, %2, %c0_0, %c0_1] : memref<1x24x8x8xbf16, #tpu.memory_space<vmem>>, vector<1x12x8x8xbf16>
    %4 = vector.shape_cast %3 : vector<1x12x8x8xbf16> to vector<12x8x8xbf16>
    %5 = vector.extract_strided_slice %4 {offsets = [0, 0, 0], sizes = [12, 8, 4], strides = [1, 1, 1]} : vector<12x8x8xbf16> to vector<12x8x4xbf16>
    %6 = vector.extract_strided_slice %4 {offsets = [0, 0, 4], sizes = [12, 8, 4], strides = [1, 1, 1]} : vector<12x8x8xbf16> to vector<12x8x4xbf16>
    %7 = arith.maximumf %5, %6 : vector<12x8x4xbf16>
    %8 = vector.shape_cast %7 : vector<12x8x4xbf16> to vector<6x2x8x4xbf16>
    %9 = vector.extract_strided_slice %8 {offsets = [0, 0, 0, 0], sizes = [6, 1, 8, 4], strides = [1, 1, 1, 1]} : vector<6x2x8x4xbf16> to vector<6x1x8x4xbf16>
    %10 = vector.shape_cast %9 : vector<6x1x8x4xbf16> to vector<6x8x4xbf16>
    %11 = vector.extract_strided_slice %8 {offsets = [0, 1, 0, 0], sizes = [6, 1, 8, 4], strides = [1, 1, 1, 1]} : vector<6x2x8x4xbf16> to vector<6x1x8x4xbf16>
    %12 = vector.shape_cast %11 : vector<6x1x8x4xbf16> to vector<6x8x4xbf16>
    %13 = arith.maximumf %10, %12 : vector<6x8x4xbf16>
    %c0_2 = arith.constant 0 : index
    %c1 = arith.constant 1 : index
    %c0_3 = arith.constant 0 : index
    %14 = vector.load %arg10[%c0_2, %c1, %c0_3] : memref<6x10x4xbf16, #tpu.memory_space<vmem>>, vector<6x8x4xbf16>
    tpu.vector_store %arg10[%c0_2, %c1, %c0_3], %13 {strides = array<i32>} : memref<6x10x4xbf16, #tpu.memory_space<vmem>>, vector<6x8x4xbf16>,
    %cst = arith.constant 0.000000e+00 : bf16
    %15 = vector.broadcast %cst : bf16 to vector<6x1x4xbf16>
    %c0_4 = arith.constant 0 : index
    %c0_5 = arith.constant 0 : index
    %c0_6 = arith.constant 0 : index
    %16 = vector.load %arg10[%c0_4, %c0_5, %c0_6] : memref<6x10x4xbf16, #tpu.memory_space<vmem>>, vector<6x1x4xbf16>
    tpu.vector_store %arg10[%c0_4, %c0_5, %c0_6], %15 {strides = array<i32>} : memref<6x10x4xbf16, #tpu.memory_space<vmem>>, vector<6x1x4xbf16>,
    %cst_7 = arith.constant 0.000000e+00 : bf16
    %17 = vector.broadcast %cst_7 : bf16 to vector<6x1x4xbf16>
    %c0_8 = arith.constant 0 : index
    %c9 = arith.constant 9 : index
    %c0_9 = arith.constant 0 : index
    %18 = vector.load %arg10[%c0_8, %c9, %c0_9] : memref<6x10x4xbf16, #tpu.memory_space<vmem>>, vector<6x1x4xbf16>
    tpu.vector_store %arg10[%c0_8, %c9, %c0_9], %17 {strides = array<i32>} : memref<6x10x4xbf16, #tpu.memory_space<vmem>>, vector<6x1x4xbf16>,
    %c0_10 = arith.constant 0 : index
    %c0_11 = arith.constant 0 : index
    %c0_12 = arith.constant 0 : index
    %19 = vector.load %arg10[%c0_10, %c0_11, %c0_12] : memref<6x10x4xbf16, #tpu.memory_space<vmem>>, vector<4x8x4xbf16>
    %20 = vector.shape_cast %19 : vector<4x8x4xbf16> to vector<32x4xbf16>
    %c0_13 = arith.constant 0 : index
    %c0_14 = arith.constant 0 : index
    %c0_15 = arith.constant 0 : index
    %21 = vector.load %arg3[%c0_13, %c0_14, %c0_15] : memref<9x4x8xbf16, #tpu.memory_space<vmem>>, vector<1x4x8xbf16>
    %22 = vector.shape_cast %21 : vector<1x4x8xbf16> to vector<4x8xbf16>
    %cst_16 = arith.constant dense<0.000000e+00> : vector<32x8xf32>
    %23 = tpu.matmul %20, %22, %cst_16 {dimension_numbers = #tpu.dot_dimension_numbers<[1], [0], [0], [1], [0, 0, 1, 1], [], []>} : vector<32x4xbf16>, vector<4x8xbf16>, vector<32x8xf32> -> vector<32x8xf32>
    %c0_17 = arith.constant 0 : index
    %c0_18 = arith.constant 0 : index
    %24 = vector.load %arg12[%c0_17, %c0_18] : memref<32x8xf32, #tpu.memory_space<vmem>>, vector<32x8xf32>
    tpu.vector_store %arg12[%c0_17, %c0_18], %23 {strides = array<i32>} : memref<32x8xf32, #tpu.memory_space<vmem>>, vector<32x8xf32>,
    %c0_19 = arith.constant 0 : index
    %c1_20 = arith.constant 1 : index
    %c0_21 = arith.constant 0 : index
    %25 = vector.load %arg10[%c0_19, %c1_20, %c0_21] : memref<6x10x4xbf16, #tpu.memory_space<vmem>>, vector<4x8x4xbf16>
    %26 = vector.shape_cast %25 : vector<4x8x4xbf16> to vector<32x4xbf16>
    %c1_22 = arith.constant 1 : index
    %c0_23 = arith.constant 0 : index
    %c0_24 = arith.constant 0 : index
    %27 = vector.load %arg3[%c1_22, %c0_23, %c0_24] : memref<9x4x8xbf16, #tpu.memory_space<vmem>>, vector<1x4x8xbf16>
    %28 = vector.shape_cast %27 : vector<1x4x8xbf16> to vector<4x8xbf16>
    %cst_25 = arith.constant dense<0.000000e+00> : vector<32x8xf32>
    %29 = tpu.matmul %26, %28, %cst_25 {dimension_numbers = #tpu.dot_dimension_numbers<[1], [0], [0], [1], [0, 0, 1, 1], [], []>} : vector<32x4xbf16>, vector<4x8xbf16>, vector<32x8xf32> -> vector<32x8xf32>
    %c0_26 = arith.constant 0 : index
    %c0_27 = arith.constant 0 : index
    %30 = vector.load %arg12[%c0_26, %c0_27] : memref<32x8xf32, #tpu.memory_space<vmem>>, vector<32x8xf32>
    %31 = arith.addf %30, %29 : vector<32x8xf32>
    %c0_28 = arith.constant 0 : index
    %c0_29 = arith.constant 0 : index
    %32 = vector.load %arg12[%c0_28, %c0_29] : memref<32x8xf32, #tpu.memory_space<vmem>>, vector<32x8xf32>
    tpu.vector_store %arg12[%c0_28, %c0_29], %31 {strides = array<i32>} : memref<32x8xf32, #tpu.memory_space<vmem>>, vector<32x8xf32>,
    %c0_30 = arith.constant 0 : index
    %c2 = arith.constant 2 : index
    %c0_31 = arith.constant 0 : index
    %33 = vector.load %arg10[%c0_30, %c2, %c0_31] : memref<6x10x4xbf16, #tpu.memory_space<vmem>>, vector<4x8x4xbf16>
    %34 = vector.shape_cast %33 : vector<4x8x4xbf16> to vector<32x4xbf16>
    %c2_32 = arith.constant 2 : index
    %c0_33 = arith.constant 0 : index
    %c0_34 = arith.constant 0 : index
    %35 = vector.load %arg3[%c2_32, %c0_33, %c0_34] : memref<9x4x8xbf16, #tpu.memory_space<vmem>>, vector<1x4x8xbf16>
    %36 = vector.shape_cast %35 : vector<1x4x8xbf16> to vector<4x8xbf16>
    %cst_35 = arith.constant dense<0.000000e+00> : vector<32x8xf32>
    %37 = tpu.matmul %34, %36, %cst_35 {dimension_numbers = #tpu.dot_dimension_numbers<[1], [0], [0], [1], [0, 0, 1, 1], [], []>} : vector<32x4xbf16>, vector<4x8xbf16>, vector<32x8xf32> -> vector<32x8xf32>
    %c0_36 = arith.constant 0 : index
    %c0_37 = arith.constant 0 : index
    %38 = vector.load %arg12[%c0_36, %c0_37] : memref<32x8xf32, #tpu.memory_space<vmem>>, vector<32x8xf32>
    %39 = arith.addf %38, %37 : vector<32x8xf32>
    %c0_38 = arith.constant 0 : index
    %c0_39 = arith.constant 0 : index
    %40 = vector.load %arg12[%c0_38, %c0_39] : memref<32x8xf32, #tpu.memory_space<vmem>>, vector<32x8xf32>
    tpu.vector_store %arg12[%c0_38, %c0_39], %39 {strides = array<i32>} : memref<32x8xf32, #tpu.memory_space<vmem>>, vector<32x8xf32>,
    %c1_40 = arith.constant 1 : index
    %c0_41 = arith.constant 0 : index
    %c0_42 = arith.constant 0 : index
    %41 = vector.load %arg10[%c1_40, %c0_41, %c0_42] : memref<6x10x4xbf16, #tpu.memory_space<vmem>>, vector<4x8x4xbf16>
    %42 = vector.shape_cast %41 : vector<4x8x4xbf16> to vector<32x4xbf16>
    %c3 = arith.constant 3 : index
    %c0_43 = arith.constant 0 : index
    %c0_44 = arith.constant 0 : index
    %43 = vector.load %arg3[%c3, %c0_43, %c0_44] : memref<9x4x8xbf16, #tpu.memory_space<vmem>>, vector<1x4x8xbf16>
    %44 = vector.shape_cast %43 : vector<1x4x8xbf16> to vector<4x8xbf16>
    %cst_45 = arith.constant dense<0.000000e+00> : vector<32x8xf32>
    %45 = tpu.matmul %42, %44, %cst_45 {dimension_numbers = #tpu.dot_dimension_numbers<[1], [0], [0], [1], [0, 0, 1, 1], [], []>} : vector<32x4xbf16>, vector<4x8xbf16>, vector<32x8xf32> -> vector<32x8xf32>
    %c0_46 = arith.constant 0 : index
    %c0_47 = arith.constant 0 : index
    %46 = vector.load %arg12[%c0_46, %c0_47] : memref<32x8xf32, #tpu.memory_space<vmem>>, vector<32x8xf32>
    %47 = arith.addf %46, %45 : vector<32x8xf32>
    %c0_48 = arith.constant 0 : index
    %c0_49 = arith.constant 0 : index
    %48 = vector.load %arg12[%c0_48, %c0_49] : memref<32x8xf32, #tpu.memory_space<vmem>>, vector<32x8xf32>
    tpu.vector_store %arg12[%c0_48, %c0_49], %47 {strides = array<i32>} : memref<32x8xf32, #tpu.memory_space<vmem>>, vector<32x8xf32>,
    %c1_50 = arith.constant 1 : index
    %c1_51 = arith.constant 1 : index
    %c0_52 = arith.constant 0 : index
    %49 = vector.load %arg10[%c1_50, %c1_51, %c0_52] : memref<6x10x4xbf16, #tpu.memory_space<vmem>>, vector<4x8x4xbf16>
    %50 = vector.shape_cast %49 : vector<4x8x4xbf16> to vector<32x4xbf16>
    %c4 = arith.constant 4 : index
    %c0_53 = arith.constant 0 : index
    %c0_54 = arith.constant 0 : index
    %51 = vector.load %arg3[%c4, %c0_53, %c0_54] : memref<9x4x8xbf16, #tpu.memory_space<vmem>>, vector<1x4x8xbf16>
    %52 = vector.shape_cast %51 : vector<1x4x8xbf16> to vector<4x8xbf16>
    %cst_55 = arith.constant dense<0.000000e+00> : vector<32x8xf32>
    %53 = tpu.matmul %50, %52, %cst_55 {dimension_numbers = #tpu.dot_dimension_numbers<[1], [0], [0], [1], [0, 0, 1, 1], [], []>} : vector<32x4xbf16>, vector<4x8xbf16>, vector<32x8xf32> -> vector<32x8xf32>
    %c0_56 = arith.constant 0 : index
    %c0_57 = arith.constant 0 : index
    %54 = vector.load %arg12[%c0_56, %c0_57] : memref<32x8xf32, #tpu.memory_space<vmem>>, vector<32x8xf32>
    %55 = arith.addf %54, %53 : vector<32x8xf32>
    %c0_58 = arith.constant 0 : index
    %c0_59 = arith.constant 0 : index
    %56 = vector.load %arg12[%c0_58, %c0_59] : memref<32x8xf32, #tpu.memory_space<vmem>>, vector<32x8xf32>
    tpu.vector_store %arg12[%c0_58, %c0_59], %55 {strides = array<i32>} : memref<32x8xf32, #tpu.memory_space<vmem>>, vector<32x8xf32>,
    %c1_60 = arith.constant 1 : index
    %c2_61 = arith.constant 2 : index
    %c0_62 = arith.constant 0 : index
    %57 = vector.load %arg10[%c1_60, %c2_61, %c0_62] : memref<6x10x4xbf16, #tpu.memory_space<vmem>>, vector<4x8x4xbf16>
    %58 = vector.shape_cast %57 : vector<4x8x4xbf16> to vector<32x4xbf16>
    %c5 = arith.constant 5 : index
    %c0_63 = arith.constant 0 : index
    %c0_64 = arith.constant 0 : index
    %59 = vector.load %arg3[%c5, %c0_63, %c0_64] : memref<9x4x8xbf16, #tpu.memory_space<vmem>>, vector<1x4x8xbf16>
    %60 = vector.shape_cast %59 : vector<1x4x8xbf16> to vector<4x8xbf16>
    %cst_65 = arith.constant dense<0.000000e+00> : vector<32x8xf32>
    %61 = tpu.matmul %58, %60, %cst_65 {dimension_numbers = #tpu.dot_dimension_numbers<[1], [0], [0], [1], [0, 0, 1, 1], [], []>} : vector<32x4xbf16>, vector<4x8xbf16>, vector<32x8xf32> -> vector<32x8xf32>
    %c0_66 = arith.constant 0 : index
    %c0_67 = arith.constant 0 : index
    %62 = vector.load %arg12[%c0_66, %c0_67] : memref<32x8xf32, #tpu.memory_space<vmem>>, vector<32x8xf32>
    %63 = arith.addf %62, %61 : vector<32x8xf32>
    %c0_68 = arith.constant 0 : index
    %c0_69 = arith.constant 0 : index
    %64 = vector.load %arg12[%c0_68, %c0_69] : memref<32x8xf32, #tpu.memory_space<vmem>>, vector<32x8xf32>
    tpu.vector_store %arg12[%c0_68, %c0_69], %63 {strides = array<i32>} : memref<32x8xf32, #tpu.memory_space<vmem>>, vector<32x8xf32>,
    %c2_70 = arith.constant 2 : index
    %c0_71 = arith.constant 0 : index
    %c0_72 = arith.constant 0 : index
    %65 = vector.load %arg10[%c2_70, %c0_71, %c0_72] : memref<6x10x4xbf16, #tpu.memory_space<vmem>>, vector<4x8x4xbf16>
    %66 = vector.shape_cast %65 : vector<4x8x4xbf16> to vector<32x4xbf16>
    %c6 = arith.constant 6 : index
    %c0_73 = arith.constant 0 : index
    %c0_74 = arith.constant 0 : index
    %67 = vector.load %arg3[%c6, %c0_73, %c0_74] : memref<9x4x8xbf16, #tpu.memory_space<vmem>>, vector<1x4x8xbf16>
    %68 = vector.shape_cast %67 : vector<1x4x8xbf16> to vector<4x8xbf16>
    %cst_75 = arith.constant dense<0.000000e+00> : vector<32x8xf32>
    %69 = tpu.matmul %66, %68, %cst_75 {dimension_numbers = #tpu.dot_dimension_numbers<[1], [0], [0], [1], [0, 0, 1, 1], [], []>} : vector<32x4xbf16>, vector<4x8xbf16>, vector<32x8xf32> -> vector<32x8xf32>
    %c0_76 = arith.constant 0 : index
    %c0_77 = arith.constant 0 : index
    %70 = vector.load %arg12[%c0_76, %c0_77] : memref<32x8xf32, #tpu.memory_space<vmem>>, vector<32x8xf32>
    %71 = arith.addf %70, %69 : vector<32x8xf32>
    %c0_78 = arith.constant 0 : index
    %c0_79 = arith.constant 0 : index
    %72 = vector.load %arg12[%c0_78, %c0_79] : memref<32x8xf32, #tpu.memory_space<vmem>>, vector<32x8xf32>
    tpu.vector_store %arg12[%c0_78, %c0_79], %71 {strides = array<i32>} : memref<32x8xf32, #tpu.memory_space<vmem>>, vector<32x8xf32>,
    %c2_80 = arith.constant 2 : index
    %c1_81 = arith.constant 1 : index
    %c0_82 = arith.constant 0 : index
    %73 = vector.load %arg10[%c2_80, %c1_81, %c0_82] : memref<6x10x4xbf16, #tpu.memory_space<vmem>>, vector<4x8x4xbf16>
    %74 = vector.shape_cast %73 : vector<4x8x4xbf16> to vector<32x4xbf16>
    %c7 = arith.constant 7 : index
    %c0_83 = arith.constant 0 : index
    %c0_84 = arith.constant 0 : index
    %75 = vector.load %arg3[%c7, %c0_83, %c0_84] : memref<9x4x8xbf16, #tpu.memory_space<vmem>>, vector<1x4x8xbf16>
    %76 = vector.shape_cast %75 : vector<1x4x8xbf16> to vector<4x8xbf16>
    %cst_85 = arith.constant dense<0.000000e+00> : vector<32x8xf32>
    %77 = tpu.matmul %74, %76, %cst_85 {dimension_numbers = #tpu.dot_dimension_numbers<[1], [0], [0], [1], [0, 0, 1, 1], [], []>} : vector<32x4xbf16>, vector<4x8xbf16>, vector<32x8xf32> -> vector<32x8xf32>
    %c0_86 = arith.constant 0 : index
    %c0_87 = arith.constant 0 : index
    %78 = vector.load %arg12[%c0_86, %c0_87] : memref<32x8xf32, #tpu.memory_space<vmem>>, vector<32x8xf32>
    %79 = arith.addf %78, %77 : vector<32x8xf32>
    %c0_88 = arith.constant 0 : index
    %c0_89 = arith.constant 0 : index
    %80 = vector.load %arg12[%c0_88, %c0_89] : memref<32x8xf32, #tpu.memory_space<vmem>>, vector<32x8xf32>
    tpu.vector_store %arg12[%c0_88, %c0_89], %79 {strides = array<i32>} : memref<32x8xf32, #tpu.memory_space<vmem>>, vector<32x8xf32>,
    %c2_90 = arith.constant 2 : index
    %c2_91 = arith.constant 2 : index
    %c0_92 = arith.constant 0 : index
    %81 = vector.load %arg10[%c2_90, %c2_91, %c0_92] : memref<6x10x4xbf16, #tpu.memory_space<vmem>>, vector<4x8x4xbf16>
    %82 = vector.shape_cast %81 : vector<4x8x4xbf16> to vector<32x4xbf16>
    %c8 = arith.constant 8 : index
    %c0_93 = arith.constant 0 : index
    %c0_94 = arith.constant 0 : index
    %83 = vector.load %arg3[%c8, %c0_93, %c0_94] : memref<9x4x8xbf16, #tpu.memory_space<vmem>>, vector<1x4x8xbf16>
    %84 = vector.shape_cast %83 : vector<1x4x8xbf16> to vector<4x8xbf16>
    %cst_95 = arith.constant dense<0.000000e+00> : vector<32x8xf32>
    %85 = tpu.matmul %82, %84, %cst_95 {dimension_numbers = #tpu.dot_dimension_numbers<[1], [0], [0], [1], [0, 0, 1, 1], [], []>} : vector<32x4xbf16>, vector<4x8xbf16>, vector<32x8xf32> -> vector<32x8xf32>
    %c0_96 = arith.constant 0 : index
    %c0_97 = arith.constant 0 : index
    %86 = vector.load %arg12[%c0_96, %c0_97] : memref<32x8xf32, #tpu.memory_space<vmem>>, vector<32x8xf32>
    %87 = arith.addf %86, %85 : vector<32x8xf32>
    %c0_98 = arith.constant 0 : index
    %c0_99 = arith.constant 0 : index
    %88 = vector.load %arg12[%c0_98, %c0_99] : memref<32x8xf32, #tpu.memory_space<vmem>>, vector<32x8xf32>
    tpu.vector_store %arg12[%c0_98, %c0_99], %87 {strides = array<i32>} : memref<32x8xf32, #tpu.memory_space<vmem>>, vector<32x8xf32>,
    %c0_100 = arith.constant 0 : index
    %c0_101 = arith.constant 0 : index
    %89 = vector.load %arg12[%c0_100, %c0_101] : memref<32x8xf32, #tpu.memory_space<vmem>>, vector<32x8xf32>
    %c0_102 = arith.constant 0 : index
    %c0_103 = arith.constant 0 : index
    %90 = vector.load %arg4[%c0_102, %c0_103] : memref<1x8xf32, #tpu.memory_space<vmem>>, vector<1x8xf32>
    %91 = vector.broadcast %90 : vector<1x8xf32> to vector<32x8xf32>
    %92 = arith.mulf %89, %91 : vector<32x8xf32>
    %c0_104 = arith.constant 0 : index
    %c0_105 = arith.constant 0 : index
    %93 = vector.load %arg5[%c0_104, %c0_105] : memref<1x8xf32, #tpu.memory_space<vmem>>, vector<1x8xf32>
    %94 = vector.broadcast %93 : vector<1x8xf32> to vector<32x8xf32>
    %95 = arith.addf %92, %94 : vector<32x8xf32>
    %cst_106 = arith.constant 0.000000e+00 : f32
    %96 = vector.broadcast %cst_106 : f32 to vector<32x8xf32>
    %97 = arith.maximumf %95, %96 : vector<32x8xf32>
    %98 = arith.truncf %97 : vector<32x8xf32> to vector<32x8xbf16>
    %99 = vector.shape_cast %98 : vector<32x8xbf16> to vector<4x8x8xbf16>
    %c0_107 = arith.constant 0 : index
    %c1_108 = arith.constant 1 : index
    %c0_109 = arith.constant 0 : index
    %100 = vector.load %arg11[%c0_107, %c1_108, %c0_109] : memref<4x10x8xbf16, #tpu.memory_space<vmem>>, vector<4x8x8xbf16>
    tpu.vector_store %arg11[%c0_107, %c1_108, %c0_109], %99 {strides = array<i32>} : memref<4x10x8xbf16, #tpu.memory_space<vmem>>, vector<4x8x8xbf16>,
    %cst_110 = arith.constant 0.000000e+00 : bf16
    %101 = vector.broadcast %cst_110 : bf16 to vector<4x1x8xbf16>
    %c0_111 = arith.constant 0 : index
    %c0_112 = arith.constant 0 : index
    %c0_113 = arith.constant 0 : index
    %102 = vector.load %arg11[%c0_111, %c0_112, %c0_113] : memref<4x10x8xbf16, #tpu.memory_space<vmem>>, vector<4x1x8xbf16>
    tpu.vector_store %arg11[%c0_111, %c0_112, %c0_113], %101 {strides = array<i32>} : memref<4x10x8xbf16, #tpu.memory_space<vmem>>, vector<4x1x8xbf16>,
    %cst_114 = arith.constant 0.000000e+00 : bf16
    %103 = vector.broadcast %cst_114 : bf16 to vector<4x1x8xbf16>
    %c0_115 = arith.constant 0 : index
    %c9_116 = arith.constant 9 : index
    %c0_117 = arith.constant 0 : index
    %104 = vector.load %arg11[%c0_115, %c9_116, %c0_117] : memref<4x10x8xbf16, #tpu.memory_space<vmem>>, vector<4x1x8xbf16>
    tpu.vector_store %arg11[%c0_115, %c9_116, %c0_117], %103 {strides = array<i32>} : memref<4x10x8xbf16, #tpu.memory_space<vmem>>, vector<4x1x8xbf16>,
    %c0_i32 = arith.constant 0 : i32
    %105 = arith.cmpi eq, %arg1, %c0_i32 : i32
    %106 = arith.extui %105 : i1 to i32
    %c0_i32_118 = arith.constant 0 : i32
    %107 = arith.cmpi ne, %106, %c0_i32_118 : i32
    scf.if %107 {
      %cst_227 = arith.constant 0.000000e+00 : bf16
      %194 = vector.broadcast %cst_227 : bf16 to vector<1x10x8xbf16>
      %c0_228 = arith.constant 0 : index
      %c0_229 = arith.constant 0 : index
      %c0_230 = arith.constant 0 : index
      %195 = vector.load %arg11[%c0_228, %c0_229, %c0_230] : memref<4x10x8xbf16, #tpu.memory_space<vmem>>, vector<1x10x8xbf16>
      tpu.vector_store %arg11[%c0_228, %c0_229, %c0_230], %194 {strides = array<i32>} : memref<4x10x8xbf16, #tpu.memory_space<vmem>>, vector<1x10x8xbf16>,
    } else {
    }
    %c3_i32 = arith.constant 3 : i32
    %108 = arith.cmpi eq, %arg1, %c3_i32 : i32
    %109 = arith.extui %108 : i1 to i32
    %c0_i32_119 = arith.constant 0 : i32
    %110 = arith.cmpi ne, %109, %c0_i32_119 : i32
    scf.if %110 {
      %cst_227 = arith.constant 0.000000e+00 : bf16
      %194 = vector.broadcast %cst_227 : bf16 to vector<1x10x8xbf16>
      %c3_228 = arith.constant 3 : index
      %c0_229 = arith.constant 0 : index
      %c0_230 = arith.constant 0 : index
      %195 = vector.load %arg11[%c3_228, %c0_229, %c0_230] : memref<4x10x8xbf16, #tpu.memory_space<vmem>>, vector<1x10x8xbf16>
      tpu.vector_store %arg11[%c3_228, %c0_229, %c0_230], %194 {strides = array<i32>} : memref<4x10x8xbf16, #tpu.memory_space<vmem>>, vector<1x10x8xbf16>,
    } else {
    }
    %c0_120 = arith.constant 0 : index
    %c0_121 = arith.constant 0 : index
    %c0_122 = arith.constant 0 : index
    %111 = vector.load %arg11[%c0_120, %c0_121, %c0_122] : memref<4x10x8xbf16, #tpu.memory_space<vmem>>, vector<2x8x8xbf16>
    %112 = vector.shape_cast %111 : vector<2x8x8xbf16> to vector<16x8xbf16>
    %c0_123 = arith.constant 0 : index
    %c0_124 = arith.constant 0 : index
    %c0_125 = arith.constant 0 : index
    %113 = vector.load %arg6[%c0_123, %c0_124, %c0_125] : memref<9x8x8xbf16, #tpu.memory_space<vmem>>, vector<1x8x8xbf16>
    %114 = vector.shape_cast %113 : vector<1x8x8xbf16> to vector<8x8xbf16>
    %cst_126 = arith.constant dense<0.000000e+00> : vector<16x8xf32>
    %115 = tpu.matmul %112, %114, %cst_126 {dimension_numbers = #tpu.dot_dimension_numbers<[1], [0], [0], [1], [0, 0, 1, 1], [], []>} : vector<16x8xbf16>, vector<8x8xbf16>, vector<16x8xf32> -> vector<16x8xf32>
    %c0_127 = arith.constant 0 : index
    %c0_128 = arith.constant 0 : index
    %116 = vector.load %arg12[%c0_127, %c0_128] : memref<32x8xf32, #tpu.memory_space<vmem>>, vector<16x8xf32>
    tpu.vector_store %arg12[%c0_127, %c0_128], %115 {strides = array<i32>} : memref<32x8xf32, #tpu.memory_space<vmem>>, vector<16x8xf32>,
    %c0_129 = arith.constant 0 : index
    %c1_130 = arith.constant 1 : index
    %c0_131 = arith.constant 0 : index
    %117 = vector.load %arg11[%c0_129, %c1_130, %c0_131] : memref<4x10x8xbf16, #tpu.memory_space<vmem>>, vector<2x8x8xbf16>
    %118 = vector.shape_cast %117 : vector<2x8x8xbf16> to vector<16x8xbf16>
    %c1_132 = arith.constant 1 : index
    %c0_133 = arith.constant 0 : index
    %c0_134 = arith.constant 0 : index
    %119 = vector.load %arg6[%c1_132, %c0_133, %c0_134] : memref<9x8x8xbf16, #tpu.memory_space<vmem>>, vector<1x8x8xbf16>
    %120 = vector.shape_cast %119 : vector<1x8x8xbf16> to vector<8x8xbf16>
    %cst_135 = arith.constant dense<0.000000e+00> : vector<16x8xf32>
    %121 = tpu.matmul %118, %120, %cst_135 {dimension_numbers = #tpu.dot_dimension_numbers<[1], [0], [0], [1], [0, 0, 1, 1], [], []>} : vector<16x8xbf16>, vector<8x8xbf16>, vector<16x8xf32> -> vector<16x8xf32>
    %c0_136 = arith.constant 0 : index
    %c0_137 = arith.constant 0 : index
    %122 = vector.load %arg12[%c0_136, %c0_137] : memref<32x8xf32, #tpu.memory_space<vmem>>, vector<16x8xf32>
    %123 = arith.addf %122, %121 : vector<16x8xf32>
    %c0_138 = arith.constant 0 : index
    %c0_139 = arith.constant 0 : index
    %124 = vector.load %arg12[%c0_138, %c0_139] : memref<32x8xf32, #tpu.memory_space<vmem>>, vector<16x8xf32>
    tpu.vector_store %arg12[%c0_138, %c0_139], %123 {strides = array<i32>} : memref<32x8xf32, #tpu.memory_space<vmem>>, vector<16x8xf32>,
    %c0_140 = arith.constant 0 : index
    %c2_141 = arith.constant 2 : index
    %c0_142 = arith.constant 0 : index
    %125 = vector.load %arg11[%c0_140, %c2_141, %c0_142] : memref<4x10x8xbf16, #tpu.memory_space<vmem>>, vector<2x8x8xbf16>
    %126 = vector.shape_cast %125 : vector<2x8x8xbf16> to vector<16x8xbf16>
    %c2_143 = arith.constant 2 : index
    %c0_144 = arith.constant 0 : index
    %c0_145 = arith.constant 0 : index
    %127 = vector.load %arg6[%c2_143, %c0_144, %c0_145] : memref<9x8x8xbf16, #tpu.memory_space<vmem>>, vector<1x8x8xbf16>
    %128 = vector.shape_cast %127 : vector<1x8x8xbf16> to vector<8x8xbf16>
    %cst_146 = arith.constant dense<0.000000e+00> : vector<16x8xf32>
    %129 = tpu.matmul %126, %128, %cst_146 {dimension_numbers = #tpu.dot_dimension_numbers<[1], [0], [0], [1], [0, 0, 1, 1], [], []>} : vector<16x8xbf16>, vector<8x8xbf16>, vector<16x8xf32> -> vector<16x8xf32>
    %c0_147 = arith.constant 0 : index
    %c0_148 = arith.constant 0 : index
    %130 = vector.load %arg12[%c0_147, %c0_148] : memref<32x8xf32, #tpu.memory_space<vmem>>, vector<16x8xf32>
    %131 = arith.addf %130, %129 : vector<16x8xf32>
    %c0_149 = arith.constant 0 : index
    %c0_150 = arith.constant 0 : index
    %132 = vector.load %arg12[%c0_149, %c0_150] : memref<32x8xf32, #tpu.memory_space<vmem>>, vector<16x8xf32>
    tpu.vector_store %arg12[%c0_149, %c0_150], %131 {strides = array<i32>} : memref<32x8xf32, #tpu.memory_space<vmem>>, vector<16x8xf32>,
    %c1_151 = arith.constant 1 : index
    %c0_152 = arith.constant 0 : index
    %c0_153 = arith.constant 0 : index
    %133 = vector.load %arg11[%c1_151, %c0_152, %c0_153] : memref<4x10x8xbf16, #tpu.memory_space<vmem>>, vector<2x8x8xbf16>
    %134 = vector.shape_cast %133 : vector<2x8x8xbf16> to vector<16x8xbf16>
    %c3_154 = arith.constant 3 : index
    %c0_155 = arith.constant 0 : index
    %c0_156 = arith.constant 0 : index
    %135 = vector.load %arg6[%c3_154, %c0_155, %c0_156] : memref<9x8x8xbf16, #tpu.memory_space<vmem>>, vector<1x8x8xbf16>
    %136 = vector.shape_cast %135 : vector<1x8x8xbf16> to vector<8x8xbf16>
    %cst_157 = arith.constant dense<0.000000e+00> : vector<16x8xf32>
    %137 = tpu.matmul %134, %136, %cst_157 {dimension_numbers = #tpu.dot_dimension_numbers<[1], [0], [0], [1], [0, 0, 1, 1], [], []>} : vector<16x8xbf16>, vector<8x8xbf16>, vector<16x8xf32> -> vector<16x8xf32>
    %c0_158 = arith.constant 0 : index
    %c0_159 = arith.constant 0 : index
    %138 = vector.load %arg12[%c0_158, %c0_159] : memref<32x8xf32, #tpu.memory_space<vmem>>, vector<16x8xf32>
    %139 = arith.addf %138, %137 : vector<16x8xf32>
    %c0_160 = arith.constant 0 : index
    %c0_161 = arith.constant 0 : index
    %140 = vector.load %arg12[%c0_160, %c0_161] : memref<32x8xf32, #tpu.memory_space<vmem>>, vector<16x8xf32>
    tpu.vector_store %arg12[%c0_160, %c0_161], %139 {strides = array<i32>} : memref<32x8xf32, #tpu.memory_space<vmem>>, vector<16x8xf32>,
    %c1_162 = arith.constant 1 : index
    %c1_163 = arith.constant 1 : index
    %c0_164 = arith.constant 0 : index
    %141 = vector.load %arg11[%c1_162, %c1_163, %c0_164] : memref<4x10x8xbf16, #tpu.memory_space<vmem>>, vector<2x8x8xbf16>
    %142 = vector.shape_cast %141 : vector<2x8x8xbf16> to vector<16x8xbf16>
    %c4_165 = arith.constant 4 : index
    %c0_166 = arith.constant 0 : index
    %c0_167 = arith.constant 0 : index
    %143 = vector.load %arg6[%c4_165, %c0_166, %c0_167] : memref<9x8x8xbf16, #tpu.memory_space<vmem>>, vector<1x8x8xbf16>
    %144 = vector.shape_cast %143 : vector<1x8x8xbf16> to vector<8x8xbf16>
    %cst_168 = arith.constant dense<0.000000e+00> : vector<16x8xf32>
    %145 = tpu.matmul %142, %144, %cst_168 {dimension_numbers = #tpu.dot_dimension_numbers<[1], [0], [0], [1], [0, 0, 1, 1], [], []>} : vector<16x8xbf16>, vector<8x8xbf16>, vector<16x8xf32> -> vector<16x8xf32>
    %c0_169 = arith.constant 0 : index
    %c0_170 = arith.constant 0 : index
    %146 = vector.load %arg12[%c0_169, %c0_170] : memref<32x8xf32, #tpu.memory_space<vmem>>, vector<16x8xf32>
    %147 = arith.addf %146, %145 : vector<16x8xf32>
    %c0_171 = arith.constant 0 : index
    %c0_172 = arith.constant 0 : index
    %148 = vector.load %arg12[%c0_171, %c0_172] : memref<32x8xf32, #tpu.memory_space<vmem>>, vector<16x8xf32>
    tpu.vector_store %arg12[%c0_171, %c0_172], %147 {strides = array<i32>} : memref<32x8xf32, #tpu.memory_space<vmem>>, vector<16x8xf32>,
    %c1_173 = arith.constant 1 : index
    %c2_174 = arith.constant 2 : index
    %c0_175 = arith.constant 0 : index
    %149 = vector.load %arg11[%c1_173, %c2_174, %c0_175] : memref<4x10x8xbf16, #tpu.memory_space<vmem>>, vector<2x8x8xbf16>
    %150 = vector.shape_cast %149 : vector<2x8x8xbf16> to vector<16x8xbf16>
    %c5_176 = arith.constant 5 : index
    %c0_177 = arith.constant 0 : index
    %c0_178 = arith.constant 0 : index
    %151 = vector.load %arg6[%c5_176, %c0_177, %c0_178] : memref<9x8x8xbf16, #tpu.memory_space<vmem>>, vector<1x8x8xbf16>
    %152 = vector.shape_cast %151 : vector<1x8x8xbf16> to vector<8x8xbf16>
    %cst_179 = arith.constant dense<0.000000e+00> : vector<16x8xf32>
    %153 = tpu.matmul %150, %152, %cst_179 {dimension_numbers = #tpu.dot_dimension_numbers<[1], [0], [0], [1], [0, 0, 1, 1], [], []>} : vector<16x8xbf16>, vector<8x8xbf16>, vector<16x8xf32> -> vector<16x8xf32>
    %c0_180 = arith.constant 0 : index
    %c0_181 = arith.constant 0 : index
    %154 = vector.load %arg12[%c0_180, %c0_181] : memref<32x8xf32, #tpu.memory_space<vmem>>, vector<16x8xf32>
    %155 = arith.addf %154, %153 : vector<16x8xf32>
    %c0_182 = arith.constant 0 : index
    %c0_183 = arith.constant 0 : index
    %156 = vector.load %arg12[%c0_182, %c0_183] : memref<32x8xf32, #tpu.memory_space<vmem>>, vector<16x8xf32>
    tpu.vector_store %arg12[%c0_182, %c0_183], %155 {strides = array<i32>} : memref<32x8xf32, #tpu.memory_space<vmem>>, vector<16x8xf32>,
    %c2_184 = arith.constant 2 : index
    %c0_185 = arith.constant 0 : index
    %c0_186 = arith.constant 0 : index
    %157 = vector.load %arg11[%c2_184, %c0_185, %c0_186] : memref<4x10x8xbf16, #tpu.memory_space<vmem>>, vector<2x8x8xbf16>
    %158 = vector.shape_cast %157 : vector<2x8x8xbf16> to vector<16x8xbf16>
    %c6_187 = arith.constant 6 : index
    %c0_188 = arith.constant 0 : index
    %c0_189 = arith.constant 0 : index
    %159 = vector.load %arg6[%c6_187, %c0_188, %c0_189] : memref<9x8x8xbf16, #tpu.memory_space<vmem>>, vector<1x8x8xbf16>
    %160 = vector.shape_cast %159 : vector<1x8x8xbf16> to vector<8x8xbf16>
    %cst_190 = arith.constant dense<0.000000e+00> : vector<16x8xf32>
    %161 = tpu.matmul %158, %160, %cst_190 {dimension_numbers = #tpu.dot_dimension_numbers<[1], [0], [0], [1], [0, 0, 1, 1], [], []>} : vector<16x8xbf16>, vector<8x8xbf16>, vector<16x8xf32> -> vector<16x8xf32>
    %c0_191 = arith.constant 0 : index
    %c0_192 = arith.constant 0 : index
    %162 = vector.load %arg12[%c0_191, %c0_192] : memref<32x8xf32, #tpu.memory_space<vmem>>, vector<16x8xf32>
    %163 = arith.addf %162, %161 : vector<16x8xf32>
    %c0_193 = arith.constant 0 : index
    %c0_194 = arith.constant 0 : index
    %164 = vector.load %arg12[%c0_193, %c0_194] : memref<32x8xf32, #tpu.memory_space<vmem>>, vector<16x8xf32>
    tpu.vector_store %arg12[%c0_193, %c0_194], %163 {strides = array<i32>} : memref<32x8xf32, #tpu.memory_space<vmem>>, vector<16x8xf32>,
    %c2_195 = arith.constant 2 : index
    %c1_196 = arith.constant 1 : index
    %c0_197 = arith.constant 0 : index
    %165 = vector.load %arg11[%c2_195, %c1_196, %c0_197] : memref<4x10x8xbf16, #tpu.memory_space<vmem>>, vector<2x8x8xbf16>
    %166 = vector.shape_cast %165 : vector<2x8x8xbf16> to vector<16x8xbf16>
    %c7_198 = arith.constant 7 : index
    %c0_199 = arith.constant 0 : index
    %c0_200 = arith.constant 0 : index
    %167 = vector.load %arg6[%c7_198, %c0_199, %c0_200] : memref<9x8x8xbf16, #tpu.memory_space<vmem>>, vector<1x8x8xbf16>
    %168 = vector.shape_cast %167 : vector<1x8x8xbf16> to vector<8x8xbf16>
    %cst_201 = arith.constant dense<0.000000e+00> : vector<16x8xf32>
    %169 = tpu.matmul %166, %168, %cst_201 {dimension_numbers = #tpu.dot_dimension_numbers<[1], [0], [0], [1], [0, 0, 1, 1], [], []>} : vector<16x8xbf16>, vector<8x8xbf16>, vector<16x8xf32> -> vector<16x8xf32>
    %c0_202 = arith.constant 0 : index
    %c0_203 = arith.constant 0 : index
    %170 = vector.load %arg12[%c0_202, %c0_203] : memref<32x8xf32, #tpu.memory_space<vmem>>, vector<16x8xf32>
    %171 = arith.addf %170, %169 : vector<16x8xf32>
    %c0_204 = arith.constant 0 : index
    %c0_205 = arith.constant 0 : index
    %172 = vector.load %arg12[%c0_204, %c0_205] : memref<32x8xf32, #tpu.memory_space<vmem>>, vector<16x8xf32>
    tpu.vector_store %arg12[%c0_204, %c0_205], %171 {strides = array<i32>} : memref<32x8xf32, #tpu.memory_space<vmem>>, vector<16x8xf32>,
    %c2_206 = arith.constant 2 : index
    %c2_207 = arith.constant 2 : index
    %c0_208 = arith.constant 0 : index
    %173 = vector.load %arg11[%c2_206, %c2_207, %c0_208] : memref<4x10x8xbf16, #tpu.memory_space<vmem>>, vector<2x8x8xbf16>
    %174 = vector.shape_cast %173 : vector<2x8x8xbf16> to vector<16x8xbf16>
    %c8_209 = arith.constant 8 : index
    %c0_210 = arith.constant 0 : index
    %c0_211 = arith.constant 0 : index
    %175 = vector.load %arg6[%c8_209, %c0_210, %c0_211] : memref<9x8x8xbf16, #tpu.memory_space<vmem>>, vector<1x8x8xbf16>
    %176 = vector.shape_cast %175 : vector<1x8x8xbf16> to vector<8x8xbf16>
    %cst_212 = arith.constant dense<0.000000e+00> : vector<16x8xf32>
    %177 = tpu.matmul %174, %176, %cst_212 {dimension_numbers = #tpu.dot_dimension_numbers<[1], [0], [0], [1], [0, 0, 1, 1], [], []>} : vector<16x8xbf16>, vector<8x8xbf16>, vector<16x8xf32> -> vector<16x8xf32>
    %c0_213 = arith.constant 0 : index
    %c0_214 = arith.constant 0 : index
    %178 = vector.load %arg12[%c0_213, %c0_214] : memref<32x8xf32, #tpu.memory_space<vmem>>, vector<16x8xf32>
    %179 = arith.addf %178, %177 : vector<16x8xf32>
    %c0_215 = arith.constant 0 : index
    %c0_216 = arith.constant 0 : index
    %180 = vector.load %arg12[%c0_215, %c0_216] : memref<32x8xf32, #tpu.memory_space<vmem>>, vector<16x8xf32>
    tpu.vector_store %arg12[%c0_215, %c0_216], %179 {strides = array<i32>} : memref<32x8xf32, #tpu.memory_space<vmem>>, vector<16x8xf32>,
    %c0_217 = arith.constant 0 : index
    %c0_218 = arith.constant 0 : index
    %181 = vector.load %arg12[%c0_217, %c0_218] : memref<32x8xf32, #tpu.memory_space<vmem>>, vector<16x8xf32>
    %c0_219 = arith.constant 0 : index
    %c0_220 = arith.constant 0 : index
    %182 = vector.load %arg7[%c0_219, %c0_220] : memref<1x8xf32, #tpu.memory_space<vmem>>, vector<1x8xf32>
    %183 = vector.broadcast %182 : vector<1x8xf32> to vector<16x8xf32>
    %184 = arith.mulf %181, %183 : vector<16x8xf32>
    %c0_221 = arith.constant 0 : index
    %c0_222 = arith.constant 0 : index
    %185 = vector.load %arg8[%c0_221, %c0_222] : memref<1x8xf32, #tpu.memory_space<vmem>>, vector<1x8xf32>
    %186 = vector.broadcast %185 : vector<1x8xf32> to vector<16x8xf32>
    %187 = arith.addf %184, %186 : vector<16x8xf32>
    %cst_223 = arith.constant 0.000000e+00 : f32
    %188 = vector.broadcast %cst_223 : f32 to vector<16x8xf32>
    %189 = arith.maximumf %187, %188 : vector<16x8xf32>
    %190 = arith.truncf %189 : vector<16x8xf32> to vector<16x8xbf16>
    %c0_224 = arith.constant 0 : index
    %c0_225 = arith.constant 0 : index
    %c0_226 = arith.constant 0 : index
    %191 = vector.load %arg9[%c0_224, %c0_225, %c0_226] : memref<1x16x8xbf16, #tpu.memory_space<vmem>>, vector<1x16x8xbf16>
    %192 = vector.shape_cast %191 : vector<1x16x8xbf16> to vector<16x8xbf16>
    %193 = vector.shape_cast %190 : vector<16x8xbf16> to vector<1x16x8xbf16>
    tpu.vector_store %arg9[%c0_224, %c0_225, %c0_226], %193 {strides = array<i32>} : memref<1x16x8xbf16, #tpu.memory_space<vmem>>, vector<1x16x8xbf16>,
    return
  }
  func.func @transform_0(%arg0: i32, %arg1: i32) -> (i32, i32, i32, i32) {
    %c0_i32 = arith.constant 0 : i32
    %c0_i32_0 = arith.constant 0 : i32
    %c0_i32_1 = arith.constant 0 : i32
    %c0_i32_2 = arith.constant 0 : i32
    return %arg0, %c0_i32, %c0_i32_0, %c0_i32_1 : i32, i32, i32, i32
  }
  func.func @transform_1(%arg0: i32, %arg1: i32) -> (i32, i32, i32) {
    %c0_i32 = arith.constant 0 : i32
    %c0_i32_0 = arith.constant 0 : i32
    %c0_i32_1 = arith.constant 0 : i32
    %c0_i32_2 = arith.constant 0 : i32
    return %c0_i32, %c0_i32_0, %c0_i32_1 : i32, i32, i32
  }
  func.func @transform_2(%arg0: i32, %arg1: i32) -> (i32, i32) {
    %c0_i32 = arith.constant 0 : i32
    %c0_i32_0 = arith.constant 0 : i32
    %c0_i32_1 = arith.constant 0 : i32
    return %c0_i32, %c0_i32_0 : i32, i32
  }
  func.func @transform_3(%arg0: i32, %arg1: i32) -> (i32, i32) {
    %c0_i32 = arith.constant 0 : i32
    %c0_i32_0 = arith.constant 0 : i32
    %c0_i32_1 = arith.constant 0 : i32
    return %c0_i32, %c0_i32_0 : i32, i32
  }
  func.func @transform_4(%arg0: i32, %arg1: i32) -> (i32, i32, i32) {
    %c0_i32 = arith.constant 0 : i32
    %c0_i32_0 = arith.constant 0 : i32
    %c0_i32_1 = arith.constant 0 : i32
    %c0_i32_2 = arith.constant 0 : i32
    return %c0_i32, %c0_i32_0, %c0_i32_1 : i32, i32, i32
  }
  func.func @transform_5(%arg0: i32, %arg1: i32) -> (i32, i32) {
    %c0_i32 = arith.constant 0 : i32
    %c0_i32_0 = arith.constant 0 : i32
    %c0_i32_1 = arith.constant 0 : i32
    return %c0_i32, %c0_i32_0 : i32, i32
  }
  func.func @transform_6(%arg0: i32, %arg1: i32) -> (i32, i32) {
    %c0_i32 = arith.constant 0 : i32
    %c0_i32_0 = arith.constant 0 : i32
    %c0_i32_1 = arith.constant 0 : i32
    return %c0_i32, %c0_i32_0 : i32, i32
  }
  func.func @transform_7(%arg0: i32, %arg1: i32) -> (i32, i32, i32) {
    %c0_i32 = arith.constant 0 : i32
    %c0_i32_0 = arith.constant 0 : i32
    return %arg0, %arg1, %c0_i32 : i32, i32, i32
  }
}

module attributes {stable_mosaic.version = 11 : i64} {
  func.func @_down_kernel(%arg0: i32, %arg1: i32, %arg2: memref<1x24x8x8xbf16, #tpu.memory_space<vmem>>, %arg3: memref<9x4x8xbf16, #tpu.memory_space<vmem>>, %arg4: memref<1x8xf32, #tpu.memory_space<vmem>>, %arg5: memref<1x8xf32, #tpu.memory_space<vmem>>, %arg6: memref<9x8x8xbf16, #tpu.memory_space<vmem>>, %arg7: memref<1x8xf32, #tpu.memory_space<vmem>>, %arg8: memref<1x8xf32, #tpu.memory_space<vmem>>, %arg9: memref<1x16x8xbf16, #tpu.memory_space<vmem>>, %arg10: memref<6x10x4xbf16, #tpu.memory_space<vmem>>, %arg11: memref<4x10x8xbf16, #tpu.memory_space<vmem>>, %arg12: memref<32x8xf32, #tpu.memory_space<vmem>>) attributes {dimension_semantics = [#tpu.dimension_semantics<parallel>, #tpu.dimension_semantics<parallel>], iteration_bounds = array<i64: 2, 4>, scalar_prefetch = 0 : i64, scratch_operands = 3 : i64, tpu.core_type = #tpu.core_type<tc>, window_params = [{transform_indices = @transform_0, window_bounds = array<i64: 1, 24, 8, 8>}, {pipeline_mode = #tpu.pipeline_mode<synchronous>, transform_indices = @transform_1, window_bounds = array<i64: 9, 4, 8>}, {pipeline_mode = #tpu.pipeline_mode<synchronous>, transform_indices = @transform_2, window_bounds = array<i64: 1, 8>}, {pipeline_mode = #tpu.pipeline_mode<synchronous>, transform_indices = @transform_3, window_bounds = array<i64: 1, 8>}, {pipeline_mode = #tpu.pipeline_mode<synchronous>, transform_indices = @transform_4, window_bounds = array<i64: 9, 8, 8>}, {pipeline_mode = #tpu.pipeline_mode<synchronous>, transform_indices = @transform_5, window_bounds = array<i64: 1, 8>}, {pipeline_mode = #tpu.pipeline_mode<synchronous>, transform_indices = @transform_6, window_bounds = array<i64: 1, 8>}, {transform_indices = @transform_7, window_bounds = array<i64: 1, 16, 8>}]} {
    %c4_i32 = arith.constant 4 : i32
    %0 = arith.muli %arg1, %c4_i32 : i32
    %1 = tpu.assume_multiple %0, 4 : i32
    %c0 = arith.constant 0 : index
    %2 = arith.index_cast %1 : i32 to index
    %c0_0 = arith.constant 0 : index
    %c0_1 = arith.constant 0 : index
    %3 = vector.load %arg2[%c0, %2, %c0_0, %c0_1] : memref<1x24x8x8xbf16, #tpu.memory_space<vmem>>, vector<1x12x8x8xbf16>
    %4 = vector.shape_cast %3 : vector<1x12x8x8xbf16> to vector<12x8x8xbf16>
    %5 = vector.extract_strided_slice %4 {offsets = [0, 0, 0], sizes = [12, 8, 4], strides = [1, 1, 1]} : vector<12x8x8xbf16> to vector<12x8x4xbf16>
    %6 = vector.extract_strided_slice %4 {offsets = [0, 0, 4], sizes = [12, 8, 4], strides = [1, 1, 1]} : vector<12x8x8xbf16> to vector<12x8x4xbf16>
    %7 = arith.maximumf %5, %6 : vector<12x8x4xbf16>
    %8 = vector.shape_cast %7 : vector<12x8x4xbf16> to vector<6x2x8x4xbf16>
    %9 = vector.extract_strided_slice %8 {offsets = [0, 0, 0, 0], sizes = [6, 1, 8, 4], strides = [1, 1, 1, 1]} : vector<6x2x8x4xbf16> to vector<6x1x8x4xbf16>
    %10 = vector.shape_cast %9 : vector<6x1x8x4xbf16> to vector<6x8x4xbf16>
    %11 = vector.extract_strided_slice %8 {offsets = [0, 1, 0, 0], sizes = [6, 1, 8, 4], strides = [1, 1, 1, 1]} : vector<6x2x8x4xbf16> to vector<6x1x8x4xbf16>
    %12 = vector.shape_cast %11 : vector<6x1x8x4xbf16> to vector<6x8x4xbf16>
    %13 = arith.maximumf %10, %12 : vector<6x8x4xbf16>
    %c0_2 = arith.constant 0 : index
    %c1 = arith.constant 1 : index
    %c0_3 = arith.constant 0 : index
    %14 = vector.load %arg10[%c0_2, %c1, %c0_3] : memref<6x10x4xbf16, #tpu.memory_space<vmem>>, vector<6x8x4xbf16>
    tpu.vector_store %arg10[%c0_2, %c1, %c0_3], %13 {strides = array<i32>} : memref<6x10x4xbf16, #tpu.memory_space<vmem>>, vector<6x8x4xbf16>,
    %cst = arith.constant 0.000000e+00 : bf16
    %15 = vector.broadcast %cst : bf16 to vector<6x1x4xbf16>
    %c0_4 = arith.constant 0 : index
    %c0_5 = arith.constant 0 : index
    %c0_6 = arith.constant 0 : index
    %16 = vector.load %arg10[%c0_4, %c0_5, %c0_6] : memref<6x10x4xbf16, #tpu.memory_space<vmem>>, vector<6x1x4xbf16>
    tpu.vector_store %arg10[%c0_4, %c0_5, %c0_6], %15 {strides = array<i32>} : memref<6x10x4xbf16, #tpu.memory_space<vmem>>, vector<6x1x4xbf16>,
    %cst_7 = arith.constant 0.000000e+00 : bf16
    %17 = vector.broadcast %cst_7 : bf16 to vector<6x1x4xbf16>
    %c0_8 = arith.constant 0 : index
    %c9 = arith.constant 9 : index
    %c0_9 = arith.constant 0 : index
    %18 = vector.load %arg10[%c0_8, %c9, %c0_9] : memref<6x10x4xbf16, #tpu.memory_space<vmem>>, vector<6x1x4xbf16>
    tpu.vector_store %arg10[%c0_8, %c9, %c0_9], %17 {strides = array<i32>} : memref<6x10x4xbf16, #tpu.memory_space<vmem>>, vector<6x1x4xbf16>,
    %c0_10 = arith.constant 0 : index
    %c0_11 = arith.constant 0 : index
    %c0_12 = arith.constant 0 : index
    %19 = vector.load %arg10[%c0_10, %c0_11, %c0_12] : memref<6x10x4xbf16, #tpu.memory_space<vmem>>, vector<4x8x4xbf16>
    %20 = vector.shape_cast %19 : vector<4x8x4xbf16> to vector<32x4xbf16>
    %c0_13 = arith.constant 0 : index
    %c0_14 = arith.constant 0 : index
    %c0_15 = arith.constant 0 : index
    %21 = vector.load %arg3[%c0_13, %c0_14, %c0_15] : memref<9x4x8xbf16, #tpu.memory_space<vmem>>, vector<1x4x8xbf16>
    %22 = vector.shape_cast %21 : vector<1x4x8xbf16> to vector<4x8xbf16>
    %cst_16 = arith.constant dense<0.000000e+00> : vector<32x8xf32>
    %23 = tpu.matmul %20, %22, %cst_16 {dimension_numbers = #tpu.dot_dimension_numbers<[1], [0], [0], [1], [0, 0, 1, 1], [], []>} : vector<32x4xbf16>, vector<4x8xbf16>, vector<32x8xf32> -> vector<32x8xf32>
    %c0_17 = arith.constant 0 : index
    %c0_18 = arith.constant 0 : index
    %24 = vector.load %arg12[%c0_17, %c0_18] : memref<32x8xf32, #tpu.memory_space<vmem>>, vector<32x8xf32>
    tpu.vector_store %arg12[%c0_17, %c0_18], %23 {strides = array<i32>} : memref<32x8xf32, #tpu.memory_space<vmem>>, vector<32x8xf32>,
    %c0_19 = arith.constant 0 : index
    %c1_20 = arith.constant 1 : index
    %c0_21 = arith.constant 0 : index
    %25 = vector.load %arg10[%c0_19, %c1_20, %c0_21] : memref<6x10x4xbf16, #tpu.memory_space<vmem>>, vector<4x8x4xbf16>
    %26 = vector.shape_cast %25 : vector<4x8x4xbf16> to vector<32x4xbf16>
    %c1_22 = arith.constant 1 : index
    %c0_23 = arith.constant 0 : index
    %c0_24 = arith.constant 0 : index
    %27 = vector.load %arg3[%c1_22, %c0_23, %c0_24] : memref<9x4x8xbf16, #tpu.memory_space<vmem>>, vector<1x4x8xbf16>
    %28 = vector.shape_cast %27 : vector<1x4x8xbf16> to vector<4x8xbf16>
    %cst_25 = arith.constant dense<0.000000e+00> : vector<32x8xf32>
    %29 = tpu.matmul %26, %28, %cst_25 {dimension_numbers = #tpu.dot_dimension_numbers<[1], [0], [0], [1], [0, 0, 1, 1], [], []>} : vector<32x4xbf16>, vector<4x8xbf16>, vector<32x8xf32> -> vector<32x8xf32>
    %c0_26 = arith.constant 0 : index
    %c0_27 = arith.constant 0 : index
    %30 = vector.load %arg12[%c0_26, %c0_27] : memref<32x8xf32, #tpu.memory_space<vmem>>, vector<32x8xf32>
    %31 = arith.addf %30, %29 : vector<32x8xf32>
    %c0_28 = arith.constant 0 : index
    %c0_29 = arith.constant 0 : index
    %32 = vector.load %arg12[%c0_28, %c0_29] : memref<32x8xf32, #tpu.memory_space<vmem>>, vector<32x8xf32>
    tpu.vector_store %arg12[%c0_28, %c0_29], %31 {strides = array<i32>} : memref<32x8xf32, #tpu.memory_space<vmem>>, vector<32x8xf32>,
    %c0_30 = arith.constant 0 : index
    %c2 = arith.constant 2 : index
    %c0_31 = arith.constant 0 : index
    %33 = vector.load %arg10[%c0_30, %c2, %c0_31] : memref<6x10x4xbf16, #tpu.memory_space<vmem>>, vector<4x8x4xbf16>
    %34 = vector.shape_cast %33 : vector<4x8x4xbf16> to vector<32x4xbf16>
    %c2_32 = arith.constant 2 : index
    %c0_33 = arith.constant 0 : index
    %c0_34 = arith.constant 0 : index
    %35 = vector.load %arg3[%c2_32, %c0_33, %c0_34] : memref<9x4x8xbf16, #tpu.memory_space<vmem>>, vector<1x4x8xbf16>
    %36 = vector.shape_cast %35 : vector<1x4x8xbf16> to vector<4x8xbf16>
    %cst_35 = arith.constant dense<0.000000e+00> : vector<32x8xf32>
    %37 = tpu.matmul %34, %36, %cst_35 {dimension_numbers = #tpu.dot_dimension_numbers<[1], [0], [0], [1], [0, 0, 1, 1], [], []>} : vector<32x4xbf16>, vector<4x8xbf16>, vector<32x8xf32> -> vector<32x8xf32>
    %c0_36 = arith.constant 0 : index
    %c0_37 = arith.constant 0 : index
    %38 = vector.load %arg12[%c0_36, %c0_37] : memref<32x8xf32, #tpu.memory_space<vmem>>, vector<32x8xf32>
    %39 = arith.addf %38, %37 : vector<32x8xf32>
    %c0_38 = arith.constant 0 : index
    %c0_39 = arith.constant 0 : index
    %40 = vector.load %arg12[%c0_38, %c0_39] : memref<32x8xf32, #tpu.memory_space<vmem>>, vector<32x8xf32>
    tpu.vector_store %arg12[%c0_38, %c0_39], %39 {strides = array<i32>} : memref<32x8xf32, #tpu.memory_space<vmem>>, vector<32x8xf32>,
    %c1_40 = arith.constant 1 : index
    %c0_41 = arith.constant 0 : index
    %c0_42 = arith.constant 0 : index
    %41 = vector.load %arg10[%c1_40, %c0_41, %c0_42] : memref<6x10x4xbf16, #tpu.memory_space<vmem>>, vector<4x8x4xbf16>
    %42 = vector.shape_cast %41 : vector<4x8x4xbf16> to vector<32x4xbf16>
    %c3 = arith.constant 3 : index
    %c0_43 = arith.constant 0 : index
    %c0_44 = arith.constant 0 : index
    %43 = vector.load %arg3[%c3, %c0_43, %c0_44] : memref<9x4x8xbf16, #tpu.memory_space<vmem>>, vector<1x4x8xbf16>
    %44 = vector.shape_cast %43 : vector<1x4x8xbf16> to vector<4x8xbf16>
    %cst_45 = arith.constant dense<0.000000e+00> : vector<32x8xf32>
    %45 = tpu.matmul %42, %44, %cst_45 {dimension_numbers = #tpu.dot_dimension_numbers<[1], [0], [0], [1], [0, 0, 1, 1], [], []>} : vector<32x4xbf16>, vector<4x8xbf16>, vector<32x8xf32> -> vector<32x8xf32>
    %c0_46 = arith.constant 0 : index
    %c0_47 = arith.constant 0 : index
    %46 = vector.load %arg12[%c0_46, %c0_47] : memref<32x8xf32, #tpu.memory_space<vmem>>, vector<32x8xf32>
    %47 = arith.addf %46, %45 : vector<32x8xf32>
    %c0_48 = arith.constant 0 : index
    %c0_49 = arith.constant 0 : index
    %48 = vector.load %arg12[%c0_48, %c0_49] : memref<32x8xf32, #tpu.memory_space<vmem>>, vector<32x8xf32>
    tpu.vector_store %arg12[%c0_48, %c0_49], %47 {strides = array<i32>} : memref<32x8xf32, #tpu.memory_space<vmem>>, vector<32x8xf32>,
    %c1_50 = arith.constant 1 : index
    %c1_51 = arith.constant 1 : index
    %c0_52 = arith.constant 0 : index
    %49 = vector.load %arg10[%c1_50, %c1_51, %c0_52] : memref<6x10x4xbf16, #tpu.memory_space<vmem>>, vector<4x8x4xbf16>
    %50 = vector.shape_cast %49 : vector<4x8x4xbf16> to vector<32x4xbf16>
    %c4 = arith.constant 4 : index
    %c0_53 = arith.constant 0 : index
    %c0_54 = arith.constant 0 : index
    %51 = vector.load %arg3[%c4, %c0_53, %c0_54] : memref<9x4x8xbf16, #tpu.memory_space<vmem>>, vector<1x4x8xbf16>
    %52 = vector.shape_cast %51 : vector<1x4x8xbf16> to vector<4x8xbf16>
    %cst_55 = arith.constant dense<0.000000e+00> : vector<32x8xf32>
    %53 = tpu.matmul %50, %52, %cst_55 {dimension_numbers = #tpu.dot_dimension_numbers<[1], [0], [0], [1], [0, 0, 1, 1], [], []>} : vector<32x4xbf16>, vector<4x8xbf16>, vector<32x8xf32> -> vector<32x8xf32>
    %c0_56 = arith.constant 0 : index
    %c0_57 = arith.constant 0 : index
    %54 = vector.load %arg12[%c0_56, %c0_57] : memref<32x8xf32, #tpu.memory_space<vmem>>, vector<32x8xf32>
    %55 = arith.addf %54, %53 : vector<32x8xf32>
    %c0_58 = arith.constant 0 : index
    %c0_59 = arith.constant 0 : index
    %56 = vector.load %arg12[%c0_58, %c0_59] : memref<32x8xf32, #tpu.memory_space<vmem>>, vector<32x8xf32>
    tpu.vector_store %arg12[%c0_58, %c0_59], %55 {strides = array<i32>} : memref<32x8xf32, #tpu.memory_space<vmem>>, vector<32x8xf32>,
    %c1_60 = arith.constant 1 : index
    %c2_61 = arith.constant 2 : index
    %c0_62 = arith.constant 0 : index
    %57 = vector.load %arg10[%c1_60, %c2_61, %c0_62] : memref<6x10x4xbf16, #tpu.memory_space<vmem>>, vector<4x8x4xbf16>
    %58 = vector.shape_cast %57 : vector<4x8x4xbf16> to vector<32x4xbf16>
    %c5 = arith.constant 5 : index
    %c0_63 = arith.constant 0 : index
    %c0_64 = arith.constant 0 : index
    %59 = vector.load %arg3[%c5, %c0_63, %c0_64] : memref<9x4x8xbf16, #tpu.memory_space<vmem>>, vector<1x4x8xbf16>
    %60 = vector.shape_cast %59 : vector<1x4x8xbf16> to vector<4x8xbf16>
    %cst_65 = arith.constant dense<0.000000e+00> : vector<32x8xf32>
    %61 = tpu.matmul %58, %60, %cst_65 {dimension_numbers = #tpu.dot_dimension_numbers<[1], [0], [0], [1], [0, 0, 1, 1], [], []>} : vector<32x4xbf16>, vector<4x8xbf16>, vector<32x8xf32> -> vector<32x8xf32>
    %c0_66 = arith.constant 0 : index
    %c0_67 = arith.constant 0 : index
    %62 = vector.load %arg12[%c0_66, %c0_67] : memref<32x8xf32, #tpu.memory_space<vmem>>, vector<32x8xf32>
    %63 = arith.addf %62, %61 : vector<32x8xf32>
    %c0_68 = arith.constant 0 : index
    %c0_69 = arith.constant 0 : index
    %64 = vector.load %arg12[%c0_68, %c0_69] : memref<32x8xf32, #tpu.memory_space<vmem>>, vector<32x8xf32>
    tpu.vector_store %arg12[%c0_68, %c0_69], %63 {strides = array<i32>} : memref<32x8xf32, #tpu.memory_space<vmem>>, vector<32x8xf32>,
    %c2_70 = arith.constant 2 : index
    %c0_71 = arith.constant 0 : index
    %c0_72 = arith.constant 0 : index
    %65 = vector.load %arg10[%c2_70, %c0_71, %c0_72] : memref<6x10x4xbf16, #tpu.memory_space<vmem>>, vector<4x8x4xbf16>
    %66 = vector.shape_cast %65 : vector<4x8x4xbf16> to vector<32x4xbf16>
    %c6 = arith.constant 6 : index
    %c0_73 = arith.constant 0 : index
    %c0_74 = arith.constant 0 : index
    %67 = vector.load %arg3[%c6, %c0_73, %c0_74] : memref<9x4x8xbf16, #tpu.memory_space<vmem>>, vector<1x4x8xbf16>
    %68 = vector.shape_cast %67 : vector<1x4x8xbf16> to vector<4x8xbf16>
    %cst_75 = arith.constant dense<0.000000e+00> : vector<32x8xf32>
    %69 = tpu.matmul %66, %68, %cst_75 {dimension_numbers = #tpu.dot_dimension_numbers<[1], [0], [0], [1], [0, 0, 1, 1], [], []>} : vector<32x4xbf16>, vector<4x8xbf16>, vector<32x8xf32> -> vector<32x8xf32>
    %c0_76 = arith.constant 0 : index
    %c0_77 = arith.constant 0 : index
    %70 = vector.load %arg12[%c0_76, %c0_77] : memref<32x8xf32, #tpu.memory_space<vmem>>, vector<32x8xf32>
    %71 = arith.addf %70, %69 : vector<32x8xf32>
    %c0_78 = arith.constant 0 : index
    %c0_79 = arith.constant 0 : index
    %72 = vector.load %arg12[%c0_78, %c0_79] : memref<32x8xf32, #tpu.memory_space<vmem>>, vector<32x8xf32>
    tpu.vector_store %arg12[%c0_78, %c0_79], %71 {strides = array<i32>} : memref<32x8xf32, #tpu.memory_space<vmem>>, vector<32x8xf32>,
    %c2_80 = arith.constant 2 : index
    %c1_81 = arith.constant 1 : index
    %c0_82 = arith.constant 0 : index
    %73 = vector.load %arg10[%c2_80, %c1_81, %c0_82] : memref<6x10x4xbf16, #tpu.memory_space<vmem>>, vector<4x8x4xbf16>
    %74 = vector.shape_cast %73 : vector<4x8x4xbf16> to vector<32x4xbf16>
    %c7 = arith.constant 7 : index
    %c0_83 = arith.constant 0 : index
    %c0_84 = arith.constant 0 : index
    %75 = vector.load %arg3[%c7, %c0_83, %c0_84] : memref<9x4x8xbf16, #tpu.memory_space<vmem>>, vector<1x4x8xbf16>
    %76 = vector.shape_cast %75 : vector<1x4x8xbf16> to vector<4x8xbf16>
    %cst_85 = arith.constant dense<0.000000e+00> : vector<32x8xf32>
    %77 = tpu.matmul %74, %76, %cst_85 {dimension_numbers = #tpu.dot_dimension_numbers<[1], [0], [0], [1], [0, 0, 1, 1], [], []>} : vector<32x4xbf16>, vector<4x8xbf16>, vector<32x8xf32> -> vector<32x8xf32>
    %c0_86 = arith.constant 0 : index
    %c0_87 = arith.constant 0 : index
    %78 = vector.load %arg12[%c0_86, %c0_87] : memref<32x8xf32, #tpu.memory_space<vmem>>, vector<32x8xf32>
    %79 = arith.addf %78, %77 : vector<32x8xf32>
    %c0_88 = arith.constant 0 : index
    %c0_89 = arith.constant 0 : index
    %80 = vector.load %arg12[%c0_88, %c0_89] : memref<32x8xf32, #tpu.memory_space<vmem>>, vector<32x8xf32>
    tpu.vector_store %arg12[%c0_88, %c0_89], %79 {strides = array<i32>} : memref<32x8xf32, #tpu.memory_space<vmem>>, vector<32x8xf32>,
    %c2_90 = arith.constant 2 : index
    %c2_91 = arith.constant 2 : index
    %c0_92 = arith.constant 0 : index
    %81 = vector.load %arg10[%c2_90, %c2_91, %c0_92] : memref<6x10x4xbf16, #tpu.memory_space<vmem>>, vector<4x8x4xbf16>
    %82 = vector.shape_cast %81 : vector<4x8x4xbf16> to vector<32x4xbf16>
    %c8 = arith.constant 8 : index
    %c0_93 = arith.constant 0 : index
    %c0_94 = arith.constant 0 : index
    %83 = vector.load %arg3[%c8, %c0_93, %c0_94] : memref<9x4x8xbf16, #tpu.memory_space<vmem>>, vector<1x4x8xbf16>
    %84 = vector.shape_cast %83 : vector<1x4x8xbf16> to vector<4x8xbf16>
    %cst_95 = arith.constant dense<0.000000e+00> : vector<32x8xf32>
    %85 = tpu.matmul %82, %84, %cst_95 {dimension_numbers = #tpu.dot_dimension_numbers<[1], [0], [0], [1], [0, 0, 1, 1], [], []>} : vector<32x4xbf16>, vector<4x8xbf16>, vector<32x8xf32> -> vector<32x8xf32>
    %c0_96 = arith.constant 0 : index
    %c0_97 = arith.constant 0 : index
    %86 = vector.load %arg12[%c0_96, %c0_97] : memref<32x8xf32, #tpu.memory_space<vmem>>, vector<32x8xf32>
    %87 = arith.addf %86, %85 : vector<32x8xf32>
    %c0_98 = arith.constant 0 : index
    %c0_99 = arith.constant 0 : index
    %88 = vector.load %arg12[%c0_98, %c0_99] : memref<32x8xf32, #tpu.memory_space<vmem>>, vector<32x8xf32>
    tpu.vector_store %arg12[%c0_98, %c0_99], %87 {strides = array<i32>} : memref<32x8xf32, #tpu.memory_space<vmem>>, vector<32x8xf32>,
    %c0_100 = arith.constant 0 : index
    %c0_101 = arith.constant 0 : index
    %89 = vector.load %arg12[%c0_100, %c0_101] : memref<32x8xf32, #tpu.memory_space<vmem>>, vector<32x8xf32>
    %c0_102 = arith.constant 0 : index
    %c0_103 = arith.constant 0 : index
    %90 = vector.load %arg4[%c0_102, %c0_103] : memref<1x8xf32, #tpu.memory_space<vmem>>, vector<1x8xf32>
    %91 = vector.broadcast %90 : vector<1x8xf32> to vector<32x8xf32>
    %92 = arith.mulf %89, %91 : vector<32x8xf32>
    %c0_104 = arith.constant 0 : index
    %c0_105 = arith.constant 0 : index
    %93 = vector.load %arg5[%c0_104, %c0_105] : memref<1x8xf32, #tpu.memory_space<vmem>>, vector<1x8xf32>
    %94 = vector.broadcast %93 : vector<1x8xf32> to vector<32x8xf32>
    %95 = arith.addf %92, %94 : vector<32x8xf32>
    %cst_106 = arith.constant 0.000000e+00 : f32
    %96 = vector.broadcast %cst_106 : f32 to vector<32x8xf32>
    %97 = arith.maximumf %95, %96 : vector<32x8xf32>
    %98 = arith.truncf %97 : vector<32x8xf32> to vector<32x8xbf16>
    %99 = vector.shape_cast %98 : vector<32x8xbf16> to vector<4x8x8xbf16>
    %c0_107 = arith.constant 0 : index
    %c1_108 = arith.constant 1 : index
    %c0_109 = arith.constant 0 : index
    %100 = vector.load %arg11[%c0_107, %c1_108, %c0_109] : memref<4x10x8xbf16, #tpu.memory_space<vmem>>, vector<4x8x8xbf16>
    tpu.vector_store %arg11[%c0_107, %c1_108, %c0_109], %99 {strides = array<i32>} : memref<4x10x8xbf16, #tpu.memory_space<vmem>>, vector<4x8x8xbf16>,
    %cst_110 = arith.constant 0.000000e+00 : bf16
    %101 = vector.broadcast %cst_110 : bf16 to vector<4x1x8xbf16>
    %c0_111 = arith.constant 0 : index
    %c0_112 = arith.constant 0 : index
    %c0_113 = arith.constant 0 : index
    %102 = vector.load %arg11[%c0_111, %c0_112, %c0_113] : memref<4x10x8xbf16, #tpu.memory_space<vmem>>, vector<4x1x8xbf16>
    tpu.vector_store %arg11[%c0_111, %c0_112, %c0_113], %101 {strides = array<i32>} : memref<4x10x8xbf16, #tpu.memory_space<vmem>>, vector<4x1x8xbf16>,
    %cst_114 = arith.constant 0.000000e+00 : bf16
    %103 = vector.broadcast %cst_114 : bf16 to vector<4x1x8xbf16>
    %c0_115 = arith.constant 0 : index
    %c9_116 = arith.constant 9 : index
    %c0_117 = arith.constant 0 : index
    %104 = vector.load %arg11[%c0_115, %c9_116, %c0_117] : memref<4x10x8xbf16, #tpu.memory_space<vmem>>, vector<4x1x8xbf16>
    tpu.vector_store %arg11[%c0_115, %c9_116, %c0_117], %103 {strides = array<i32>} : memref<4x10x8xbf16, #tpu.memory_space<vmem>>, vector<4x1x8xbf16>,
    %c0_i32 = arith.constant 0 : i32
    %105 = arith.cmpi eq, %arg1, %c0_i32 : i32
    %106 = arith.extui %105 : i1 to i32
    %c0_i32_118 = arith.constant 0 : i32
    %107 = arith.cmpi ne, %106, %c0_i32_118 : i32
    scf.if %107 {
      %cst_227 = arith.constant 0.000000e+00 : bf16
      %194 = vector.broadcast %cst_227 : bf16 to vector<1x10x8xbf16>
      %c0_228 = arith.constant 0 : index
      %c0_229 = arith.constant 0 : index
      %c0_230 = arith.constant 0 : index
      %195 = vector.load %arg11[%c0_228, %c0_229, %c0_230] : memref<4x10x8xbf16, #tpu.memory_space<vmem>>, vector<1x10x8xbf16>
      tpu.vector_store %arg11[%c0_228, %c0_229, %c0_230], %194 {strides = array<i32>} : memref<4x10x8xbf16, #tpu.memory_space<vmem>>, vector<1x10x8xbf16>,
    } else {
    }
    %c3_i32 = arith.constant 3 : i32
    %108 = arith.cmpi eq, %arg1, %c3_i32 : i32
    %109 = arith.extui %108 : i1 to i32
    %c0_i32_119 = arith.constant 0 : i32
    %110 = arith.cmpi ne, %109, %c0_i32_119 : i32
    scf.if %110 {
      %cst_227 = arith.constant 0.000000e+00 : bf16
      %194 = vector.broadcast %cst_227 : bf16 to vector<1x10x8xbf16>
      %c3_228 = arith.constant 3 : index
      %c0_229 = arith.constant 0 : index
      %c0_230 = arith.constant 0 : index
      %195 = vector.load %arg11[%c3_228, %c0_229, %c0_230] : memref<4x10x8xbf16, #tpu.memory_space<vmem>>, vector<1x10x8xbf16>
      tpu.vector_store %arg11[%c3_228, %c0_229, %c0_230], %194 {strides = array<i32>} : memref<4x10x8xbf16, #tpu.memory_space<vmem>>, vector<1x10x8xbf16>,
    } else {
    }
    %c0_120 = arith.constant 0 : index
    %c0_121 = arith.constant 0 : index
    %c0_122 = arith.constant 0 : index
    %111 = vector.load %arg11[%c0_120, %c0_121, %c0_122] : memref<4x10x8xbf16, #tpu.memory_space<vmem>>, vector<2x8x8xbf16>
    %112 = vector.shape_cast %111 : vector<2x8x8xbf16> to vector<16x8xbf16>
    %c0_123 = arith.constant 0 : index
    %c0_124 = arith.constant 0 : index
    %c0_125 = arith.constant 0 : index
    %113 = vector.load %arg6[%c0_123, %c0_124, %c0_125] : memref<9x8x8xbf16, #tpu.memory_space<vmem>>, vector<1x8x8xbf16>
    %114 = vector.shape_cast %113 : vector<1x8x8xbf16> to vector<8x8xbf16>
    %cst_126 = arith.constant dense<0.000000e+00> : vector<16x8xf32>
    %115 = tpu.matmul %112, %114, %cst_126 {dimension_numbers = #tpu.dot_dimension_numbers<[1], [0], [0], [1], [0, 0, 1, 1], [], []>} : vector<16x8xbf16>, vector<8x8xbf16>, vector<16x8xf32> -> vector<16x8xf32>
    %c0_127 = arith.constant 0 : index
    %c0_128 = arith.constant 0 : index
    %116 = vector.load %arg12[%c0_127, %c0_128] : memref<32x8xf32, #tpu.memory_space<vmem>>, vector<16x8xf32>
    tpu.vector_store %arg12[%c0_127, %c0_128], %115 {strides = array<i32>} : memref<32x8xf32, #tpu.memory_space<vmem>>, vector<16x8xf32>,
    %c0_129 = arith.constant 0 : index
    %c1_130 = arith.constant 1 : index
    %c0_131 = arith.constant 0 : index
    %117 = vector.load %arg11[%c0_129, %c1_130, %c0_131] : memref<4x10x8xbf16, #tpu.memory_space<vmem>>, vector<2x8x8xbf16>
    %118 = vector.shape_cast %117 : vector<2x8x8xbf16> to vector<16x8xbf16>
    %c1_132 = arith.constant 1 : index
    %c0_133 = arith.constant 0 : index
    %c0_134 = arith.constant 0 : index
    %119 = vector.load %arg6[%c1_132, %c0_133, %c0_134] : memref<9x8x8xbf16, #tpu.memory_space<vmem>>, vector<1x8x8xbf16>
    %120 = vector.shape_cast %119 : vector<1x8x8xbf16> to vector<8x8xbf16>
    %cst_135 = arith.constant dense<0.000000e+00> : vector<16x8xf32>
    %121 = tpu.matmul %118, %120, %cst_135 {dimension_numbers = #tpu.dot_dimension_numbers<[1], [0], [0], [1], [0, 0, 1, 1], [], []>} : vector<16x8xbf16>, vector<8x8xbf16>, vector<16x8xf32> -> vector<16x8xf32>
    %c0_136 = arith.constant 0 : index
    %c0_137 = arith.constant 0 : index
    %122 = vector.load %arg12[%c0_136, %c0_137] : memref<32x8xf32, #tpu.memory_space<vmem>>, vector<16x8xf32>
    %123 = arith.addf %122, %121 : vector<16x8xf32>
    %c0_138 = arith.constant 0 : index
    %c0_139 = arith.constant 0 : index
    %124 = vector.load %arg12[%c0_138, %c0_139] : memref<32x8xf32, #tpu.memory_space<vmem>>, vector<16x8xf32>
    tpu.vector_store %arg12[%c0_138, %c0_139], %123 {strides = array<i32>} : memref<32x8xf32, #tpu.memory_space<vmem>>, vector<16x8xf32>,
    %c0_140 = arith.constant 0 : index
    %c2_141 = arith.constant 2 : index
    %c0_142 = arith.constant 0 : index
    %125 = vector.load %arg11[%c0_140, %c2_141, %c0_142] : memref<4x10x8xbf16, #tpu.memory_space<vmem>>, vector<2x8x8xbf16>
    %126 = vector.shape_cast %125 : vector<2x8x8xbf16> to vector<16x8xbf16>
    %c2_143 = arith.constant 2 : index
    %c0_144 = arith.constant 0 : index
    %c0_145 = arith.constant 0 : index
    %127 = vector.load %arg6[%c2_143, %c0_144, %c0_145] : memref<9x8x8xbf16, #tpu.memory_space<vmem>>, vector<1x8x8xbf16>
    %128 = vector.shape_cast %127 : vector<1x8x8xbf16> to vector<8x8xbf16>
    %cst_146 = arith.constant dense<0.000000e+00> : vector<16x8xf32>
    %129 = tpu.matmul %126, %128, %cst_146 {dimension_numbers = #tpu.dot_dimension_numbers<[1], [0], [0], [1], [0, 0, 1, 1], [], []>} : vector<16x8xbf16>, vector<8x8xbf16>, vector<16x8xf32> -> vector<16x8xf32>
    %c0_147 = arith.constant 0 : index
    %c0_148 = arith.constant 0 : index
    %130 = vector.load %arg12[%c0_147, %c0_148] : memref<32x8xf32, #tpu.memory_space<vmem>>, vector<16x8xf32>
    %131 = arith.addf %130, %129 : vector<16x8xf32>
    %c0_149 = arith.constant 0 : index
    %c0_150 = arith.constant 0 : index
    %132 = vector.load %arg12[%c0_149, %c0_150] : memref<32x8xf32, #tpu.memory_space<vmem>>, vector<16x8xf32>
    tpu.vector_store %arg12[%c0_149, %c0_150], %131 {strides = array<i32>} : memref<32x8xf32, #tpu.memory_space<vmem>>, vector<16x8xf32>,
    %c1_151 = arith.constant 1 : index
    %c0_152 = arith.constant 0 : index
    %c0_153 = arith.constant 0 : index
    %133 = vector.load %arg11[%c1_151, %c0_152, %c0_153] : memref<4x10x8xbf16, #tpu.memory_space<vmem>>, vector<2x8x8xbf16>
    %134 = vector.shape_cast %133 : vector<2x8x8xbf16> to vector<16x8xbf16>
    %c3_154 = arith.constant 3 : index
    %c0_155 = arith.constant 0 : index
    %c0_156 = arith.constant 0 : index
    %135 = vector.load %arg6[%c3_154, %c0_155, %c0_156] : memref<9x8x8xbf16, #tpu.memory_space<vmem>>, vector<1x8x8xbf16>
    %136 = vector.shape_cast %135 : vector<1x8x8xbf16> to vector<8x8xbf16>
    %cst_157 = arith.constant dense<0.000000e+00> : vector<16x8xf32>
    %137 = tpu.matmul %134, %136, %cst_157 {dimension_numbers = #tpu.dot_dimension_numbers<[1], [0], [0], [1], [0, 0, 1, 1], [], []>} : vector<16x8xbf16>, vector<8x8xbf16>, vector<16x8xf32> -> vector<16x8xf32>
    %c0_158 = arith.constant 0 : index
    %c0_159 = arith.constant 0 : index
    %138 = vector.load %arg12[%c0_158, %c0_159] : memref<32x8xf32, #tpu.memory_space<vmem>>, vector<16x8xf32>
    %139 = arith.addf %138, %137 : vector<16x8xf32>
    %c0_160 = arith.constant 0 : index
    %c0_161 = arith.constant 0 : index
    %140 = vector.load %arg12[%c0_160, %c0_161] : memref<32x8xf32, #tpu.memory_space<vmem>>, vector<16x8xf32>
    tpu.vector_store %arg12[%c0_160, %c0_161], %139 {strides = array<i32>} : memref<32x8xf32, #tpu.memory_space<vmem>>, vector<16x8xf32>,
    %c1_162 = arith.constant 1 : index
    %c1_163 = arith.constant 1 : index
    %c0_164 = arith.constant 0 : index
    %141 = vector.load %arg11[%c1_162, %c1_163, %c0_164] : memref<4x10x8xbf16, #tpu.memory_space<vmem>>, vector<2x8x8xbf16>
    %142 = vector.shape_cast %141 : vector<2x8x8xbf16> to vector<16x8xbf16>
    %c4_165 = arith.constant 4 : index
    %c0_166 = arith.constant 0 : index
    %c0_167 = arith.constant 0 : index
    %143 = vector.load %arg6[%c4_165, %c0_166, %c0_167] : memref<9x8x8xbf16, #tpu.memory_space<vmem>>, vector<1x8x8xbf16>
    %144 = vector.shape_cast %143 : vector<1x8x8xbf16> to vector<8x8xbf16>
    %cst_168 = arith.constant dense<0.000000e+00> : vector<16x8xf32>
    %145 = tpu.matmul %142, %144, %cst_168 {dimension_numbers = #tpu.dot_dimension_numbers<[1], [0], [0], [1], [0, 0, 1, 1], [], []>} : vector<16x8xbf16>, vector<8x8xbf16>, vector<16x8xf32> -> vector<16x8xf32>
    %c0_169 = arith.constant 0 : index
    %c0_170 = arith.constant 0 : index
    %146 = vector.load %arg12[%c0_169, %c0_170] : memref<32x8xf32, #tpu.memory_space<vmem>>, vector<16x8xf32>
    %147 = arith.addf %146, %145 : vector<16x8xf32>
    %c0_171 = arith.constant 0 : index
    %c0_172 = arith.constant 0 : index
    %148 = vector.load %arg12[%c0_171, %c0_172] : memref<32x8xf32, #tpu.memory_space<vmem>>, vector<16x8xf32>
    tpu.vector_store %arg12[%c0_171, %c0_172], %147 {strides = array<i32>} : memref<32x8xf32, #tpu.memory_space<vmem>>, vector<16x8xf32>,
    %c1_173 = arith.constant 1 : index
    %c2_174 = arith.constant 2 : index
    %c0_175 = arith.constant 0 : index
    %149 = vector.load %arg11[%c1_173, %c2_174, %c0_175] : memref<4x10x8xbf16, #tpu.memory_space<vmem>>, vector<2x8x8xbf16>
    %150 = vector.shape_cast %149 : vector<2x8x8xbf16> to vector<16x8xbf16>
    %c5_176 = arith.constant 5 : index
    %c0_177 = arith.constant 0 : index
    %c0_178 = arith.constant 0 : index
    %151 = vector.load %arg6[%c5_176, %c0_177, %c0_178] : memref<9x8x8xbf16, #tpu.memory_space<vmem>>, vector<1x8x8xbf16>
    %152 = vector.shape_cast %151 : vector<1x8x8xbf16> to vector<8x8xbf16>
    %cst_179 = arith.constant dense<0.000000e+00> : vector<16x8xf32>
    %153 = tpu.matmul %150, %152, %cst_179 {dimension_numbers = #tpu.dot_dimension_numbers<[1], [0], [0], [1], [0, 0, 1, 1], [], []>} : vector<16x8xbf16>, vector<8x8xbf16>, vector<16x8xf32> -> vector<16x8xf32>
    %c0_180 = arith.constant 0 : index
    %c0_181 = arith.constant 0 : index
    %154 = vector.load %arg12[%c0_180, %c0_181] : memref<32x8xf32, #tpu.memory_space<vmem>>, vector<16x8xf32>
    %155 = arith.addf %154, %153 : vector<16x8xf32>
    %c0_182 = arith.constant 0 : index
    %c0_183 = arith.constant 0 : index
    %156 = vector.load %arg12[%c0_182, %c0_183] : memref<32x8xf32, #tpu.memory_space<vmem>>, vector<16x8xf32>
    tpu.vector_store %arg12[%c0_182, %c0_183], %155 {strides = array<i32>} : memref<32x8xf32, #tpu.memory_space<vmem>>, vector<16x8xf32>,
    %c2_184 = arith.constant 2 : index
    %c0_185 = arith.constant 0 : index
    %c0_186 = arith.constant 0 : index
    %157 = vector.load %arg11[%c2_184, %c0_185, %c0_186] : memref<4x10x8xbf16, #tpu.memory_space<vmem>>, vector<2x8x8xbf16>
    %158 = vector.shape_cast %157 : vector<2x8x8xbf16> to vector<16x8xbf16>
    %c6_187 = arith.constant 6 : index
    %c0_188 = arith.constant 0 : index
    %c0_189 = arith.constant 0 : index
    %159 = vector.load %arg6[%c6_187, %c0_188, %c0_189] : memref<9x8x8xbf16, #tpu.memory_space<vmem>>, vector<1x8x8xbf16>
    %160 = vector.shape_cast %159 : vector<1x8x8xbf16> to vector<8x8xbf16>
    %cst_190 = arith.constant dense<0.000000e+00> : vector<16x8xf32>
    %161 = tpu.matmul %158, %160, %cst_190 {dimension_numbers = #tpu.dot_dimension_numbers<[1], [0], [0], [1], [0, 0, 1, 1], [], []>} : vector<16x8xbf16>, vector<8x8xbf16>, vector<16x8xf32> -> vector<16x8xf32>
    %c0_191 = arith.constant 0 : index
    %c0_192 = arith.constant 0 : index
    %162 = vector.load %arg12[%c0_191, %c0_192] : memref<32x8xf32, #tpu.memory_space<vmem>>, vector<16x8xf32>
    %163 = arith.addf %162, %161 : vector<16x8xf32>
    %c0_193 = arith.constant 0 : index
    %c0_194 = arith.constant 0 : index
    %164 = vector.load %arg12[%c0_193, %c0_194] : memref<32x8xf32, #tpu.memory_space<vmem>>, vector<16x8xf32>
    tpu.vector_store %arg12[%c0_193, %c0_194], %163 {strides = array<i32>} : memref<32x8xf32, #tpu.memory_space<vmem>>, vector<16x8xf32>,
    %c2_195 = arith.constant 2 : index
    %c1_196 = arith.constant 1 : index
    %c0_197 = arith.constant 0 : index
    %165 = vector.load %arg11[%c2_195, %c1_196, %c0_197] : memref<4x10x8xbf16, #tpu.memory_space<vmem>>, vector<2x8x8xbf16>
    %166 = vector.shape_cast %165 : vector<2x8x8xbf16> to vector<16x8xbf16>
    %c7_198 = arith.constant 7 : index
    %c0_199 = arith.constant 0 : index
    %c0_200 = arith.constant 0 : index
    %167 = vector.load %arg6[%c7_198, %c0_199, %c0_200] : memref<9x8x8xbf16, #tpu.memory_space<vmem>>, vector<1x8x8xbf16>
    %168 = vector.shape_cast %167 : vector<1x8x8xbf16> to vector<8x8xbf16>
    %cst_201 = arith.constant dense<0.000000e+00> : vector<16x8xf32>
    %169 = tpu.matmul %166, %168, %cst_201 {dimension_numbers = #tpu.dot_dimension_numbers<[1], [0], [0], [1], [0, 0, 1, 1], [], []>} : vector<16x8xbf16>, vector<8x8xbf16>, vector<16x8xf32> -> vector<16x8xf32>
    %c0_202 = arith.constant 0 : index
    %c0_203 = arith.constant 0 : index
    %170 = vector.load %arg12[%c0_202, %c0_203] : memref<32x8xf32, #tpu.memory_space<vmem>>, vector<16x8xf32>
    %171 = arith.addf %170, %169 : vector<16x8xf32>
    %c0_204 = arith.constant 0 : index
    %c0_205 = arith.constant 0 : index
    %172 = vector.load %arg12[%c0_204, %c0_205] : memref<32x8xf32, #tpu.memory_space<vmem>>, vector<16x8xf32>
    tpu.vector_store %arg12[%c0_204, %c0_205], %171 {strides = array<i32>} : memref<32x8xf32, #tpu.memory_space<vmem>>, vector<16x8xf32>,
    %c2_206 = arith.constant 2 : index
    %c2_207 = arith.constant 2 : index
    %c0_208 = arith.constant 0 : index
    %173 = vector.load %arg11[%c2_206, %c2_207, %c0_208] : memref<4x10x8xbf16, #tpu.memory_space<vmem>>, vector<2x8x8xbf16>
    %174 = vector.shape_cast %173 : vector<2x8x8xbf16> to vector<16x8xbf16>
    %c8_209 = arith.constant 8 : index
    %c0_210 = arith.constant 0 : index
    %c0_211 = arith.constant 0 : index
    %175 = vector.load %arg6[%c8_209, %c0_210, %c0_211] : memref<9x8x8xbf16, #tpu.memory_space<vmem>>, vector<1x8x8xbf16>
    %176 = vector.shape_cast %175 : vector<1x8x8xbf16> to vector<8x8xbf16>
    %cst_212 = arith.constant dense<0.000000e+00> : vector<16x8xf32>
    %177 = tpu.matmul %174, %176, %cst_212 {dimension_numbers = #tpu.dot_dimension_numbers<[1], [0], [0], [1], [0, 0, 1, 1], [], []>} : vector<16x8xbf16>, vector<8x8xbf16>, vector<16x8xf32> -> vector<16x8xf32>
    %c0_213 = arith.constant 0 : index
    %c0_214 = arith.constant 0 : index
    %178 = vector.load %arg12[%c0_213, %c0_214] : memref<32x8xf32, #tpu.memory_space<vmem>>, vector<16x8xf32>
    %179 = arith.addf %178, %177 : vector<16x8xf32>
    %c0_215 = arith.constant 0 : index
    %c0_216 = arith.constant 0 : index
    %180 = vector.load %arg12[%c0_215, %c0_216] : memref<32x8xf32, #tpu.memory_space<vmem>>, vector<16x8xf32>
    tpu.vector_store %arg12[%c0_215, %c0_216], %179 {strides = array<i32>} : memref<32x8xf32, #tpu.memory_space<vmem>>, vector<16x8xf32>,
    %c0_217 = arith.constant 0 : index
    %c0_218 = arith.constant 0 : index
    %181 = vector.load %arg12[%c0_217, %c0_218] : memref<32x8xf32, #tpu.memory_space<vmem>>, vector<16x8xf32>
    %c0_219 = arith.constant 0 : index
    %c0_220 = arith.constant 0 : index
    %182 = vector.load %arg7[%c0_219, %c0_220] : memref<1x8xf32, #tpu.memory_space<vmem>>, vector<1x8xf32>
    %183 = vector.broadcast %182 : vector<1x8xf32> to vector<16x8xf32>
    %184 = arith.mulf %181, %183 : vector<16x8xf32>
    %c0_221 = arith.constant 0 : index
    %c0_222 = arith.constant 0 : index
    %185 = vector.load %arg8[%c0_221, %c0_222] : memref<1x8xf32, #tpu.memory_space<vmem>>, vector<1x8xf32>
    %186 = vector.broadcast %185 : vector<1x8xf32> to vector<16x8xf32>
    %187 = arith.addf %184, %186 : vector<16x8xf32>
    %cst_223 = arith.constant 0.000000e+00 : f32
    %188 = vector.broadcast %cst_223 : f32 to vector<16x8xf32>
    %189 = arith.maximumf %187, %188 : vector<16x8xf32>
    %190 = arith.truncf %189 : vector<16x8xf32> to vector<16x8xbf16>
    %c0_224 = arith.constant 0 : index
    %c0_225 = arith.constant 0 : index
    %c0_226 = arith.constant 0 : index
    %191 = vector.load %arg9[%c0_224, %c0_225, %c0_226] : memref<1x16x8xbf16, #tpu.memory_space<vmem>>, vector<1x16x8xbf16>
    %192 = vector.shape_cast %191 : vector<1x16x8xbf16> to vector<16x8xbf16>
    %193 = vector.shape_cast %190 : vector<16x8xbf16> to vector<1x16x8xbf16>
    tpu.vector_store %arg9[%c0_224, %c0_225, %c0_226], %193 {strides = array<i32>} : memref<1x16x8xbf16, #tpu.memory_space<vmem>>, vector<1x16x8xbf16>,
    return
  }
  func.func @transform_0(%arg0: i32, %arg1: i32) -> (i32, i32, i32, i32) {
    %c0_i32 = arith.constant 0 : i32
    %c0_i32_0 = arith.constant 0 : i32
    %c0_i32_1 = arith.constant 0 : i32
    %c0_i32_2 = arith.constant 0 : i32
    return %arg0, %c0_i32, %c0_i32_0, %c0_i32_1 : i32, i32, i32, i32
  }
  func.func @transform_1(%arg0: i32, %arg1: i32) -> (i32, i32, i32) {
    %c0_i32 = arith.constant 0 : i32
    %c0_i32_0 = arith.constant 0 : i32
    %c0_i32_1 = arith.constant 0 : i32
    %c0_i32_2 = arith.constant 0 : i32
    return %c0_i32, %c0_i32_0, %c0_i32_1 : i32, i32, i32
  }
  func.func @transform_2(%arg0: i32, %arg1: i32) -> (i32, i32) {
    %c0_i32 = arith.constant 0 : i32
    %c0_i32_0 = arith.constant 0 : i32
    %c0_i32_1 = arith.constant 0 : i32
    return %c0_i32, %c0_i32_0 : i32, i32
  }
  func.func @transform_3(%arg0: i32, %arg1: i32) -> (i32, i32) {
    %c0_i32 = arith.constant 0 : i32
    %c0_i32_0 = arith.constant 0 : i32
    %c0_i32_1 = arith.constant 0 : i32
    return %c0_i32, %c0_i32_0 : i32, i32
  }
  func.func @transform_4(%arg0: i32, %arg1: i32) -> (i32, i32, i32) {
    %c0_i32 = arith.constant 0 : i32
    %c0_i32_0 = arith.constant 0 : i32
    %c0_i32_1 = arith.constant 0 : i32
    %c0_i32_2 = arith.constant 0 : i32
    return %c0_i32, %c0_i32_0, %c0_i32_1 : i32, i32, i32
  }
  func.func @transform_5(%arg0: i32, %arg1: i32) -> (i32, i32) {
    %c0_i32 = arith.constant 0 : i32
    %c0_i32_0 = arith.constant 0 : i32
    %c0_i32_1 = arith.constant 0 : i32
    return %c0_i32, %c0_i32_0 : i32, i32
  }
  func.func @transform_6(%arg0: i32, %arg1: i32) -> (i32, i32) {
    %c0_i32 = arith.constant 0 : i32
    %c0_i32_0 = arith.constant 0 : i32
    %c0_i32_1 = arith.constant 0 : i32
    return %c0_i32, %c0_i32_0 : i32, i32
  }
  func.func @transform_7(%arg0: i32, %arg1: i32) -> (i32, i32, i32) {
    %c0_i32 = arith.constant 0 : i32
    %c0_i32_0 = arith.constant 0 : i32
    return %arg0, %arg1, %c0_i32 : i32, i32, i32
  }
}

</mosaic_0001>

<bundles_post_ra>
// kernel: tpu_custom_call.1
= control target key start
LH: loop header
LB: loop body
LE: loop exit
PB: predicated region body
PF: predicated region fallthrough
CT: control target
= control target key end

     0   :  { %s2301_s24 = smov 0   ;;  %s2303_s25 = smov 0   ;;  %s2783_s0 = inlined_call_operand.vmem [shape: bf16[2,24,8,8], index: 0, kind: input, shape index: {}]   ;;  %s2784_s1 = inlined_call_operand.vmem [shape: bf16[9,4,8], index: 1, kind: input, shape index: {}]   ;;  %s2785_s2 = inlined_call_operand.vmem [shape: f32[1,8], index: 2, kind: input, shape index: {}]   ;;  %s2786_s3 = inlined_call_operand.vmem [shape: f32[1,8], index: 3, kind: input, shape index: {}]   ;;  %s2787_s4 = inlined_call_operand.vmem [shape: bf16[9,8,8], index: 4, kind: input, shape index: {}]   ;;  %s2788_s5 = inlined_call_operand.vmem [shape: f32[1,8], index: 5, kind: input, shape index: {}]   ;;  %s2789_s6 = inlined_call_operand.vmem [shape: f32[1,8], index: 6, kind: input, shape index: {}]   ;;  %s2790_s7 = inlined_call_operand.vmem [shape: bf16[2,64,8], index: 7, kind: output, shape index: {}]  }
   0x1   :  { %s2305_s26 = smov 0   ;;  %s2307_s27 = smov 0  }
   0x2   :  { %s2309_s28 = smov 0  }
   0x3 LB: > { %s26_s29 = sadd.s32 1, %s2248_s26  ;;  %s29_s30 = sadd.s32 1, %s2252_s27  ;;  %s2256_s28 = sphi %s2309_s28, %s17_s28   ;;  %s2252_s27 = sphi %s2307_s27, %s2810_s27   ;;  %s2248_s26 = sphi %s2305_s26, %s2809_s26   ;;  %s2244_s25 = sphi %s2303_s25, %s2808_s25   ;;  %s2240_s24 = sphi %s2301_s24, %s2807_s24  }
   0x4   : > { %p27_p0 = scmp.ge.s32.totalorder %s26_s29, 4  ;;  %p1993_p1 = scmp.ge.s32.totalorder %s2256_s28, 1 }
   0x5   : > { %p251_p2 = scmp.lt.s32.totalorder %s2256_s28, 9 }
   0x6   : > { %s2812_s29 = smov (%p27_p0, %s26_s29), 0  ;;  %s2814_s30 = smov (!%p27_p0, %s29_s30), %s2252_s27 }
   0x7   : > { %p252_p3 = pnand %p1993_p1, %p251_p2  ;;  %p31_p4 = scmp.ge.s32.totalorder %s2814_s30, 2 }
   0x8   : > { %p287_p5 = scmp.lt.s32.totalorder (!%p252_p3), %s2244_s25, 1  ;;  %s1995_s8 = sshll.u32 (!%p252_p3), %s2240_s24, 1 }
   0x9   : > { %s2816_s30 = smov (%p31_p4, %s2814_s30), 0  ;;  %255 = sbr.rel (%p252_p3) target bundleno = 718 (0x2ce), region = 48 }
   0xa   : > { %p295_p6 = scmp.lt.s32.totalorder (!%p252_p3), %s1995_s8, 7  ;;  %s2101_s9 = sshll.u32 (!%p252_p3), %s2240_s24, 4 }
   0xb   : > { %s2258_s21 = smov (!%p252_p3), 124   ;;  %p2062_p7 = scmp.ne.s32.totalorder (!%p252_p3), %s2240_s24, 0 }
   0xe   : > { %s2818_s25 = smov (!%p287_p5, %s2244_s25), 1  ;;  %s2820_s8 = smov (!%p295_p6, %s1995_s8), 7  ;;  %vm486_vm0 = vcmask 27648   ;;  %vm487_vm1 = vsmask.f32 7938  ;;  %vm492_vm2 = vcmask 24576  }
   0xf   : > { %s2140_s10 = smul.u32 96, %s2818_s25  ;;  %s1996_s11 = sshll.u32 %s2818_s25, 3  ;;  %vm493_vm3 = vsmask.f32 256  ;;  %vm2368_vm4 = vmand %vm486_vm0, %vm487_vm1  ;;  %v516_v48 = vld [vmem:[#allocation2 + $0x20] sm:$0xf] }
  0x10   : > { %s298_s12 = sadd.s32 %s1996_s11, %s2820_s8  ;;  %vm2374_vm5 = vmand %vm492_vm2, %vm493_vm3  ;;  %v519_v49 = vld [vmem:[#allocation2 + $0x24] sm:$0x1]  ;;  %vm587_vm7 = vcmask 1041408   ;;  %vm623_vm8 = vsmask.f32 3328  ;;  %vm746_vm9 = vcmask 1042432  }
  0x11   : > { %s291_s15 = scalar_lea.vmem %s2783_s0, %s2140_s10  ;;  %s1997_s16 = sshll.u32 %s298_s12, 2  ;;  %vm2402_vm6 = vmand %vm492_vm2, %vm487_vm1  ;;  %vm747_vm10 = vcmask 1046532   ;;  %vm580_vm11 = vcmask 31744   ;;  %vm624_vm13 = vsmask.f32 7440  ;;  %vm610_vm15 = vcmask 64512  }
  0x12   : > { %s2341_s19 = scalar_lea.vmem %s2790_s7, %s1997_s16  ;;  %s305_s20 = scalar_lea.vmem %s291_s15, %s2101_s9  ;;  %vm2468_vm12 = vmor %vm746_vm9, %vm747_vm10  ;;  %v2041_v43 = vld [vmem:[%s2784_s1 + $0xc] sm:$0x3]  ;;  %vm1379_vm0 = vcmask 60416   ;;  %vm1384_vm2 = vcmask 57344  }
  0x13   : > { %v2136_v0 = vld [vmem:[%s305_s20 + $0x10] sm:$0xff]   ;;  %v2112_v1 = vld [vmem:[%s305_s20] sm:$0xff]   ;;  %v2343_v6 = vld [vmem:[%s305_s20 + $0x18] sm:$0xff]  }
  0x14   : > { %v2121_v2 = vunpack.c.l.bf16 %v2136_v0  ;;  %v2122_v3 = vunpack.c.h.bf16 %v2136_v0  ;;  %v2113_v4 = vunpack.c.l.bf16 %v2112_v1  ;;  %v2114_v5 = vunpack.c.h.bf16 %v2112_v1  ;;  %v2138_v7 = vld [vmem:[%s305_s20 + $0x20] sm:$0xff]   ;;  %v2345_v8 = vld [vmem:[%s305_s20 + $0x8] sm:$0xff]   ;;  %vm2482_vm14 = vmor %vm623_vm8, %vm624_vm13 }
  0x15   : > { %v2129_v11 = vunpack.c.l.bf16 %v2138_v7  ;;  %v2130_v12 = vunpack.c.h.bf16 %v2138_v7  ;;  %v2125_v13 = vunpack.c.l.bf16 %v2343_v6  ;;  %v2348_v14 = vld [vmem:[%s305_s20 + $0x28] sm:$0xff]   ;;  %v2126_v15 = vunpack.c.h.bf16 %v2343_v6 }
  0x16   : > { %v2194_v9 = vpack.i.bf16 %v2122_v3, %v2121_v2  ;;  %v2184_v10 = vpack.i.bf16 %v2114_v5, %v2113_v4  ;;  %v2117_v16 = vunpack.c.l.bf16 %v2345_v8  ;;  %v2118_v17 = vunpack.c.h.bf16 %v2345_v8 }
  0x17   : > { %v2204_v18 = vpack.i.bf16 %v2130_v12, %v2129_v11  ;;  %v2133_v19 = vunpack.c.l.bf16 %v2348_v14  ;;  %v2134_v20 = vunpack.c.h.bf16 %v2348_v14  ;;  %v2199_v21 = vpack.i.bf16 %v2126_v15, %v2125_v13 }
  0x18   : > { %2195 = vrot.lane.b32.xlu1 %v2194_v9, %s2258_s21  ;;  %2185 = vrot.lane.b32.xlu0 %v2184_v10, %s2258_s21  ;;  %v2189_v22 = vpack.i.bf16 %v2118_v17, %v2117_v16 }
  0x19   : > { %2205 = vrot.lane.b32.xlu2 %v2204_v18, %s2258_s21  ;;  %v2209_v23 = vpack.i.bf16 %v2134_v20, %v2133_v19 }
  0x20   : > { %2200 = vrot.lane.b32.xlu1 %v2199_v21, %s2258_s21  ;;  %2190 = vrot.lane.b32.xlu0 %v2189_v22, %s2258_s21 }
  0x21   : > { %2210 = vrot.lane.b32.xlu2 %v2209_v23, %s2258_s21 }
  0x73   : > { %v2206_v24 = vpop.permute.xlu2 %2205 }
  0x74   : > { %v2208_v25 = vunpack.i.h.bf16 %v2206_v24  ;;  %v2207_v26 = vunpack.i.l.bf16 %v2206_v24 }
  0x76   : > { %v387_v27 = vmax.f32 %v2130_v12, %v2208_v25  ;;  %v386_v28 = vmax.f32 %v2129_v11, %v2207_v26  ;;  %v489_v11 = vld [vmem:[#allocation2] sm:$0xf]  ;;  %v495_v12 = vld [vmem:[#allocation2 + $0x4] sm:$0x1] }
  0x78   : > { %v418_v29 = vmax.f32 %v386_v28, %v387_v27 }
  0x7a   : > { %v424_v30 = vpack.c.bf16 %v418_v29, %v418_v29 }
  0x7b   : > { %v2211_v62 = vpop.permute.xlu2 %2210 }
  0x7c   : > { %v459_v31 = vshrl.u32 %v424_v30, 16  ;;  %v462_v35 = vshll.u32 %v424_v30, 16  ;;  %v2213_v9 = vunpack.i.h.bf16 %v2211_v62  ;;  %v2212_v10 = vunpack.i.l.bf16 %v2211_v62 }
  0x7e   : > { %v461_v34 = vrot.slane %v459_v31, 7 }
  0x80   : > { %v464_v41 = vor.u32 %v462_v35, %v461_v34  ;;  %v465_v42 = vrot.slane %v461_v34, 4  ;;  %v389_v34 = vmax.f32 %v2134_v20, %v2213_v9  ;;  %v388_v35 = vmax.f32 %v2133_v19, %v2212_v10 }
  0x82   : > { %v517_v50 = vsel %vm2368_vm4, %v464_v41, %v516_v48  ;;  %v520_v51 = vsel %vm2374_vm5, %v465_v42, %v519_v49  ;;  %v419_v14 = vmax.f32 %v388_v35, %v389_v34  ;;  %v510_v49 = vld [vmem:[#allocation2 + $0x18] sm:$0xf] }
  0x83   : > { %518 = vst [vmem:[#allocation2 + $0x20] sm:$0xf] %v517_v50  ;;  %v513_v50 = vld [vmem:[#allocation2 + $0x1c] sm:$0x1] }
  0x84   : > { %521 = vst [vmem:[#allocation2 + $0x24] sm:$0x1] %v520_v51  ;;  %v425_v48 = vpack.c.bf16 %v419_v14, %v419_v14 }
  0x8a   : > { %v2196_v32 = vpop.permute.xlu1 %2195  ;;  %v2186_v33 = vpop.permute.xlu0 %2185  ;;  %v540_v24 = vld [vmem:[#allocation2 + $0x20] sm:$0x1] }
  0x8b   : > { %v2198_v36 = vunpack.i.h.bf16 %v2196_v32  ;;  %v2197_v37 = vunpack.i.l.bf16 %v2196_v32  ;;  %v2188_v38 = vunpack.i.h.bf16 %v2186_v33  ;;  %v2187_v39 = vunpack.i.l.bf16 %v2186_v33 }
  0x8c   : > { %v541_v31 = vsel %vm2374_vm5, 0, %v540_v24 }
  0x8d   : > { %v383_v44 = vmax.f32 %v2122_v3, %v2198_v36  ;;  %v382_v45 = vmax.f32 %v2121_v2, %v2197_v37  ;;  %v379_v46 = vmax.f32 %v2114_v5, %v2188_v38  ;;  %v378_v47 = vmax.f32 %v2113_v4, %v2187_v39  ;;  %v504_v3 = vld [vmem:[#allocation2 + $0x10] sm:$0xf]  ;;  %v507_v4 = vld [vmem:[#allocation2 + $0x14] sm:$0x1]  ;;  %542 = vst [vmem:[#allocation2 + $0x20] sm:$0x1] %v541_v31 }
  0x8e   : > { %v569_v36 = vld [vmem:[%s2784_s1] sm:$0x3]  ;;  %v2020_v37 = vld [vmem:[%s2784_s1 + $0x6] sm:$0x3] }
  0x8f   : > { %v416_v52 = vmax.f32 %v382_v45, %v383_v44  ;;  %v414_v53 = vmax.f32 %v378_v47, %v379_v46  ;;  %v589_v19 = vsel %vm587_vm7, %v569_v36, 0  ;;  %v837_v42 = vsel %vm587_vm7, %v2020_v37, 0  ;;  %v2017_v44 = vld [vmem:[%s2784_s1 + $0x4] sm:$0x3] }
  0x90   : > { %598 = vmatpush.bf16.msra.mxu0 %v589_v19  ;;  %846 = vmatpush.bf16.msra.mxu3 %v837_v42  ;;  %v780_v47 = vsel %vm587_vm7, %v2017_v44, 0 }
  0x91   : > { %v422_v54 = vpack.c.bf16 %v416_v52, %v416_v52  ;;  %v420_v55 = vpack.c.bf16 %v414_v53, %v414_v53  ;;  %789 = vmatpush.bf16.msra.mxu2 %v780_v47 }
  0x92   : > { %v2201_v56 = vpop.permute.xlu1 %2200  ;;  %v2191_v57 = vpop.permute.xlu0 %2190 }
  0x93   : > { %v443_v58 = vshrl.u32 %v422_v54, 16  ;;  %v446_v59 = vshll.u32 %v422_v54, 16  ;;  %v427_v60 = vshrl.u32 %v420_v55, 16  ;;  %v430_v61 = vshll.u32 %v420_v55, 16  ;;  %v498_v55 = vld [vmem:[#allocation2 + $0x8] sm:$0xf] }
  0x94   : > { %v2203_v63 = vunpack.i.h.bf16 %v2201_v56  ;;  %v2202_v0 = vunpack.i.l.bf16 %v2201_v56  ;;  %v2193_v1 = vunpack.i.h.bf16 %v2191_v57  ;;  %v2192_v2 = vunpack.i.l.bf16 %v2191_v57 }
  0x95   : > { %v445_v5 = vrot.slane %v443_v58, 7  ;;  %v429_v7 = vrot.slane %v427_v60, 7  ;;  %v467_v56 = vshrl.u32 %v425_v48, 16  ;;  %v470_v57 = vshll.u32 %v425_v48, 16  ;;  %v501_v60 = vld [vmem:[#allocation2 + $0xc] sm:$0x1] }
  0x96   : > { %v385_v18 = vmax.f32 %v2126_v15, %v2203_v63  ;;  %v384_v21 = vmax.f32 %v2125_v13, %v2202_v0  ;;  %v381_v22 = vmax.f32 %v2118_v17, %v2193_v1  ;;  %v380_v23 = vmax.f32 %v2117_v16, %v2192_v2  ;;  %v559_v15 = vld [vmem:[#allocation2 + $0x24] sm:$0x1]  ;;  %v2010_v63 = vld [vmem:[%s2784_s1 + $0x2] sm:$0x3] }
  0x97   : > { %v448_v25 = vor.u32 %v446_v59, %v445_v5  ;;  %v449_v26 = vrot.slane %v445_v5, 4  ;;  %v432_v27 = vor.u32 %v430_v61, %v429_v7  ;;  %v433_v28 = vrot.slane %v429_v7, 4 }
  0x98   : > { %v417_v29 = vmax.f32 %v384_v21, %v385_v18  ;;  %v415_v30 = vmax.f32 %v380_v23, %v381_v22  ;;  %v560_v38 = vsel %vm2402_vm6, 0, %v559_v15  ;;  %v469_v2 = vrot.slane %v467_v56, 7  ;;  %v525_v22 = vld [vmem:[#allocation2 + $0x2c] sm:$0x1]  ;;  %v2031_v23 = vld [vmem:[%s2784_s1 + $0x8] sm:$0x3] }
  0x99   : > { %v505_v6 = vsel %vm2368_vm4, %v448_v25, %v504_v3  ;;  %v508_v13 = vsel %vm2374_vm5, %v449_v26, %v507_v4  ;;  %v490_v8 = vsel %vm2368_vm4, %v432_v27, %v489_v11  ;;  %v496_v16 = vsel %vm2374_vm5, %v433_v28, %v495_v12  ;;  %561 = vst [vmem:[#allocation2 + $0x24] sm:$0x1] %v560_v38  ;;  %v522_v11 = vld [vmem:[#allocation2 + $0x28] sm:$0xf] }
  0x9a   : > { %506 = vst [vmem:[#allocation2 + $0x10] sm:$0xf] %v505_v6  ;;  %v423_v32 = vpack.c.bf16 %v417_v29, %v417_v29  ;;  %v421_v33 = vpack.c.bf16 %v415_v30, %v415_v30  ;;  %v697_v7 = vsel %vm587_vm7, %v2010_v63, 0  ;;  %v472_v12 = vor.u32 %v470_v57, %v469_v2  ;;  %v2038_v15 = vld [vmem:[%s2784_s1 + $0xa] sm:$0x3] }
  0x9b   : > { %509 = vst [vmem:[#allocation2 + $0x14] sm:$0x1] %v508_v13  ;;  %v473_v18 = vrot.slane %v469_v2, 4  ;;  %706 = vmatpush.bf16.msra.mxu1 %v697_v7  ;;  %v949_v25 = vsel %vm587_vm7, %v2031_v23, 0 }
  0x9c   : > { %491 = vst [vmem:[#allocation2] sm:$0xf] %v490_v8  ;;  %v451_v39 = vshrl.u32 %v423_v32, 16  ;;  %v454_v41 = vshll.u32 %v423_v32, 16  ;;  %v435_v20 = vshrl.u32 %v421_v33, 16  ;;  %v438_v52 = vshll.u32 %v421_v33, 16  ;;  %958 = vmatpush.bf16.msrb.mxu0 %v949_v25 }
  0x9d   : > { %497 = vst [vmem:[#allocation2 + $0x4] sm:$0x1] %v496_v16  ;;  %v523_v26 = vsel %vm2368_vm4, %v472_v12, %v522_v11  ;;  %v526_v27 = vsel %vm2374_vm5, %v473_v18, %v525_v22  ;;  %v1029_v8 = vsel %vm587_vm7, %v2038_v15, 0  ;;  %v2052_v12 = vld [vmem:[%s2784_s1 + $0xe] sm:$0x3] }
  0x9e   : > { %v453_v45 = vrot.slane %v451_v39, 7  ;;  %v437_v46 = vrot.slane %v435_v20, 7  ;;  %524 = vst [vmem:[#allocation2 + $0x28] sm:$0xf] %v523_v26  ;;  %v1198_v15 = vsel %vm587_vm7, %v2052_v12, 0 }
  0x9f   : > { %527 = vst [vmem:[#allocation2 + $0x2c] sm:$0x1] %v526_v27  ;;  %1038 = vmatpush.bf16.msrb.mxu1 %v1029_v8  ;;  %1207 = vmatpush.bf16.msrb.mxu3 %v1198_v15 }
  0xa0   : > { %v456_v51 = vor.u32 %v454_v41, %v453_v45  ;;  %v457_v54 = vrot.slane %v453_v45, 4  ;;  %v440_v61 = vor.u32 %v438_v52, %v437_v46  ;;  %v441_v62 = vrot.slane %v437_v46, 4 }
  0xa1   : > { %v534_v53 = vld [vmem:[#allocation2 + $0x10] sm:$0x1]  ;;  %v2472_v46 = vld [vmem:[#allocation2 + $0x10] sm:$0xe] }
  0xa2   : > { %v535_v58 = vsel %vm2374_vm5, 0, %v534_v53  ;;  %v553_v59 = vld [vmem:[#allocation2 + $0x14] sm:$0x1]  ;;  %v511_v5 = vsel %vm2368_vm4, %v456_v51, %v510_v49  ;;  %v514_v10 = vsel %vm2374_vm5, %v457_v54, %v513_v50  ;;  %v499_v21 = vsel %vm2368_vm4, %v440_v61, %v498_v55  ;;  %vm2608_vm4 = vmand %vm1379_vm0, %vm487_vm1 }
  0xa3   : > { %536 = vst [vmem:[#allocation2 + $0x10] sm:$0x1] %v535_v58  ;;  %v554_v0 = vsel %vm2402_vm6, 0, %v553_v59  ;;  %v528_v1 = vld [vmem:[#allocation2] sm:$0x1]  ;;  %v502_v24 = vsel %vm2374_vm5, %v441_v62, %v501_v60  ;;  %v1086_v49 = vsel %vm587_vm7, %v2041_v43, 0 }
  0xa4   : > { %555 = vst [vmem:[#allocation2 + $0x14] sm:$0x1] %v554_v0  ;;  %v529_v3 = vsel %vm2374_vm5, 0, %v528_v1  ;;  %v547_v4 = vld [vmem:[#allocation2 + $0x4] sm:$0x1]  ;;  %1095 = vmatpush.bf16.msrb.mxu2 %v1086_v49 }
  0xa5   : > { %530 = vst [vmem:[#allocation2] sm:$0x1] %v529_v3  ;;  %v548_v9 = vsel %vm2402_vm6, 0, %v547_v4  ;;  %v543_v38 = vld [vmem:[#allocation2 + $0x28] sm:$0x1] }
  0xa6   : > { %549 = vst [vmem:[#allocation2 + $0x4] sm:$0x1] %v548_v9  ;;  %v544_v39 = vsel %vm2374_vm5, 0, %v543_v38  ;;  %v562_v41 = vld [vmem:[#allocation2 + $0x2c] sm:$0x1] }
  0xa7   : > { %512 = vst [vmem:[#allocation2 + $0x18] sm:$0xf] %v511_v5  ;;  %v563_v20 = vsel %vm2402_vm6, 0, %v562_v41  ;;  %v730_v14 = vld [vmem:[#allocation2] sm:$0xe]  ;;  %v2015_v5 = vrot.slane %v2472_v46, 9 }
  0xa8   : > { %515 = vst [vmem:[#allocation2 + $0x1c] sm:$0x1] %v514_v10  ;;  %v2013_v48 = vrot.slane %v730_v14, 9 }
  0xa9   : > { %500 = vst [vmem:[#allocation2 + $0x8] sm:$0xf] %v499_v21 }
  0xaa   : > { %503 = vst [vmem:[#allocation2 + $0xc] sm:$0x1] %v502_v24  ;;  %v2104_v17 = vld [vmem:[#allocation2 + $0xc] sm:$0xf0] }
  0xab   : > { %545 = vst [vmem:[#allocation2 + $0x28] sm:$0x1] %v544_v39  ;;  %v619_v53 = vld [vmem:[#allocation2 + $0x10] sm:$0xf] }
  0xac   : > { %v615_v28 = vld [vmem:[#allocation2] sm:$0xf]  ;;  %564 = vst [vmem:[#allocation2 + $0x2c] sm:$0x1] %v563_v20  ;;  %v655_v22 = vshrl.u32 %v619_v53, 16 }
  0xad   : > { %v627_v29 = vshrl.u32 %v615_v28, 16  ;;  %v630_v30 = vshll.u32 %v615_v28, 16  ;;  %v731_v33 = vld [vmem:[#allocation2 + $0x4] sm:$0x1]  ;;  %v2002_v47 = vld [vmem:[#allocation2] sm:$0xf] }
  0xae   : > { %v537_v31 = vld [vmem:[#allocation2 + $0x18] sm:$0x1]  ;;  %v751_v42 = vrot.slane %v731_v33, 5  ;;  %v616_v44 = vld [vmem:[#allocation2 + $0x4] sm:$0x1]  ;;  %v658_v28 = vshll.u32 %v619_v53, 16 }
  0xaf   : > { %v538_v40 = vsel %vm2374_vm5, 0, %v537_v31  ;;  %v556_v6 = vld [vmem:[#allocation2 + $0x1c] sm:$0x1]  ;;  %v629_v13 = vrot.slane %v627_v29, 4  ;;  %v632_v34 = vrot.slane %v630_v30, 5  ;;  %v636_v52 = vshll.u32 %v616_v44, 16 }
  0xb0   : > { %539 = vst [vmem:[#allocation2 + $0x18] sm:$0x1] %v538_v40  ;;  %v557_v16 = vsel %vm2402_vm6, 0, %v556_v6  ;;  %v531_v32 = vld [vmem:[#allocation2 + $0x8] sm:$0x1]  ;;  %v752_v57 = vsel %vm2468_vm12, %v2013_v48, %v751_v42  ;;  %v660_v38 = vrot.slane %v658_v28, 5 }
  0xb1   : > { %558 = vst [vmem:[#allocation2 + $0x1c] sm:$0x1] %v557_v16  ;;  %v532_v35 = vsel %vm2374_vm5, 0, %v531_v32  ;;  %v550_v36 = vld [vmem:[#allocation2 + $0xc] sm:$0x1]  ;;  %v633_v19 = vor.u32 %v632_v34, %v629_v13  ;;  %v638_v7 = vrot.slane %v636_v52, 5  ;;  %v767_v21 = vunpack.c.l.b16 %v752_v57  ;;  %vm2614_vm5 = vmand %vm1384_vm2, %vm493_vm3 }
  0xb2   : > { %533 = vst [vmem:[#allocation2 + $0x8] sm:$0x1] %v532_v35  ;;  %v551_v37 = vsel %vm2402_vm6, 0, %v550_v36  ;;  %v732_v50 = vld [vmem:[#allocation2 + $0x8] sm:$0xe]  ;;  %v657_v35 = vrot.slane %v655_v22, 4  ;;  %vm2630_vm3 = vmand %vm1384_vm2, %vm487_vm1 }
  0xb3   : > { %552 = vst [vmem:[#allocation2 + $0xc] sm:$0x1] %v551_v37  ;;  %v634_v51 = vrot.slane %v633_v19, 4  ;;  %v2014_v1 = vrot.slane %v732_v50, 9  ;;  %v736_v27 = vld [vmem:[#allocation2 + $0x18] sm:$0xe] }
  0xb4   : > { %v872_v40 = vld [vmem:[#allocation2 + $0x10] sm:$0xf]  ;;  %v2016_v34 = vrot.slane %v736_v27, 9  ;;  %v735_v19 = vld [vmem:[#allocation2 + $0x14] sm:$0x1] }
  0xb5   : > { %v639_v25 = vsel %vm2482_vm14, %v634_v51, %v638_v7  ;;  %v893_v41 = vshrl.u32 %v872_v40, 16  ;;  %v1119_v20 = vld [vmem:[#allocation2 + $0x10] sm:$0xf]  ;;  %v896_v43 = vshll.u32 %v872_v40, 16  ;;  %v2105_v53 = vld [vmem:[#allocation2 + $0x1c] sm:$0xf0] }
  0xb6   : > { %v684_v33 = vunpack.c.l.b16 %v639_v25  ;;  %v2006_v12 = vld [vmem:[#allocation2 + $0x10] sm:$0xf] }
  0xb7   : > { %v621_v54 = vld [vmem:[#allocation2 + $0x18] sm:$0xf] }
  0xb8   : > { %v669_v11 = vshrl.u32 %v621_v54, 16  ;;  %v672_v23 = vshll.u32 %v621_v54, 16  ;;  %v737_v31 = vld [vmem:[#allocation2 + $0x1c] sm:$0x1]  ;;  %v1121_v50 = vld [vmem:[#allocation2 + $0x18] sm:$0xf] }
  0xb9   : > { %v2102_v55 = vld [vmem:[#allocation2 + $0x4] sm:$0xf0]  ;;  %v622_v8 = vld [vmem:[#allocation2 + $0x1c] sm:$0x1]  ;;  %v763_v42 = vrot.slane %v737_v31, 5  ;;  %v895_v54 = vrot.slane %v893_v41, 4 }
  0xba   : > { %v2023_v56 = vld [vmem:[#allocation2 + $0x8] sm:$0xf]  ;;  %v2003_v59 = vor.u32 %v2102_v55, %v2002_v47  ;;  %v733_v61 = vld [vmem:[#allocation2 + $0xc] sm:$0x1]  ;;  %v671_v16 = vrot.slane %v669_v11, 4  ;;  %v674_v32 = vrot.slane %v672_v23, 5 }
  0xbb   : > { %v617_v58 = vld [vmem:[#allocation2 + $0x8] sm:$0xf]  ;;  %v2024_v60 = vor.u32 %v2104_v17, %v2023_v56  ;;  %v618_v62 = vld [vmem:[#allocation2 + $0xc] sm:$0x1]  ;;  %v755_v2 = vrot.slane %v733_v61, 5  ;;  %v678_v44 = vshll.u32 %v622_v8, 16 }
  0xbc   : > { %v641_v63 = vshrl.u32 %v617_v58, 16  ;;  %v644_v0 = vshll.u32 %v617_v58, 16  ;;  %v650_v4 = vshll.u32 %v618_v62, 16  ;;  %2008 = vmatmul.msk.bf16.vlgmr.msra.gmra.mxu0 %vm580_vm11, %v2003_v59  ;;  %v870_v29 = vld [vmem:[#allocation2 + $0x8] sm:$0xf]  ;;  %v675_v17 = vor.u32 %v674_v32, %v671_v16 }
  0xbd   : > { %2029 = vmatmul.msk.bf16.vlgmr.msra.gmra.mxu3 %vm580_vm11, %v2024_v60  ;;  %v756_v18 = vsel %vm2468_vm12, %v2014_v1, %v755_v2  ;;  %v879_v36 = vshrl.u32 %v870_v29, 16  ;;  %v882_v39 = vshll.u32 %v870_v29, 16  ;;  %v620_v47 = vld [vmem:[#allocation2 + $0x14] sm:$0x1]  ;;  %v2103_v52 = vld [vmem:[#allocation2 + $0x14] sm:$0xf0]  ;;  %v661_v59 = vor.u32 %v660_v38, %v657_v35 }
  0xbe   : > { %v643_v9 = vrot.slane %v641_v63, 4  ;;  %v646_v10 = vrot.slane %v644_v0, 5  ;;  %v768_v24 = vunpack.c.l.b16 %v756_v18  ;;  %v652_v30 = vrot.slane %v650_v4, 5  ;;  %v2027_v57 = vld [vmem:[#allocation2 + $0x18] sm:$0xf] }
  0xbf   : > { %v881_v48 = vrot.slane %v879_v36, 4  ;;  %v884_v49 = vrot.slane %v882_v39, 5  ;;  %v898_v55 = vrot.slane %v896_v43, 5  ;;  %v1128_v56 = vshrl.u32 %v1119_v20, 16  ;;  %v873_v60 = vld [vmem:[#allocation2 + $0x14] sm:$0x1] }
  0xc0   : > { %v647_v26 = vor.u32 %v646_v10, %v643_v9  ;;  %v771_v6 = vpack.c.b16 %v768_v24, %v767_v21  ;;  %v759_v58 = vrot.slane %v735_v19, 5  ;;  %v1131_v61 = vshll.u32 %v1119_v20, 16  ;;  %v871_v1 = vld [vmem:[#allocation2 + $0xc] sm:$0x1]  ;;  %v1122_v7 = vld [vmem:[#allocation2 + $0x1c] sm:$0x1] }
  0xc1   : > { %v764_v62 = vsel %vm2468_vm12, %v2016_v34, %v763_v42  ;;  %v664_v63 = vshll.u32 %v620_v47, 16  ;;  %v680_v0 = vrot.slane %v678_v44, 5  ;;  %v1142_v2 = vshrl.u32 %v1121_v50, 16  ;;  %v1120_v23 = vld [vmem:[#allocation2 + $0x14] sm:$0x1] }
  0xc2   : > { %v648_v13 = vrot.slane %v647_v26, 4  ;;  %2018 = vmatmul.msk.bf16.vlgmr.msra.gmra.mxu2 %vm580_vm11, %v771_v6  ;;  %v676_v4 = vrot.slane %v675_v17, 4  ;;  %v1130_v9 = vrot.slane %v1128_v56, 4  ;;  %v1133_v10 = vrot.slane %v1131_v61, 5  ;;  %v874_v34 = vld [vmem:[#allocation2 + $0x18] sm:$0xf] }
  0xc3   : > { %v1145_v11 = vshll.u32 %v1121_v50, 16  ;;  %v885_v18 = vor.u32 %v884_v49, %v881_v48  ;;  %v899_v21 = vor.u32 %v898_v55, %v895_v54  ;;  %v902_v22 = vshll.u32 %v873_v60, 16  ;;  %v876_v39 = vld [vmem:[#allocation2 + $0x20] sm:$0xf]  ;;  %v2059_v56 = vld [vmem:[%s2784_s1 + $0x10] sm:$0x3] }
  0xc4   : > { %v653_v37 = vsel %vm2482_vm14, %v648_v13, %v652_v30  ;;  %v1144_v24 = vrot.slane %v1142_v2, 4  ;;  %v2007_v25 = vor.u32 %v2103_v52, %v2006_v12  ;;  %v2028_v26 = vor.u32 %v2105_v53, %v2027_v57  ;;  %v1123_v42 = vld [vmem:[#allocation2 + $0x20] sm:$0xf]  ;;  %v984_v53 = vld [vmem:[#allocation2 + $0x10] sm:$0xe] }
  0xc5   : > { %v685_v14 = vunpack.c.l.b16 %v653_v37  ;;  %v760_v27 = vsel %vm2468_vm12, %v2015_v5, %v759_v58  ;;  %v1147_v28 = vrot.slane %v1145_v11, 5  ;;  %v662_v29 = vrot.slane %v661_v59, 4  ;;  %v982_v61 = vld [vmem:[#allocation2 + $0x8] sm:$0xe] }
  0xc6   : > { %v666_v30 = vrot.slane %v664_v63, 5  ;;  %v888_v31 = vshll.u32 %v871_v1, 16  ;;  %v1151_v15 = vshll.u32 %v1122_v7, 16  ;;  %v770_v40 = vunpack.c.l.b16 %v764_v62  ;;  %v983_v62 = vld [vmem:[#allocation2 + $0xc] sm:$0x1] }
  0xc7   : > { %v688_v51 = vpack.c.b16 %v685_v14, %v684_v33  ;;  %v1134_v6 = vor.u32 %v1133_v10, %v1130_v9  ;;  %v1137_v13 = vshll.u32 %v1120_v23, 16  ;;  %v1148_v8 = vor.u32 %v1147_v28, %v1144_v24  ;;  %v985_v63 = vld [vmem:[#allocation2 + $0x14] sm:$0x1]  ;;  %v877_v10 = vld [vmem:[#allocation2 + $0x24] sm:$0x1] }
  0xc8   : > { %v681_v16 = vsel %vm2482_vm14, %v676_v4, %v680_v0  ;;  %v886_v46 = vrot.slane %v885_v18, 4  ;;  %v900_v32 = vrot.slane %v899_v21, 4  ;;  %v904_v33 = vrot.slane %v902_v22, 5  ;;  %v875_v0 = vld [vmem:[#allocation2 + $0x1c] sm:$0x1] }
  0xc9   : > { %2011 = vmatmul.msk.bf16.vlgmr.msra.gmra.mxu1 %vm580_vm11, %v688_v51  ;;  %v769_v5 = vunpack.c.l.b16 %v760_v27  ;;  %v667_v35 = vsel %vm2482_vm14, %v662_v29, %v666_v30  ;;  %v890_v36 = vrot.slane %v888_v31, 5  ;;  %v1149_v37 = vrot.slane %v1148_v8, 4  ;;  %v1125_v51 = vld [vmem:[#allocation2 + $0x28] sm:$0xf]  ;;  %v1124_v21 = vld [vmem:[#allocation2 + $0x24] sm:$0x1] }
  0xca   : > { %v1153_v38 = vrot.slane %v1151_v15, 5  ;;  %v687_v20 = vunpack.c.l.b16 %v681_v16  ;;  %v1135_v14 = vrot.slane %v1134_v6, 4  ;;  %v1139_v19 = vrot.slane %v1137_v13, 5  ;;  %v1126_v29 = vld [vmem:[#allocation2 + $0x2c] sm:$0x1] }
  0xcb   : > { %v772_v41 = vpack.c.b16 %v770_v40, %v769_v5  ;;  %v891_v44 = vsel %vm2482_vm14, %v886_v46, %v890_v36  ;;  %v905_v43 = vsel %vm2482_vm14, %v900_v32, %v904_v33  ;;  %v907_v47 = vshrl.u32 %v874_v34, 16 }
  0xcc   : > { %2009 = vmatmul.msk.bf16.gmra.mxu0 %vm580_vm11, %v2007_v25  ;;  %v910_v17 = vshll.u32 %v874_v34, 16  ;;  %v686_v48 = vunpack.c.l.b16 %v667_v35  ;;  %v921_v49 = vshrl.u32 %v876_v39, 16  ;;  %v924_v50 = vshll.u32 %v876_v39, 16  ;;  %v2106_v34 = vld [vmem:[#allocation2 + $0x14] sm:$0xf0] }
  0xcd   : > { %2030 = vmatmul.msk.bf16.gmra.mxu3 %vm580_vm11, %v2028_v26  ;;  %v1154_v52 = vsel %vm2482_vm14, %v1149_v37, %v1153_v38  ;;  %v1156_v54 = vshrl.u32 %v1123_v42, 16  ;;  %v1159_v55 = vshll.u32 %v1123_v42, 16  ;;  %v936_v58 = vunpack.c.l.b16 %v891_v44 }
  0xce   : > { %v689_v57 = vpack.c.b16 %v687_v20, %v686_v48  ;;  %v937_v59 = vunpack.c.l.b16 %v905_v43  ;;  %v1140_v60 = vsel %vm2482_vm14, %v1135_v14, %v1139_v19  ;;  %v909_v1 = vrot.slane %v907_v47, 4  ;;  %v2044_v20 = vld [vmem:[#allocation2 + $0x10] sm:$0xf] }
  0xcf   : > { %v912_v2 = vrot.slane %v910_v17, 5  ;;  %v1170_v4 = vshrl.u32 %v1125_v51, 16  ;;  %v1173_v7 = vshll.u32 %v1125_v51, 16  ;;  %v1186_v9 = vunpack.c.l.b16 %v1154_v52 }
  0xd0   : > { %v923_v11 = vrot.slane %v921_v49, 4  ;;  %v926_v12 = vrot.slane %v924_v50, 5  ;;  %v1278_v18 = vsel %vm587_vm7, %v2059_v56, 0  ;;  %v1158_v22 = vrot.slane %v1156_v54, 4 }
  0xd1   : > { %v1161_v23 = vrot.slane %v1159_v55, 5  ;;  %v1172_v24 = vrot.slane %v1170_v4, 4  ;;  %v1175_v25 = vrot.slane %v1173_v7, 5  ;;  %1287 = vmatpush.bf16.msra.mxu0 %v1278_v18  ;;  %v1185_v26 = vunpack.c.l.b16 %v1140_v60  ;;  %v989_v60 = vld [vmem:[#allocation2 + $0x24] sm:$0x1] }
  0xd2   : > { %2019 = vmatmul.msk.bf16.gmra.mxu2 %vm580_vm11, %v772_v41  ;;  %v2034_v27 = vrot.slane %v982_v61, 9  ;;  %v2035_v28 = vrot.slane %v984_v53, 9  ;;  %v940_v30 = vpack.c.b16 %v937_v59, %v936_v58  ;;  %v1000_v31 = vrot.slane %v983_v62, 5  ;;  %v987_v58 = vld [vmem:[#allocation2 + $0x1c] sm:$0x1] }
  0xd3   : > { %v1004_v15 = vrot.slane %v985_v63, 5  ;;  %v916_v40 = vshll.u32 %v875_v0, 16  ;;  %v1189_v6 = vpack.c.b16 %v1186_v9, %v1185_v26  ;;  %v913_v13 = vor.u32 %v912_v2, %v909_v1  ;;  %v988_v59 = vld [vmem:[#allocation2 + $0x20] sm:$0xe]  ;;  %v1233_v4 = vld [vmem:[#allocation2 + $0x18] sm:$0xe] }
  0xd4   : > { %v930_v8 = vshll.u32 %v877_v10, 16  ;;  %v1165_v16 = vshll.u32 %v1124_v21, 16  ;;  %v927_v46 = vor.u32 %v926_v12, %v923_v11  ;;  %v1162_v32 = vor.u32 %v1161_v23, %v1158_v22  ;;  %v1234_v7 = vld [vmem:[#allocation2 + $0x1c] sm:$0x1]  ;;  %v2048_v9 = vld [vmem:[#allocation2 + $0x20] sm:$0xf] }
  0xd5   : > { %v1176_v33 = vor.u32 %v1175_v25, %v1172_v24  ;;  %v1179_v5 = vshll.u32 %v1126_v29, 16  ;;  %v1001_v35 = vsel %vm2468_vm12, %v2034_v27, %v1000_v31  ;;  %v1005_v36 = vsel %vm2468_vm12, %v2035_v28, %v1004_v15  ;;  %v2107_v10 = vld [vmem:[#allocation2 + $0x24] sm:$0xf0]  ;;  %v1231_v18 = vld [vmem:[#allocation2 + $0x10] sm:$0xe] }
  0xd6   : > { %v914_v37 = vrot.slane %v913_v13, 4  ;;  %v918_v38 = vrot.slane %v916_v40, 5  ;;  %v932_v39 = vrot.slane %v930_v8, 5  ;;  %v1167_v41 = vrot.slane %v1165_v16, 5  ;;  %v1232_v21 = vld [vmem:[#allocation2 + $0x14] sm:$0x1] }
  0xd7   : > { %v928_v14 = vrot.slane %v927_v46, 4  ;;  %v1163_v19 = vrot.slane %v1162_v32, 4  ;;  %v1177_v42 = vrot.slane %v1176_v33, 4  ;;  %v1181_v44 = vrot.slane %v1179_v5, 5  ;;  %v1235_v13 = vld [vmem:[#allocation2 + $0x20] sm:$0xe] }
  0xd8   : > { %v2045_v43 = vor.u32 %v2106_v34, %v2044_v20  ;;  %v1016_v47 = vunpack.c.l.b16 %v1001_v35  ;;  %v1017_v17 = vunpack.c.l.b16 %v1005_v36  ;;  %v919_v48 = vsel %vm2482_vm14, %v914_v37, %v918_v38  ;;  %v1236_v8 = vld [vmem:[#allocation2 + $0x24] sm:$0x1]  ;;  %v1237_v16 = vld [vmem:[#allocation2 + $0x28] sm:$0xe]  ;;  %v1238_v46 = vld [vmem:[#allocation2 + $0x2c] sm:$0x1] }
  0xd9   : > { %2012 = vmatmul.msk.bf16.gmra.mxu1 %vm580_vm11, %v689_v57  ;;  %v933_v49 = vsel %vm2482_vm14, %v928_v14, %v932_v39  ;;  %v1168_v50 = vsel %vm2482_vm14, %v1163_v19, %v1167_v41  ;;  %v1182_v51 = vsel %vm2482_vm14, %v1177_v42, %v1181_v44  ;;  %v938_v53 = vunpack.c.l.b16 %v919_v48  ;;  %v986_v57 = vld [vmem:[#allocation2 + $0x18] sm:$0xe] }
  0xda   : > { %v1020_v52 = vpack.c.b16 %v1017_v17, %v1016_v47  ;;  %v939_v54 = vunpack.c.l.b16 %v933_v49  ;;  %v1187_v55 = vunpack.c.l.b16 %v1168_v50  ;;  %v1188_v56 = vunpack.c.l.b16 %v1182_v51 }
  0xdb   : > { %v2036_v61 = vrot.slane %v986_v57, 9  ;;  %v1008_v62 = vrot.slane %v987_v58, 5  ;;  %v2037_v1 = vrot.slane %v988_v59, 9  ;;  %v1012_v2 = vrot.slane %v989_v60, 5 }
  0xdc   : > { %2032 = vmatmul.msk.bf16.vlgmr.msrb.gmra.mxu0 %vm580_vm11, %v940_v30  ;;  %v941_v63 = vpack.c.b16 %v939_v54, %v938_v53  ;;  %v1190_v0 = vpack.c.b16 %v1188_v56, %v1187_v55  ;;  %v2056_v22 = vrot.slane %v1233_v4, 9  ;;  %v1253_v23 = vrot.slane %v1234_v7, 5 }
  0xdd   : > { %2053 = vmatmul.msk.bf16.vlgmr.msrb.gmra.mxu3 %vm580_vm11, %v1189_v6  ;;  %v1009_v11 = vsel %vm2468_vm12, %v2036_v61, %v1008_v62  ;;  %v1013_v12 = vsel %vm2468_vm12, %v2037_v1, %v1012_v2  ;;  %v2049_v24 = vor.u32 %v2107_v10, %v2048_v9  ;;  %v2055_v27 = vrot.slane %v1231_v18, 9 }
  0xde   : > { %v1018_v25 = vunpack.c.l.b16 %v1009_v11  ;;  %v1019_v26 = vunpack.c.l.b16 %v1013_v12  ;;  %v1249_v28 = vrot.slane %v1232_v21, 5  ;;  %v1254_v29 = vsel %vm2468_vm12, %v2056_v22, %v1253_v23 }
  0xdf   : > { %v1266_v15 = vunpack.c.l.b16 %v1254_v29  ;;  %v2057_v32 = vrot.slane %v1235_v13, 9  ;;  %v1257_v33 = vrot.slane %v1236_v8, 5  ;;  %v2058_v5 = vrot.slane %v1237_v16, 9 }
  0xe0   : > { %v1021_v30 = vpack.c.b16 %v1019_v26, %v1018_v25  ;;  %v1250_v31 = vsel %vm2468_vm12, %v2055_v27, %v1249_v28  ;;  %v1261_v34 = vrot.slane %v1238_v46, 5 }
  0xe1   : > { %v1265_v40 = vunpack.c.l.b16 %v1250_v31  ;;  %v1258_v35 = vsel %vm2468_vm12, %v2057_v32, %v1257_v33 }
  0xe2   : > { %2050 = vmatmul.msk.bf16.vlgmr.msrb.gmra.mxu2 %vm580_vm11, %v2045_v43  ;;  %v1262_v36 = vsel %vm2468_vm12, %v2058_v5, %v1261_v34  ;;  %v1267_v37 = vunpack.c.l.b16 %v1258_v35 }
  0xe3   : > { %v1269_v6 = vpack.c.b16 %v1266_v15, %v1265_v40  ;;  %v1268_v38 = vunpack.c.l.b16 %v1262_v36 }
  0xe5   : > { %v1270_v39 = vpack.c.b16 %v1268_v38, %v1267_v37 }
  0xe9   : > { %2039 = vmatmul.msk.bf16.vlgmr.msrb.gmra.mxu1 %vm580_vm11, %v1020_v52 }
  0xec   : > { %2033 = vmatmul.msk.bf16.gmra.mxu0 %vm580_vm11, %v941_v63 }
  0xed   : > { %2054 = vmatmul.msk.bf16.gmra.mxu3 %vm580_vm11, %v1190_v0 }
  0xf2   : > { %2051 = vmatmul.msk.bf16.gmra.mxu2 %vm580_vm11, %v2049_v24 }
  0xf9   : > { %2040 = vmatmul.msk.bf16.gmra.mxu1 %vm580_vm11, %v1021_v30 }
  0xfc   : > { %2060 = vmatmul.msk.bf16.vlgmr.msra.gmra.mxu0 %vm580_vm11, %v1269_v6 }
 0x10c   : > { %2061 = vmatmul.msk.bf16.gmra.mxu0 %vm580_vm11, %v1270_v39 }
 0x139   : > { %v600_v41 = vpop.f32.mrf.mxu0 }
 0x13a   : > { %611 = vst.msk [vmem:[#allocation4] sm:$0xff] %vm610_vm15, %v600_v41 }
 0x140   : > { %v848_v51 = vpop.f32.mrf.mxu3 }
 0x141   : > { %v602_v20 = vpop.f32.mrf.mxu0  ;;  %v718_v19 = vld [vmem:[#allocation4] sm:$0xff] }
 0x142   : > { %612 = vst.msk [vmem:[#allocation4 + $0x8] sm:$0xff] %vm610_vm15, %v602_v20 }
 0x145   : > { %v791_v44 = vpop.f32.mrf.mxu2 }
 0x146   : > { %v708_v14 = vpop.f32.mrf.mxu1 }
 0x147   : > { %v722_v42 = vadd.f32 %v718_v19, %v708_v14 }
 0x148   : > { %v850_v61 = vpop.f32.mrf.mxu3 }
 0x149   : > { %726 = vst.msk [vmem:[#allocation4] sm:$0xff] %vm610_vm15, %v722_v42  ;;  %v605_v43 = vpop.f32.mrf.mxu0  ;;  %v719_v17 = vld [vmem:[#allocation4 + $0x8] sm:$0xff] }
 0x14a   : > { %613 = vst.msk [vmem:[#allocation4 + $0x10] sm:$0xff] %vm610_vm15, %v605_v43 }
 0x14d   : > { %v793_v52 = vpop.f32.mrf.mxu2 }
 0x14e   : > { %v710_v47 = vpop.f32.mrf.mxu1 }
 0x14f   : > { %v723_v48 = vadd.f32 %v719_v17, %v710_v47 }
 0x150   : > { %v801_v49 = vld [vmem:[#allocation4] sm:$0xff]  ;;  %v853_v18 = vpop.f32.mrf.mxu3 }
 0x151   : > { %v805_v50 = vadd.f32 %v801_v49, %v791_v44  ;;  %727 = vst.msk [vmem:[#allocation4 + $0x8] sm:$0xff] %vm610_vm15, %v723_v48  ;;  %v607_v53 = vpop.f32.mrf.mxu0  ;;  %v720_v55 = vld [vmem:[#allocation4 + $0x10] sm:$0xff] }
 0x152   : > { %614 = vst.msk [vmem:[#allocation4 + $0x18] sm:$0xff] %vm610_vm15, %v607_v53 }
 0x153   : > { %809 = vst.msk [vmem:[#allocation4] sm:$0xff] %vm610_vm15, %v805_v50 }
 0x155   : > { %v796_v62 = vpop.f32.mrf.mxu2 }
 0x156   : > { %v713_v54 = vpop.f32.mrf.mxu1 }
 0x157   : > { %v724_v56 = vadd.f32 %v720_v55, %v713_v54 }
 0x158   : > { %v802_v57 = vld [vmem:[#allocation4 + $0x8] sm:$0xff]  ;;  %v855_v15 = vpop.f32.mrf.mxu3 }
 0x159   : > { %v806_v58 = vadd.f32 %v802_v57, %v793_v52  ;;  %728 = vst.msk [vmem:[#allocation4 + $0x10] sm:$0xff] %vm610_vm15, %v724_v56  ;;  %v960_v63 = vpop.f32.mrf.mxu0  ;;  %v721_v1 = vld [vmem:[#allocation4 + $0x18] sm:$0xff] }
 0x15a   : > { %v858_v59 = vld [vmem:[#allocation4] sm:$0xff] }
 0x15b   : > { %810 = vst.msk [vmem:[#allocation4 + $0x8] sm:$0xff] %vm610_vm15, %v806_v58  ;;  %v862_v60 = vadd.f32 %v858_v59, %v848_v51 }
 0x15d   : > { %866 = vst.msk [vmem:[#allocation4] sm:$0xff] %vm610_vm15, %v862_v60  ;;  %v798_v21 = vpop.f32.mrf.mxu2  ;;  %v2594_v60 = vld [vmem:[%s2785_s2] ss:$0 sm:$0xff] }
 0x15e   : > { %v715_v0 = vpop.f32.mrf.mxu1 }
 0x15f   : > { %v725_v2 = vadd.f32 %v721_v1, %v715_v0  ;;  %v2599_v0 = vld [vmem:[%s2786_s3] ss:$0 sm:$0xff] }
 0x160   : > { %v803_v4 = vld [vmem:[#allocation4 + $0x10] sm:$0xff]  ;;  %v1209_v14 = vpop.f32.mrf.mxu3 }
 0x161   : > { %v807_v7 = vadd.f32 %v803_v4, %v796_v62  ;;  %729 = vst.msk [vmem:[#allocation4 + $0x18] sm:$0xff] %vm610_vm15, %v725_v2  ;;  %v962_v23 = vpop.f32.mrf.mxu0 }
 0x162   : > { %v859_v9 = vld [vmem:[#allocation4 + $0x8] sm:$0xff] }
 0x163   : > { %811 = vst.msk [vmem:[#allocation4 + $0x10] sm:$0xff] %vm610_vm15, %v807_v7  ;;  %v863_v10 = vadd.f32 %v859_v9, %v850_v61 }
 0x164   : > { %v970_v11 = vld [vmem:[#allocation4] sm:$0xff] }
 0x165   : > { %v974_v12 = vadd.f32 %v970_v11, %v960_v63  ;;  %867 = vst.msk [vmem:[#allocation4 + $0x8] sm:$0xff] %vm610_vm15, %v863_v10  ;;  %v1097_v8 = vpop.f32.mrf.mxu2 }
 0x166   : > { %v1040_v25 = vpop.f32.mrf.mxu1 }
 0x167   : > { %978 = vst.msk [vmem:[#allocation4] sm:$0xff] %vm610_vm15, %v974_v12 }
 0x168   : > { %v804_v22 = vld [vmem:[#allocation4 + $0x18] sm:$0xff]  ;;  %v1211_v49 = vpop.f32.mrf.mxu3 }
 0x169   : > { %v808_v24 = vadd.f32 %v804_v22, %v798_v21  ;;  %v965_v40 = vpop.f32.mrf.mxu0 }
 0x16a   : > { %v860_v26 = vld [vmem:[#allocation4 + $0x10] sm:$0xff] }
 0x16b   : > { %812 = vst.msk [vmem:[#allocation4 + $0x18] sm:$0xff] %vm610_vm15, %v808_v24  ;;  %v864_v27 = vadd.f32 %v860_v26, %v853_v18 }
 0x16c   : > { %v971_v28 = vld [vmem:[#allocation4 + $0x8] sm:$0xff] }
 0x16d   : > { %v975_v29 = vadd.f32 %v971_v28, %v962_v23  ;;  %868 = vst.msk [vmem:[#allocation4 + $0x10] sm:$0xff] %vm610_vm15, %v864_v27  ;;  %v1099_v39 = vpop.f32.mrf.mxu2 }
 0x16e   : > { %v1050_v30 = vld [vmem:[#allocation4] sm:$0xff]  ;;  %v1042_v46 = vpop.f32.mrf.mxu1 }
 0x16f   : > { %979 = vst.msk [vmem:[#allocation4 + $0x8] sm:$0xff] %vm610_vm15, %v975_v29  ;;  %v1054_v31 = vadd.f32 %v1050_v30, %v1040_v25 }
 0x170   : > { %v1214_v59 = vpop.f32.mrf.mxu3 }
 0x171   : > { %1058 = vst.msk [vmem:[#allocation4] sm:$0xff] %vm610_vm15, %v1054_v31  ;;  %v967_v36 = vpop.f32.mrf.mxu0 }
 0x172   : > { %v861_v6 = vld [vmem:[#allocation4 + $0x18] sm:$0xff] }
 0x173   : > { %v865_v13 = vadd.f32 %v861_v6, %v855_v15  ;;  %v1386_v6 = vld [vmem:[#allocation3 + $0x4] sm:$0x1] }
 0x174   : > { %v972_v16 = vld [vmem:[#allocation4 + $0x10] sm:$0xff] }
 0x175   : > { %v976_v32 = vadd.f32 %v972_v16, %v965_v40  ;;  %869 = vst.msk [vmem:[#allocation4 + $0x18] sm:$0xff] %vm610_vm15, %v865_v13  ;;  %v1102_v17 = vpop.f32.mrf.mxu2  ;;  %v1381_v40 = vld [vmem:[#allocation3] sm:$0xf] }
 0x176   : > { %v1051_v33 = vld [vmem:[#allocation4 + $0x8] sm:$0xff]  ;;  %v1045_v41 = vpop.f32.mrf.mxu1 }
 0x177   : > { %980 = vst.msk [vmem:[#allocation4 + $0x10] sm:$0xff] %vm610_vm15, %v976_v32  ;;  %v1055_v5 = vadd.f32 %v1051_v33, %v1042_v46 }
 0x178   : > { %v1107_v34 = vld [vmem:[#allocation4] sm:$0xff]  ;;  %v1216_v22 = vpop.f32.mrf.mxu3 }
 0x179   : > { %v1111_v35 = vadd.f32 %v1107_v34, %v1097_v8  ;;  %1059 = vst.msk [vmem:[#allocation4 + $0x8] sm:$0xff] %vm610_vm15, %v1055_v5  ;;  %v1289_v51 = vpop.f32.mrf.mxu0 }
 0x17b   : > { %1115 = vst.msk [vmem:[#allocation4] sm:$0xff] %vm610_vm15, %v1111_v35 }
 0x17c   : > { %v973_v37 = vld [vmem:[#allocation4 + $0x18] sm:$0xff] }
 0x17d   : > { %v977_v38 = vadd.f32 %v973_v37, %v967_v36  ;;  %v1104_v61 = vpop.f32.mrf.mxu2 }
 0x17e   : > { %v1052_v20 = vld [vmem:[#allocation4 + $0x10] sm:$0xff]  ;;  %v1047_v52 = vpop.f32.mrf.mxu1 }
 0x17f   : > { %981 = vst.msk [vmem:[#allocation4 + $0x18] sm:$0xff] %vm610_vm15, %v977_v38  ;;  %v1056_v19 = vadd.f32 %v1052_v20, %v1045_v41 }
 0x180   : > { %v1108_v42 = vld [vmem:[#allocation4 + $0x8] sm:$0xff] }
 0x181   : > { %v1112_v44 = vadd.f32 %v1108_v42, %v1099_v39  ;;  %1060 = vst.msk [vmem:[#allocation4 + $0x10] sm:$0xff] %vm610_vm15, %v1056_v19  ;;  %v1291_v63 = vpop.f32.mrf.mxu0 }
 0x182   : > { %v1219_v43 = vld [vmem:[#allocation4] sm:$0xff] }
 0x183   : > { %1116 = vst.msk [vmem:[#allocation4 + $0x8] sm:$0xff] %vm610_vm15, %v1112_v44  ;;  %v1223_v47 = vadd.f32 %v1219_v43, %v1209_v14  ;;  %v1389_v43 = vld [vmem:[#allocation3 + $0x8] sm:$0xf] }
 0x185   : > { %1227 = vst.msk [vmem:[#allocation4] sm:$0xff] %vm610_vm15, %v1223_v47 }
 0x186   : > { %v1053_v53 = vld [vmem:[#allocation4 + $0x18] sm:$0xff] }
 0x187   : > { %v1057_v54 = vadd.f32 %v1053_v53, %v1047_v52 }
 0x188   : > { %v1109_v48 = vld [vmem:[#allocation4 + $0x10] sm:$0xff] }
 0x189   : > { %v1113_v50 = vadd.f32 %v1109_v48, %v1102_v17  ;;  %1061 = vst.msk [vmem:[#allocation4 + $0x18] sm:$0xff] %vm610_vm15, %v1057_v54  ;;  %v1294_v23 = vpop.f32.mrf.mxu0 }
 0x18a   : > { %v1220_v57 = vld [vmem:[#allocation4 + $0x8] sm:$0xff] }
 0x18b   : > { %1117 = vst.msk [vmem:[#allocation4 + $0x10] sm:$0xff] %vm610_vm15, %v1113_v50  ;;  %v1224_v58 = vadd.f32 %v1220_v57, %v1211_v49  ;;  %v1392_v49 = vld [vmem:[#allocation3 + $0xc] sm:$0x1] }
 0x18c   : > { %v1299_v55 = vld [vmem:[#allocation4] sm:$0xff] }
 0x18d   : > { %v1303_v56 = vadd.f32 %v1299_v55, %v1289_v51  ;;  %1228 = vst.msk [vmem:[#allocation4 + $0x8] sm:$0xff] %vm610_vm15, %v1224_v58 }
 0x18f   : > { %1307 = vst.msk [vmem:[#allocation4] sm:$0xff] %vm610_vm15, %v1303_v56 }
 0x190   : > { %v1110_v62 = vld [vmem:[#allocation4 + $0x18] sm:$0xff] }
 0x191   : > { %v1114_v1 = vadd.f32 %v1110_v62, %v1104_v61  ;;  %v1296_v35 = vpop.f32.mrf.mxu0 }
 0x192   : > { %v1221_v4 = vld [vmem:[#allocation4 + $0x10] sm:$0xff] }
 0x193   : > { %1118 = vst.msk [vmem:[#allocation4 + $0x18] sm:$0xff] %vm610_vm15, %v1114_v1  ;;  %v1225_v9 = vadd.f32 %v1221_v4, %v1214_v59  ;;  %v1395_v1 = vld [vmem:[#allocation3 + $0x10] sm:$0xf] }
 0x194   : > { %v1300_v10 = vld [vmem:[#allocation4 + $0x8] sm:$0xff] }
 0x195   : > { %v1304_v12 = vadd.f32 %v1300_v10, %v1291_v63  ;;  %1229 = vst.msk [vmem:[#allocation4 + $0x10] sm:$0xff] %vm610_vm15, %v1225_v9 }
 0x196   : > { %v1311_v2 = vld [vmem:[#allocation4] sm:$0xff] }
 0x197   : > { %v1319_v7 = vmul.f32 %v2594_v60, %v1311_v2  ;;  %1308 = vst.msk [vmem:[#allocation4 + $0x8] sm:$0xff] %vm610_vm15, %v1304_v12 }
 0x199   : > { %v1327_v11 = vadd.f32 %v2599_v0, %v1319_v7  ;;  %v1398_v7 = vld [vmem:[#allocation3 + $0x14] sm:$0x1] }
 0x19a   : > { %v1222_v24 = vld [vmem:[#allocation4 + $0x18] sm:$0xff] }
 0x19b   : > { %v1331_v18 = vmax.f32 %v1327_v11, 0.0  ;;  %v1226_v26 = vadd.f32 %v1222_v24, %v1216_v22 }
 0x19c   : > { %v1301_v28 = vld [vmem:[#allocation4 + $0x10] sm:$0xff] }
 0x19d   : > { %v1335_v21 = vpack.c.bf16 %v1331_v18, %v1331_v18  ;;  %v1305_v15 = vadd.f32 %v1301_v28, %v1294_v23  ;;  %1230 = vst.msk [vmem:[#allocation4 + $0x18] sm:$0xff] %vm610_vm15, %v1226_v26  ;;  %v1404_v26 = vld [vmem:[#allocation3 + $0x1c] sm:$0x1] }
 0x19e   : > { %v1312_v13 = vld [vmem:[#allocation4 + $0x8] sm:$0xff] }
 0x19f   : > { %v1340_v25 = vshrl.u32 %v1335_v21, 16  ;;  %v1343_v31 = vshll.u32 %v1335_v21, 16  ;;  %v1320_v46 = vmul.f32 %v2594_v60, %v1312_v13  ;;  %1309 = vst.msk [vmem:[#allocation4 + $0x10] sm:$0xff] %vm610_vm15, %v1305_v15 }
 0x1a1   : > { %v1342_v30 = vrot.slane %v1340_v25, 7  ;;  %v1328_v5 = vadd.f32 %v2599_v0, %v1320_v46  ;;  %v1401_v25 = vld [vmem:[#allocation3 + $0x18] sm:$0xf] }
 0x1a3   : > { %v1345_v8 = vor.u32 %v1343_v31, %v1342_v30  ;;  %v1346_v16 = vrot.slane %v1342_v30, 4  ;;  %v1332_v34 = vmax.f32 %v1328_v5, 0.0 }
 0x1a4   : > { %v1302_v36 = vld [vmem:[#allocation4 + $0x18] sm:$0xff] }
 0x1a5   : > { %v1382_v32 = vsel %vm2608_vm4, %v1345_v8, %v1381_v40  ;;  %v1387_v33 = vsel %vm2614_vm5, %v1346_v16, %v1386_v6  ;;  %v1336_v37 = vpack.c.bf16 %v1332_v34, %v1332_v34  ;;  %v1306_v38 = vadd.f32 %v1302_v36, %v1296_v35 }
 0x1a6   : > { %1383 = vst [vmem:[#allocation3] sm:$0xf] %v1382_v32  ;;  %v1313_v39 = vld [vmem:[#allocation4 + $0x10] sm:$0xff] }
 0x1a7   : > { %1388 = vst [vmem:[#allocation3 + $0x4] sm:$0x1] %v1387_v33  ;;  %v1348_v41 = vshrl.u32 %v1336_v37, 16  ;;  %v1321_v20 = vmul.f32 %v2594_v60, %v1313_v39  ;;  %v1351_v44 = vshll.u32 %v1336_v37, 16 }
 0x1a8   : > { %1310 = vst.msk [vmem:[#allocation4 + $0x18] sm:$0xff] %vm610_vm15, %v1306_v38 }
 0x1a9   : > { %v1350_v42 = vrot.slane %v1348_v41, 7  ;;  %v1329_v47 = vadd.f32 %v2599_v0, %v1321_v20 }
 0x1ab   : > { %v1353_v51 = vor.u32 %v1351_v44, %v1350_v42  ;;  %v1354_v52 = vrot.slane %v1350_v42, 4  ;;  %v1333_v53 = vmax.f32 %v1329_v47, 0.0 }
 0x1ad   : > { %v1407_v19 = vld [vmem:[#allocation3] sm:$0x1]  ;;  %v1390_v54 = vsel %vm2608_vm4, %v1353_v51, %v1389_v43  ;;  %v1393_v55 = vsel %vm2614_vm5, %v1354_v52, %v1392_v49  ;;  %v1337_v56 = vpack.c.bf16 %v1333_v53, %v1333_v53 }
 0x1ae   : > { %v1408_v17 = vsel %vm2614_vm5, 0, %v1407_v19  ;;  %v1420_v48 = vld [vmem:[#allocation3 + $0x4] sm:$0x1]  ;;  %1391 = vst [vmem:[#allocation3 + $0x8] sm:$0xf] %v1390_v54 }
 0x1af   : > { %1409 = vst [vmem:[#allocation3] sm:$0x1] %v1408_v17  ;;  %v1421_v50 = vsel %vm2630_vm3, 0, %v1420_v48  ;;  %v1314_v57 = vld [vmem:[#allocation4 + $0x18] sm:$0xff]  ;;  %v1356_v58 = vshrl.u32 %v1337_v56, 16  ;;  %v1359_v62 = vshll.u32 %v1337_v56, 16 }
 0x1b0   : > { %1422 = vst [vmem:[#allocation3 + $0x4] sm:$0x1] %v1421_v50  ;;  %v1322_v59 = vmul.f32 %v2594_v60, %v1314_v57 }
 0x1b1   : > { %1394 = vst [vmem:[#allocation3 + $0xc] sm:$0x1] %v1393_v55  ;;  %v1358_v61 = vrot.slane %v1356_v58, 7 }
 0x1b2   : > { %v1330_v63 = vadd.f32 %v2599_v0, %v1322_v59 }
 0x1b3   : > { %v1361_v2 = vor.u32 %v1359_v62, %v1358_v61  ;;  %v1362_v4 = vrot.slane %v1358_v61, 4 }
 0x1b4   : > { %v1334_v9 = vmax.f32 %v1330_v63, 0.0 }
 0x1b5   : > { %v1410_v10 = vld [vmem:[#allocation3 + $0x8] sm:$0x1]  ;;  %v1396_v11 = vsel %vm2608_vm4, %v1361_v2, %v1395_v1  ;;  %v1399_v60 = vsel %vm2614_vm5, %v1362_v4, %v1398_v7 }
 0x1b6   : > { %v1338_v12 = vpack.c.bf16 %v1334_v9, %v1334_v9  ;;  %v1411_v18 = vsel %vm2614_vm5, 0, %v1410_v10  ;;  %1397 = vst [vmem:[#allocation3 + $0x10] sm:$0xf] %v1396_v11 }
 0x1b7   : > { %1412 = vst [vmem:[#allocation3 + $0x8] sm:$0x1] %v1411_v18 }
 0x1b8   : > { %v1423_v21 = vld [vmem:[#allocation3 + $0xc] sm:$0x1]  ;;  %v1364_v22 = vshrl.u32 %v1338_v12, 16  ;;  %1400 = vst [vmem:[#allocation3 + $0x14] sm:$0x1] %v1399_v60  ;;  %v1367_v24 = vshll.u32 %v1338_v12, 16 }
 0x1b9   : > { %v1424_v0 = vsel %vm2630_vm3, 0, %v1423_v21 }
 0x1ba   : > { %1425 = vst [vmem:[#allocation3 + $0xc] sm:$0x1] %v1424_v0  ;;  %v1366_v23 = vrot.slane %v1364_v22, 7 }
 0x1bc   : > { %v1369_v28 = vor.u32 %v1367_v24, %v1366_v23  ;;  %v1370_v30 = vrot.slane %v1366_v23, 4 }
 0x1bd   : > { %v1413_v31 = vld [vmem:[#allocation3 + $0x10] sm:$0x1] }
 0x1be   : > { %v1402_v15 = vsel %vm2608_vm4, %v1369_v28, %v1401_v25  ;;  %v1405_v40 = vsel %vm2614_vm5, %v1370_v30, %v1404_v26  ;;  %v1414_v6 = vsel %vm2614_vm5, 0, %v1413_v31 }
 0x1bf   : > { %1403 = vst [vmem:[#allocation3 + $0x18] sm:$0xf] %v1402_v15  ;;  %v1426_v13 = vld [vmem:[#allocation3 + $0x14] sm:$0x1] }
 0x1c0   : > { %1415 = vst [vmem:[#allocation3 + $0x10] sm:$0x1] %v1414_v6  ;;  %v1427_v8 = vsel %vm2630_vm3, 0, %v1426_v13 }
 0x1c1   : > { %1406 = vst [vmem:[#allocation3 + $0x1c] sm:$0x1] %v1405_v40 }
 0x1c2   : > { %1428 = vst [vmem:[#allocation3 + $0x14] sm:$0x1] %v1427_v8 }
 0x1c6   : > { %v1416_v16 = vld [vmem:[#allocation3 + $0x18] sm:$0x1]  ;;  %1435 = sbr.rel (%p2062_p7) target bundleno = 462 (0x1ce), region = 52 }
 0x1c7   : > { %v1417_v46 = vsel %vm2614_vm5, 0, %v1416_v16 }
 0x1c8   : > { %1418 = vst [vmem:[#allocation3 + $0x18] sm:$0x1] %v1417_v46  ;;  %v1429_v27 = vld [vmem:[#allocation3 + $0x1c] sm:$0x1] }
 0x1c9   : > { %v1430_v32 = vsel %vm2630_vm3, 0, %v1429_v27 }
 0x1ca   : > { %1431 = vst [vmem:[#allocation3 + $0x1c] sm:$0x1] %v1430_v32 }
 0x1cb   : > { %v2259_v33 = vmov 0  }
 0x1cc   : > { %1437 = vst.msk [vmem:[#allocation3] sm:$0xf] %vm1379_vm0, %v2259_v33 }
 0x1cd   : > { %1439 = vst.msk [vmem:[#allocation3 + $0x4] sm:$0x1] %vm1384_vm2, %v2259_v33 }
 0x1ce PF: > { %p2063_p8 = scmp.ne.s32.totalorder %s2240_s24, 3 }
 0x1d0   : > { %1443 = sbr.rel (%p2063_p8) target bundleno = 472 (0x1d8), region = 56 }
 0x1d5   : > { %v2260_v29 = vmov 0  }
 0x1d6   : > { %1446 = vst.msk [vmem:[#allocation3 + $0x18] sm:$0xf] %vm1379_vm0, %v2260_v29 }
 0x1d7   : > { %1448 = vst.msk [vmem:[#allocation3 + $0x1c] sm:$0x1] %vm1384_vm2, %v2260_v29 }
 0x1d8 PF: > { %v1451_v5 = vld [vmem:[%s2787_s4] sm:$0xf]  ;;  %vm1460_vm1 = vcmask 1043456   ;;  %v2066_v34 = vld [vmem:[#allocation3] sm:$0xf] }
 0x1d9   : > { %v1462_v35 = vsel %vm1460_vm1, %v1451_v5, 0  ;;  %v2108_v36 = vld [vmem:[#allocation3 + $0x4] sm:$0xf0]  ;;  %v2069_v37 = vld [vmem:[%s2787_s4 + $0x4] sm:$0xf] }
 0x1da   : > { %1471 = vmatpush.bf16.msra.mxu1 %v1462_v35  ;;  %v2067_v38 = vor.u32 %v2108_v36, %v2066_v34  ;;  %v1521_v39 = vsel %vm1460_vm1, %v2069_v37, 0  ;;  %v2073_v41 = vld [vmem:[%s2787_s4 + $0x8] sm:$0xf]  ;;  %v1480_v20 = vld [vmem:[#allocation3] sm:$0xf] }
 0x1db   : > { %1530 = vmatpush.bf16.msra.mxu2 %v1521_v39  ;;  %v1568_v14 = vsel %vm1460_vm1, %v2073_v41, 0  ;;  %v1481_v19 = vld [vmem:[#allocation3 + $0x4] sm:$0x1]  ;;  %v1482_v42 = vld [vmem:[#allocation3 + $0x8] sm:$0xf]  ;;  %v1485_v44 = vshrl.u32 %v1480_v20, 16 }
 0x1dc   : > { %1577 = vmatpush.bf16.msra.mxu3 %v1568_v14  ;;  %v1483_v43 = vld [vmem:[#allocation3 + $0xc] sm:$0x1]  ;;  %v1488_v47 = vshll.u32 %v1480_v20, 16  ;;  %v1494_v17 = vshll.u32 %v1481_v19, 16  ;;  %v1499_v48 = vshrl.u32 %v1482_v42, 16  ;;  %v1502_v49 = vshll.u32 %v1482_v42, 16 }
 0x1dd   : > { %2068 = vmatmul.msk.bf16.vlgmr.msra.gmra.mxu1 %vm610_vm15, %v2067_v38  ;;  %v1487_v50 = vrot.slane %v1485_v44, 4  ;;  %v1508_v51 = vshll.u32 %v1483_v43, 16  ;;  %v1543_v52 = vld [vmem:[#allocation3] sm:$0xe]  ;;  %v1544_v53 = vld [vmem:[#allocation3 + $0x4] sm:$0x1] }
 0x1de   : > { %v1490_v54 = vrot.slane %v1488_v47, 5  ;;  %v1501_v55 = vrot.slane %v1499_v48, 4  ;;  %v1504_v56 = vrot.slane %v1502_v49, 5  ;;  %v1545_v57 = vld [vmem:[#allocation3 + $0x8] sm:$0xe]  ;;  %v1496_v58 = vrot.slane %v1494_v17, 5 }
 0x1df   : > { %v1546_v59 = vld [vmem:[#allocation3 + $0xc] sm:$0x1]  ;;  %v2071_v61 = vrot.slane %v1543_v52, 9  ;;  %v1553_v62 = vrot.slane %v1544_v53, 5  ;;  %v2072_v63 = vrot.slane %v1545_v57, 9  ;;  %v1510_v4 = vrot.slane %v1508_v51, 5 }
 0x1e0   : > { %v1491_v1 = vor.u32 %v1490_v54, %v1487_v50  ;;  %v1505_v2 = vor.u32 %v1504_v56, %v1501_v55  ;;  %v1557_v7 = vrot.slane %v1546_v59, 5  ;;  %v2075_v9 = vld [vmem:[%s2787_s4 + $0xc] sm:$0xf]  ;;  %v2081_v10 = vld [vmem:[%s2787_s4 + $0x10] sm:$0xf] }
 0x1e1   : > { %v1554_v11 = vsel %vm2468_vm12, %v2071_v61, %v1553_v62  ;;  %v1604_v12 = vsel %vm1460_vm1, %v2075_v9, 0  ;;  %v1667_v18 = vsel %vm1460_vm1, %v2081_v10, 0  ;;  %v1626_v23 = vld [vmem:[#allocation3 + $0x8] sm:$0xf]  ;;  %v1627_v24 = vld [vmem:[#allocation3 + $0xc] sm:$0x1] }
 0x1e2   : > { %v1492_v21 = vrot.slane %v1491_v1, 4  ;;  %v1506_v60 = vrot.slane %v1505_v2, 4  ;;  %v1558_v0 = vsel %vm2468_vm12, %v2072_v63, %v1557_v7  ;;  %v1561_v22 = vunpack.c.l.b16 %v1554_v11  ;;  %1613 = vmatpush.bf16.msrb.mxu1 %v1604_v12  ;;  %1676 = vmatpush.bf16.msrb.mxu2 %v1667_v18  ;;  %v1628_v26 = vld [vmem:[#allocation3 + $0x10] sm:$0xf]  ;;  %v1629_v28 = vld [vmem:[#allocation3 + $0x14] sm:$0x1] }
 0x1e3   : > { %v1562_v25 = vunpack.c.l.b16 %v1558_v0  ;;  %v1631_v30 = vshrl.u32 %v1626_v23, 16  ;;  %v1634_v31 = vshll.u32 %v1626_v23, 16  ;;  %v2078_v6 = vld [vmem:[#allocation3 + $0x8] sm:$0xf]  ;;  %v2109_v13 = vld [vmem:[#allocation3 + $0xc] sm:$0xf0] }
 0x1e4   : > { %v1497_v15 = vsel %vm2482_vm14, %v1492_v21, %v1496_v58  ;;  %v1511_v40 = vsel %vm2482_vm14, %v1506_v60, %v1510_v4  ;;  %v1640_v8 = vshll.u32 %v1627_v24, 16  ;;  %v1645_v16 = vshrl.u32 %v1628_v26, 16  ;;  %v2085_v46 = vld [vmem:[%s2787_s4 + $0x14] sm:$0xf]  ;;  %v1689_v27 = vld [vmem:[#allocation3 + $0x8] sm:$0xe] }
 0x1e5   : > { %v1514_v32 = vunpack.c.l.b16 %v1497_v15  ;;  %v1515_v33 = vunpack.c.l.b16 %v1511_v40  ;;  %v1563_v29 = vpack.c.b16 %v1562_v25, %v1561_v22  ;;  %v1633_v5 = vrot.slane %v1631_v30, 4  ;;  %v1690_v34 = vld [vmem:[#allocation3 + $0xc] sm:$0x1]  ;;  %v1691_v35 = vld [vmem:[#allocation3 + $0x10] sm:$0xe] }
 0x1e6   : > { %v1636_v36 = vrot.slane %v1634_v31, 5  ;;  %v1647_v37 = vrot.slane %v1645_v16, 4  ;;  %v1648_v38 = vshll.u32 %v1628_v26, 16  ;;  %v1692_v39 = vld [vmem:[#allocation3 + $0x14] sm:$0x1]  ;;  %v1654_v20 = vshll.u32 %v1629_v28, 16 }
 0x1e7   : > { %v1516_v41 = vpack.c.b16 %v1515_v33, %v1514_v32  ;;  %2074 = vmatmul.msk.bf16.vlgmr.msra.gmra.mxu3 %vm610_vm15, %v1563_v29  ;;  %v1714_v14 = vsel %vm1460_vm1, %v2085_v46, 0  ;;  %v2083_v19 = vrot.slane %v1689_v27, 9  ;;  %v2087_v42 = vld [vmem:[%s2787_s4 + $0x18] sm:$0xf]  ;;  %v1699_v47 = vrot.slane %v1690_v34, 5 }
 0x1e8   : > { %v1637_v44 = vor.u32 %v1636_v36, %v1633_v5  ;;  %v1650_v43 = vrot.slane %v1648_v38, 5  ;;  %1723 = vmatpush.bf16.msrb.mxu3 %v1714_v14  ;;  %v2084_v17 = vrot.slane %v1691_v35, 9  ;;  %v2090_v48 = vld [vmem:[#allocation3 + $0x10] sm:$0xf]  ;;  %v2079_v49 = vor.u32 %v2109_v13, %v2078_v6  ;;  %v2110_v53 = vld [vmem:[#allocation3 + $0x14] sm:$0xf0] }
 0x1e9   : > { %2070 = vmatmul.msk.bf16.vlgmr.msra.gmra.mxu2 %vm610_vm15, %v1516_v41  ;;  %v1642_v50 = vrot.slane %v1640_v8, 5  ;;  %v1703_v51 = vrot.slane %v1692_v39, 5  ;;  %v1750_v52 = vsel %vm1460_vm1, %v2087_v42, 0  ;;  %v1656_v56 = vrot.slane %v1654_v20, 5  ;;  %v2093_v58 = vld [vmem:[%s2787_s4 + $0x1c] sm:$0xf] }
 0x1ea   : > { %v1638_v54 = vrot.slane %v1637_v44, 4  ;;  %v1651_v55 = vor.u32 %v1650_v43, %v1647_v37  ;;  %1759 = vmatpush.bf16.msrb.mxu0 %v1750_v52  ;;  %v2091_v57 = vor.u32 %v2110_v53, %v2090_v48  ;;  %v2097_v59 = vld [vmem:[%s2787_s4 + $0x20] sm:$0xf]  ;;  %v1813_v61 = vsel %vm1460_vm1, %v2093_v58, 0  ;;  %v1773_v1 = vld [vmem:[#allocation3 + $0x14] sm:$0x1] }
 0x1eb   : > { %v1860_v62 = vsel %vm1460_vm1, %v2097_v59, 0  ;;  %v1772_v63 = vld [vmem:[#allocation3 + $0x10] sm:$0xf]  ;;  %v1700_v4 = vsel %vm2468_vm12, %v2083_v19, %v1699_v47  ;;  %v1704_v7 = vsel %vm2468_vm12, %v2084_v17, %v1703_v51  ;;  %1822 = vmatpush.bf16.msra.mxu1 %v1813_v61  ;;  %v1774_v9 = vld [vmem:[#allocation3 + $0x18] sm:$0xf]  ;;  %v1786_v18 = vshll.u32 %v1773_v1, 16 }
 0x1ec   : > { %v1652_v2 = vrot.slane %v1651_v55, 4  ;;  %1869 = vmatpush.bf16.msra.mxu2 %v1860_v62  ;;  %v1777_v10 = vshrl.u32 %v1772_v63, 16  ;;  %v1775_v11 = vld [vmem:[#allocation3 + $0x1c] sm:$0x1]  ;;  %v1780_v12 = vshll.u32 %v1772_v63, 16  ;;  %v1791_v21 = vshrl.u32 %v1774_v9, 16 }
 0x1ed   : > { %2080 = vmatmul.msk.bf16.vlgmr.msrb.gmra.mxu1 %vm610_vm15, %v2079_v49  ;;  %2092 = vmatmul.msk.bf16.vlgmr.msrb.gmra.mxu0 %vm610_vm15, %v2091_v57  ;;  %v1643_v60 = vsel %vm2482_vm14, %v1638_v54, %v1642_v50  ;;  %v1794_v23 = vshll.u32 %v1774_v9, 16  ;;  %v1707_v24 = vunpack.c.l.b16 %v1700_v4  ;;  %v1708_v25 = vunpack.c.l.b16 %v1704_v7  ;;  %v1835_v35 = vld [vmem:[#allocation3 + $0x10] sm:$0xe]  ;;  %v1836_v37 = vld [vmem:[#allocation3 + $0x14] sm:$0x1] }
 0x1ee   : > { %v1657_v0 = vsel %vm2482_vm14, %v1652_v2, %v1656_v56  ;;  %v1779_v22 = vrot.slane %v1777_v10, 4  ;;  %v1782_v26 = vrot.slane %v1780_v12, 5  ;;  %v1793_v28 = vrot.slane %v1791_v21, 4  ;;  %v1837_v38 = vld [vmem:[#allocation3 + $0x18] sm:$0xe] }
 0x1ef   : > { %v1796_v30 = vrot.slane %v1794_v23, 5  ;;  %v1800_v31 = vshll.u32 %v1775_v11, 16  ;;  %v1660_v15 = vunpack.c.l.b16 %v1643_v60  ;;  %v1661_v40 = vunpack.c.l.b16 %v1657_v0  ;;  %v1838_v39 = vld [vmem:[#allocation3 + $0x1c] sm:$0x1] }
 0x1f0   : > { %v1783_v6 = vor.u32 %v1782_v26, %v1779_v22  ;;  %v1788_v13 = vrot.slane %v1786_v18, 5  ;;  %v1709_v46 = vpack.c.b16 %v1708_v25, %v1707_v24  ;;  %v2095_v20 = vrot.slane %v1835_v35, 9 }
 0x1f1   : > { %v1797_v8 = vor.u32 %v1796_v30, %v1793_v28  ;;  %v1802_v16 = vrot.slane %v1800_v31, 5  ;;  %v1662_v33 = vpack.c.b16 %v1661_v40, %v1660_v15  ;;  %v1845_v14 = vrot.slane %v1836_v37, 5 }
 0x1f2   : > { %v1784_v27 = vrot.slane %v1783_v6, 4  ;;  %v2096_v19 = vrot.slane %v1837_v38, 9  ;;  %v1849_v42 = vrot.slane %v1838_v39, 5 }
 0x1f3   : > { %v1798_v32 = vrot.slane %v1797_v8, 4  ;;  %v1846_v3 = vsel %vm2468_vm12, %v2095_v20, %v1845_v14 }
 0x1f4   : > { %v1789_v29 = vsel %vm2482_vm14, %v1784_v27, %v1788_v13  ;;  %v1850_v44 = vsel %vm2468_vm12, %v2096_v19, %v1849_v42  ;;  %v1853_v43 = vunpack.c.l.b16 %v1846_v3 }
 0x1f5   : > { %v1803_v5 = vsel %vm2482_vm14, %v1798_v32, %v1802_v16  ;;  %v1806_v34 = vunpack.c.l.b16 %v1789_v29  ;;  %v1854_v47 = vunpack.c.l.b16 %v1850_v44 }
 0x1f6   : > { %v1807_v36 = vunpack.c.l.b16 %v1803_v5  ;;  %v2216_v5 = vld [vmem:[%s2788_s5] ss:$0 sm:$0xff] }
 0x1f7   : > { %2086 = vmatmul.msk.bf16.vlgmr.msrb.gmra.mxu3 %vm610_vm15, %v1709_v46  ;;  %v1855_v17 = vpack.c.b16 %v1854_v47, %v1853_v43 }
 0x1f8   : > { %v1808_v41 = vpack.c.b16 %v1807_v36, %v1806_v34  ;;  %v2217_v36 = vld [vmem:[%s2789_s6] ss:$0 sm:$0xff] }
 0x1f9   : > { %2082 = vmatmul.msk.bf16.vlgmr.msrb.gmra.mxu2 %vm610_vm15, %v1662_v33 }
 0x1fd   : > { %2094 = vmatmul.msk.bf16.vlgmr.msra.gmra.mxu1 %vm610_vm15, %v1808_v41 }
 0x209   : > { %2098 = vmatmul.msk.bf16.vlgmr.msra.gmra.mxu2 %vm610_vm15, %v1855_v17 }
 0x25a   : > { %v1473_v48 = vpop.f32.mrf.mxu1 }
 0x25b   : > { %1478 = vst.msk [vmem:[#allocation4] sm:$0xff] %vm610_vm15, %v1473_v48 }
 0x262   : > { %v1475_v49 = vpop.f32.mrf.mxu1  ;;  %v1537_v50 = vld [vmem:[#allocation4] sm:$0xff] }
 0x263   : > { %1479 = vst.msk [vmem:[#allocation4 + $0x8] sm:$0xff] %vm610_vm15, %v1475_v49 }
 0x26a   : > { %v1579_v53 = vpop.f32.mrf.mxu3  ;;  %v1538_v45 = vld [vmem:[#allocation4 + $0x8] sm:$0xff]  ;;  %v1615_v61 = vpop.f32.mrf.mxu1 }
 0x26b   : > { %v1761_v25 = vpop.f32.mrf.mxu0 }
 0x26c   : > { %v1532_v51 = vpop.f32.mrf.mxu2 }
 0x26d   : > { %v1539_v52 = vadd.f32 %v1537_v50, %v1532_v51 }
 0x26f   : > { %1541 = vst.msk [vmem:[#allocation4] sm:$0xff] %vm610_vm15, %v1539_v52 }
 0x272   : > { %v1581_v58 = vpop.f32.mrf.mxu3  ;;  %v1617_v2 = vpop.f32.mrf.mxu1 }
 0x273   : > { %v1763_v31 = vpop.f32.mrf.mxu0 }
 0x274   : > { %v1534_v54 = vpop.f32.mrf.mxu2 }
 0x275   : > { %v1540_v55 = vadd.f32 %v1538_v45, %v1534_v54 }
 0x276   : > { %v1584_v56 = vld [vmem:[#allocation4] sm:$0xff] }
 0x277   : > { %v1586_v57 = vadd.f32 %v1584_v56, %v1579_v53  ;;  %1542 = vst.msk [vmem:[#allocation4 + $0x8] sm:$0xff] %vm610_vm15, %v1540_v55 }
 0x279   : > { %1588 = vst.msk [vmem:[#allocation4] sm:$0xff] %vm610_vm15, %v1586_v57 }
 0x27a   : > { %v1725_v21 = vpop.f32.mrf.mxu3  ;;  %v1824_v40 = vpop.f32.mrf.mxu1 }
 0x27c   : > { %v1678_v7 = vpop.f32.mrf.mxu2 }
 0x27e   : > { %v1585_v59 = vld [vmem:[#allocation4 + $0x8] sm:$0xff] }
 0x27f   : > { %v1587_v62 = vadd.f32 %v1585_v59, %v1581_v58 }
 0x280   : > { %v1620_v63 = vld [vmem:[#allocation4] sm:$0xff] }
 0x281   : > { %1589 = vst.msk [vmem:[#allocation4 + $0x8] sm:$0xff] %vm610_vm15, %v1587_v62  ;;  %v1622_v1 = vadd.f32 %v1620_v63, %v1615_v61 }
 0x282   : > { %v1727_v23 = vpop.f32.mrf.mxu3  ;;  %v1826_v16 = vpop.f32.mrf.mxu1 }
 0x283   : > { %1624 = vst.msk [vmem:[#allocation4] sm:$0xff] %vm610_vm15, %v1622_v1 }
 0x284   : > { %v1680_v12 = vpop.f32.mrf.mxu2 }
 0x288   : > { %v1621_v4 = vld [vmem:[#allocation4 + $0x8] sm:$0xff] }
 0x289   : > { %v1623_v9 = vadd.f32 %v1621_v4, %v1617_v2 }
 0x28a   : > { %v1683_v10 = vld [vmem:[#allocation4] sm:$0xff] }
 0x28b   : > { %1625 = vst.msk [vmem:[#allocation4 + $0x8] sm:$0xff] %vm610_vm15, %v1623_v9  ;;  %v1685_v11 = vadd.f32 %v1683_v10, %v1678_v7 }
 0x28c   : > { %v1871_v27 = vpop.f32.mrf.mxu2 }
 0x28d   : > { %1687 = vst.msk [vmem:[#allocation4] sm:$0xff] %vm610_vm15, %v1685_v11 }
 0x292   : > { %v1684_v18 = vld [vmem:[#allocation4 + $0x8] sm:$0xff] }
 0x293   : > { %v1686_v60 = vadd.f32 %v1684_v18, %v1680_v12 }
 0x294   : > { %v1730_v0 = vld [vmem:[#allocation4] sm:$0xff]  ;;  %v1873_v34 = vpop.f32.mrf.mxu2 }
 0x295   : > { %1688 = vst.msk [vmem:[#allocation4 + $0x8] sm:$0xff] %vm610_vm15, %v1686_v60  ;;  %v1732_v22 = vadd.f32 %v1730_v0, %v1725_v21 }
 0x297   : > { %1734 = vst.msk [vmem:[#allocation4] sm:$0xff] %vm610_vm15, %v1732_v22 }
 0x29c   : > { %v1731_v24 = vld [vmem:[#allocation4 + $0x8] sm:$0xff] }
 0x29d   : > { %v1733_v26 = vadd.f32 %v1731_v24, %v1727_v23 }
 0x29e   : > { %v1766_v28 = vld [vmem:[#allocation4] sm:$0xff] }
 0x29f   : > { %1735 = vst.msk [vmem:[#allocation4 + $0x8] sm:$0xff] %vm610_vm15, %v1733_v26  ;;  %v1768_v30 = vadd.f32 %v1766_v28, %v1761_v25 }
 0x2a1   : > { %1770 = vst.msk [vmem:[#allocation4] sm:$0xff] %vm610_vm15, %v1768_v30 }
 0x2a6   : > { %v1767_v15 = vld [vmem:[#allocation4 + $0x8] sm:$0xff] }
 0x2a7   : > { %v1769_v6 = vadd.f32 %v1767_v15, %v1763_v31 }
 0x2a8   : > { %v1829_v13 = vld [vmem:[#allocation4] sm:$0xff] }
 0x2a9   : > { %1771 = vst.msk [vmem:[#allocation4 + $0x8] sm:$0xff] %vm610_vm15, %v1769_v6  ;;  %v1831_v8 = vadd.f32 %v1829_v13, %v1824_v40 }
 0x2ab   : > { %1833 = vst.msk [vmem:[#allocation4] sm:$0xff] %vm610_vm15, %v1831_v8 }
 0x2b0   : > { %v1830_v46 = vld [vmem:[#allocation4 + $0x8] sm:$0xff] }
 0x2b1   : > { %v1832_v32 = vadd.f32 %v1830_v46, %v1826_v16 }
 0x2b2   : > { %v1876_v33 = vld [vmem:[#allocation4] sm:$0xff] }
 0x2b3   : > { %1834 = vst.msk [vmem:[#allocation4 + $0x8] sm:$0xff] %vm610_vm15, %v1832_v32  ;;  %v1878_v29 = vadd.f32 %v1876_v33, %v1871_v27 }
 0x2b5   : > { %1880 = vst.msk [vmem:[#allocation4] sm:$0xff] %vm610_vm15, %v1878_v29 }
 0x2ba   : > { %v1877_v35 = vld [vmem:[#allocation4 + $0x8] sm:$0xff] }
 0x2bb   : > { %v1879_v37 = vadd.f32 %v1877_v35, %v1873_v34 }
 0x2bc   : > { %v1882_v38 = vld [vmem:[#allocation4] sm:$0xff] }
 0x2bd   : > { %v1888_v39 = vmul.f32 %v2216_v5, %v1882_v38  ;;  %1881 = vst.msk [vmem:[#allocation4 + $0x8] sm:$0xff] %vm610_vm15, %v1879_v37 }
 0x2bf   : > { %v1894_v41 = vadd.f32 %v2217_v36, %v1888_v39 }
 0x2c1   : > { %v1896_v20 = vmax.f32 %v1894_v41, 0.0 }
 0x2c3   : > { %v1898_v14 = vpack.c.bf16 %v1896_v20, %v1896_v20 }
 0x2c4   : > { %v1883_v19 = vld [vmem:[#allocation4 + $0x8] sm:$0xff] }
 0x2c5   : > { %1901 = vst.msk [vmem:[%s2341_s19] sm:$0xf] %vm1379_vm0, %v1898_v14  ;;  %v1889_v42 = vmul.f32 %v2216_v5, %v1883_v19 }
 0x2c7   : > { %v1895_v3 = vadd.f32 %v2217_v36, %v1889_v42 }
 0x2c9   : > { %v1897_v44 = vmax.f32 %v1895_v3, 0.0 }
 0x2cb   : > { %v1899_v43 = vpack.c.bf16 %v1897_v44, %v1897_v44 }
 0x2cd   : > { %1902 = vst.msk [vmem:[%s2341_s19 + $0x4] sm:$0xf] %vm1379_vm0, %v1899_v43 }
 0x2ce PF: > { %s17_s28 = sadd.s32 1, %s2256_s28   ;;  %s2807_s24 = smov %s2248_s26 }
 0x2cf   : > { %p14_p9 = scmp.ge.s32.totalorder %s17_s28, 10   ;;  %s2808_s25 = smov %s2252_s27 }
 0x2d0   : > { %s2809_s26 = smov %s2812_s29  ;;  %s2810_s27 = smov %s2816_s30 }
 0x2d1   :  { %16 = sbr.rel (!%p14_p9) target bundleno = 3 (0x3), region = 108 }

// kernel: tpu_custom_call.1
= control target key start
LH: loop header
LB: loop body
LE: loop exit
PB: predicated region body
PF: predicated region fallthrough
CT: control target
= control target key end

     0   :  { %s2301_s24 = smov 0   ;;  %s2303_s25 = smov 0   ;;  %s2783_s0 = inlined_call_operand.vmem [shape: bf16[2,24,8,8], index: 0, kind: input, shape index: {}]   ;;  %s2784_s1 = inlined_call_operand.vmem [shape: bf16[9,4,8], index: 1, kind: input, shape index: {}]   ;;  %s2785_s2 = inlined_call_operand.vmem [shape: f32[1,8], index: 2, kind: input, shape index: {}]   ;;  %s2786_s3 = inlined_call_operand.vmem [shape: f32[1,8], index: 3, kind: input, shape index: {}]   ;;  %s2787_s4 = inlined_call_operand.vmem [shape: bf16[9,8,8], index: 4, kind: input, shape index: {}]   ;;  %s2788_s5 = inlined_call_operand.vmem [shape: f32[1,8], index: 5, kind: input, shape index: {}]   ;;  %s2789_s6 = inlined_call_operand.vmem [shape: f32[1,8], index: 6, kind: input, shape index: {}]   ;;  %s2790_s7 = inlined_call_operand.vmem [shape: bf16[2,64,8], index: 7, kind: output, shape index: {}]  }
   0x1   :  { %s2305_s26 = smov 0   ;;  %s2307_s27 = smov 0  }
   0x2   :  { %s2309_s28 = smov 0  }
   0x3 LB: > { %s26_s29 = sadd.s32 1, %s2248_s26  ;;  %s29_s30 = sadd.s32 1, %s2252_s27  ;;  %s2256_s28 = sphi %s2309_s28, %s17_s28   ;;  %s2252_s27 = sphi %s2307_s27, %s2810_s27   ;;  %s2248_s26 = sphi %s2305_s26, %s2809_s26   ;;  %s2244_s25 = sphi %s2303_s25, %s2808_s25   ;;  %s2240_s24 = sphi %s2301_s24, %s2807_s24  }
   0x4   : > { %p27_p0 = scmp.ge.s32.totalorder %s26_s29, 4  ;;  %p1993_p1 = scmp.ge.s32.totalorder %s2256_s28, 1 }
   0x5   : > { %p251_p2 = scmp.lt.s32.totalorder %s2256_s28, 9 }
   0x6   : > { %s2812_s29 = smov (%p27_p0, %s26_s29), 0  ;;  %s2814_s30 = smov (!%p27_p0, %s29_s30), %s2252_s27 }
   0x7   : > { %p252_p3 = pnand %p1993_p1, %p251_p2  ;;  %p31_p4 = scmp.ge.s32.totalorder %s2814_s30, 2 }
   0x8   : > { %p287_p5 = scmp.lt.s32.totalorder (!%p252_p3), %s2244_s25, 1  ;;  %s1995_s8 = sshll.u32 (!%p252_p3), %s2240_s24, 1 }
   0x9   : > { %s2816_s30 = smov (%p31_p4, %s2814_s30), 0  ;;  %255 = sbr.rel (%p252_p3) target bundleno = 718 (0x2ce), region = 48 }
   0xa   : > { %p295_p6 = scmp.lt.s32.totalorder (!%p252_p3), %s1995_s8, 7  ;;  %s2101_s9 = sshll.u32 (!%p252_p3), %s2240_s24, 4 }
   0xb   : > { %s2258_s21 = smov (!%p252_p3), 124   ;;  %p2062_p7 = scmp.ne.s32.totalorder (!%p252_p3), %s2240_s24, 0 }
   0xe   : > { %s2818_s25 = smov (!%p287_p5, %s2244_s25), 1  ;;  %s2820_s8 = smov (!%p295_p6, %s1995_s8), 7  ;;  %vm486_vm0 = vcmask 27648   ;;  %vm487_vm1 = vsmask.f32 7938  ;;  %vm492_vm2 = vcmask 24576  }
   0xf   : > { %s2140_s10 = smul.u32 96, %s2818_s25  ;;  %s1996_s11 = sshll.u32 %s2818_s25, 3  ;;  %vm493_vm3 = vsmask.f32 256  ;;  %vm2368_vm4 = vmand %vm486_vm0, %vm487_vm1  ;;  %v516_v48 = vld [vmem:[#allocation2 + $0x20] sm:$0xf] }
  0x10   : > { %s298_s12 = sadd.s32 %s1996_s11, %s2820_s8  ;;  %vm2374_vm5 = vmand %vm492_vm2, %vm493_vm3  ;;  %v519_v49 = vld [vmem:[#allocation2 + $0x24] sm:$0x1]  ;;  %vm587_vm7 = vcmask 1041408   ;;  %vm623_vm8 = vsmask.f32 3328  ;;  %vm746_vm9 = vcmask 1042432  }
  0x11   : > { %s291_s15 = scalar_lea.vmem %s2783_s0, %s2140_s10  ;;  %s1997_s16 = sshll.u32 %s298_s12, 2  ;;  %vm2402_vm6 = vmand %vm492_vm2, %vm487_vm1  ;;  %vm747_vm10 = vcmask 1046532   ;;  %vm580_vm11 = vcmask 31744   ;;  %vm624_vm13 = vsmask.f32 7440  ;;  %vm610_vm15 = vcmask 64512  }
  0x12   : > { %s2341_s19 = scalar_lea.vmem %s2790_s7, %s1997_s16  ;;  %s305_s20 = scalar_lea.vmem %s291_s15, %s2101_s9  ;;  %vm2468_vm12 = vmor %vm746_vm9, %vm747_vm10  ;;  %v2041_v43 = vld [vmem:[%s2784_s1 + $0xc] sm:$0x3]  ;;  %vm1379_vm0 = vcmask 60416   ;;  %vm1384_vm2 = vcmask 57344  }
  0x13   : > { %v2136_v0 = vld [vmem:[%s305_s20 + $0x10] sm:$0xff]   ;;  %v2112_v1 = vld [vmem:[%s305_s20] sm:$0xff]   ;;  %v2343_v6 = vld [vmem:[%s305_s20 + $0x18] sm:$0xff]  }
  0x14   : > { %v2121_v2 = vunpack.c.l.bf16 %v2136_v0  ;;  %v2122_v3 = vunpack.c.h.bf16 %v2136_v0  ;;  %v2113_v4 = vunpack.c.l.bf16 %v2112_v1  ;;  %v2114_v5 = vunpack.c.h.bf16 %v2112_v1  ;;  %v2138_v7 = vld [vmem:[%s305_s20 + $0x20] sm:$0xff]   ;;  %v2345_v8 = vld [vmem:[%s305_s20 + $0x8] sm:$0xff]   ;;  %vm2482_vm14 = vmor %vm623_vm8, %vm624_vm13 }
  0x15   : > { %v2129_v11 = vunpack.c.l.bf16 %v2138_v7  ;;  %v2130_v12 = vunpack.c.h.bf16 %v2138_v7  ;;  %v2125_v13 = vunpack.c.l.bf16 %v2343_v6  ;;  %v2348_v14 = vld [vmem:[%s305_s20 + $0x28] sm:$0xff]   ;;  %v2126_v15 = vunpack.c.h.bf16 %v2343_v6 }
  0x16   : > { %v2194_v9 = vpack.i.bf16 %v2122_v3, %v2121_v2  ;;  %v2184_v10 = vpack.i.bf16 %v2114_v5, %v2113_v4  ;;  %v2117_v16 = vunpack.c.l.bf16 %v2345_v8  ;;  %v2118_v17 = vunpack.c.h.bf16 %v2345_v8 }
  0x17   : > { %v2204_v18 = vpack.i.bf16 %v2130_v12, %v2129_v11  ;;  %v2133_v19 = vunpack.c.l.bf16 %v2348_v14  ;;  %v2134_v20 = vunpack.c.h.bf16 %v2348_v14  ;;  %v2199_v21 = vpack.i.bf16 %v2126_v15, %v2125_v13 }
  0x18   : > { %2195 = vrot.lane.b32.xlu1 %v2194_v9, %s2258_s21  ;;  %2185 = vrot.lane.b32.xlu0 %v2184_v10, %s2258_s21  ;;  %v2189_v22 = vpack.i.bf16 %v2118_v17, %v2117_v16 }
  0x19   : > { %2205 = vrot.lane.b32.xlu2 %v2204_v18, %s2258_s21  ;;  %v2209_v23 = vpack.i.bf16 %v2134_v20, %v2133_v19 }
  0x20   : > { %2200 = vrot.lane.b32.xlu1 %v2199_v21, %s2258_s21  ;;  %2190 = vrot.lane.b32.xlu0 %v2189_v22, %s2258_s21 }
  0x21   : > { %2210 = vrot.lane.b32.xlu2 %v2209_v23, %s2258_s21 }
  0x73   : > { %v2206_v24 = vpop.permute.xlu2 %2205 }
  0x74   : > { %v2208_v25 = vunpack.i.h.bf16 %v2206_v24  ;;  %v2207_v26 = vunpack.i.l.bf16 %v2206_v24 }
  0x76   : > { %v387_v27 = vmax.f32 %v2130_v12, %v2208_v25  ;;  %v386_v28 = vmax.f32 %v2129_v11, %v2207_v26  ;;  %v489_v11 = vld [vmem:[#allocation2] sm:$0xf]  ;;  %v495_v12 = vld [vmem:[#allocation2 + $0x4] sm:$0x1] }
  0x78   : > { %v418_v29 = vmax.f32 %v386_v28, %v387_v27 }
  0x7a   : > { %v424_v30 = vpack.c.bf16 %v418_v29, %v418_v29 }
  0x7b   : > { %v2211_v62 = vpop.permute.xlu2 %2210 }
  0x7c   : > { %v459_v31 = vshrl.u32 %v424_v30, 16  ;;  %v462_v35 = vshll.u32 %v424_v30, 16  ;;  %v2213_v9 = vunpack.i.h.bf16 %v2211_v62  ;;  %v2212_v10 = vunpack.i.l.bf16 %v2211_v62 }
  0x7e   : > { %v461_v34 = vrot.slane %v459_v31, 7 }
  0x80   : > { %v464_v41 = vor.u32 %v462_v35, %v461_v34  ;;  %v465_v42 = vrot.slane %v461_v34, 4  ;;  %v389_v34 = vmax.f32 %v2134_v20, %v2213_v9  ;;  %v388_v35 = vmax.f32 %v2133_v19, %v2212_v10 }
  0x82   : > { %v517_v50 = vsel %vm2368_vm4, %v464_v41, %v516_v48  ;;  %v520_v51 = vsel %vm2374_vm5, %v465_v42, %v519_v49  ;;  %v419_v14 = vmax.f32 %v388_v35, %v389_v34  ;;  %v510_v49 = vld [vmem:[#allocation2 + $0x18] sm:$0xf] }
  0x83   : > { %518 = vst [vmem:[#allocation2 + $0x20] sm:$0xf] %v517_v50  ;;  %v513_v50 = vld [vmem:[#allocation2 + $0x1c] sm:$0x1] }
  0x84   : > { %521 = vst [vmem:[#allocation2 + $0x24] sm:$0x1] %v520_v51  ;;  %v425_v48 = vpack.c.bf16 %v419_v14, %v419_v14 }
  0x8a   : > { %v2196_v32 = vpop.permute.xlu1 %2195  ;;  %v2186_v33 = vpop.permute.xlu0 %2185  ;;  %v540_v24 = vld [vmem:[#allocation2 + $0x20] sm:$0x1] }
  0x8b   : > { %v2198_v36 = vunpack.i.h.bf16 %v2196_v32  ;;  %v2197_v37 = vunpack.i.l.bf16 %v2196_v32  ;;  %v2188_v38 = vunpack.i.h.bf16 %v2186_v33  ;;  %v2187_v39 = vunpack.i.l.bf16 %v2186_v33 }
  0x8c   : > { %v541_v31 = vsel %vm2374_vm5, 0, %v540_v24 }
  0x8d   : > { %v383_v44 = vmax.f32 %v2122_v3, %v2198_v36  ;;  %v382_v45 = vmax.f32 %v2121_v2, %v2197_v37  ;;  %v379_v46 = vmax.f32 %v2114_v5, %v2188_v38  ;;  %v378_v47 = vmax.f32 %v2113_v4, %v2187_v39  ;;  %v504_v3 = vld [vmem:[#allocation2 + $0x10] sm:$0xf]  ;;  %v507_v4 = vld [vmem:[#allocation2 + $0x14] sm:$0x1]  ;;  %542 = vst [vmem:[#allocation2 + $0x20] sm:$0x1] %v541_v31 }
  0x8e   : > { %v569_v36 = vld [vmem:[%s2784_s1] sm:$0x3]  ;;  %v2020_v37 = vld [vmem:[%s2784_s1 + $0x6] sm:$0x3] }
  0x8f   : > { %v416_v52 = vmax.f32 %v382_v45, %v383_v44  ;;  %v414_v53 = vmax.f32 %v378_v47, %v379_v46  ;;  %v589_v19 = vsel %vm587_vm7, %v569_v36, 0  ;;  %v837_v42 = vsel %vm587_vm7, %v2020_v37, 0  ;;  %v2017_v44 = vld [vmem:[%s2784_s1 + $0x4] sm:$0x3] }
  0x90   : > { %598 = vmatpush.bf16.msra.mxu0 %v589_v19  ;;  %846 = vmatpush.bf16.msra.mxu3 %v837_v42  ;;  %v780_v47 = vsel %vm587_vm7, %v2017_v44, 0 }
  0x91   : > { %v422_v54 = vpack.c.bf16 %v416_v52, %v416_v52  ;;  %v420_v55 = vpack.c.bf16 %v414_v53, %v414_v53  ;;  %789 = vmatpush.bf16.msra.mxu2 %v780_v47 }
  0x92   : > { %v2201_v56 = vpop.permute.xlu1 %2200  ;;  %v2191_v57 = vpop.permute.xlu0 %2190 }
  0x93   : > { %v443_v58 = vshrl.u32 %v422_v54, 16  ;;  %v446_v59 = vshll.u32 %v422_v54, 16  ;;  %v427_v60 = vshrl.u32 %v420_v55, 16  ;;  %v430_v61 = vshll.u32 %v420_v55, 16  ;;  %v498_v55 = vld [vmem:[#allocation2 + $0x8] sm:$0xf] }
  0x94   : > { %v2203_v63 = vunpack.i.h.bf16 %v2201_v56  ;;  %v2202_v0 = vunpack.i.l.bf16 %v2201_v56  ;;  %v2193_v1 = vunpack.i.h.bf16 %v2191_v57  ;;  %v2192_v2 = vunpack.i.l.bf16 %v2191_v57 }
  0x95   : > { %v445_v5 = vrot.slane %v443_v58, 7  ;;  %v429_v7 = vrot.slane %v427_v60, 7  ;;  %v467_v56 = vshrl.u32 %v425_v48, 16  ;;  %v470_v57 = vshll.u32 %v425_v48, 16  ;;  %v501_v60 = vld [vmem:[#allocation2 + $0xc] sm:$0x1] }
  0x96   : > { %v385_v18 = vmax.f32 %v2126_v15, %v2203_v63  ;;  %v384_v21 = vmax.f32 %v2125_v13, %v2202_v0  ;;  %v381_v22 = vmax.f32 %v2118_v17, %v2193_v1  ;;  %v380_v23 = vmax.f32 %v2117_v16, %v2192_v2  ;;  %v559_v15 = vld [vmem:[#allocation2 + $0x24] sm:$0x1]  ;;  %v2010_v63 = vld [vmem:[%s2784_s1 + $0x2] sm:$0x3] }
  0x97   : > { %v448_v25 = vor.u32 %v446_v59, %v445_v5  ;;  %v449_v26 = vrot.slane %v445_v5, 4  ;;  %v432_v27 = vor.u32 %v430_v61, %v429_v7  ;;  %v433_v28 = vrot.slane %v429_v7, 4 }
  0x98   : > { %v417_v29 = vmax.f32 %v384_v21, %v385_v18  ;;  %v415_v30 = vmax.f32 %v380_v23, %v381_v22  ;;  %v560_v38 = vsel %vm2402_vm6, 0, %v559_v15  ;;  %v469_v2 = vrot.slane %v467_v56, 7  ;;  %v525_v22 = vld [vmem:[#allocation2 + $0x2c] sm:$0x1]  ;;  %v2031_v23 = vld [vmem:[%s2784_s1 + $0x8] sm:$0x3] }
  0x99   : > { %v505_v6 = vsel %vm2368_vm4, %v448_v25, %v504_v3  ;;  %v508_v13 = vsel %vm2374_vm5, %v449_v26, %v507_v4  ;;  %v490_v8 = vsel %vm2368_vm4, %v432_v27, %v489_v11  ;;  %v496_v16 = vsel %vm2374_vm5, %v433_v28, %v495_v12  ;;  %561 = vst [vmem:[#allocation2 + $0x24] sm:$0x1] %v560_v38  ;;  %v522_v11 = vld [vmem:[#allocation2 + $0x28] sm:$0xf] }
  0x9a   : > { %506 = vst [vmem:[#allocation2 + $0x10] sm:$0xf] %v505_v6  ;;  %v423_v32 = vpack.c.bf16 %v417_v29, %v417_v29  ;;  %v421_v33 = vpack.c.bf16 %v415_v30, %v415_v30  ;;  %v697_v7 = vsel %vm587_vm7, %v2010_v63, 0  ;;  %v472_v12 = vor.u32 %v470_v57, %v469_v2  ;;  %v2038_v15 = vld [vmem:[%s2784_s1 + $0xa] sm:$0x3] }
  0x9b   : > { %509 = vst [vmem:[#allocation2 + $0x14] sm:$0x1] %v508_v13  ;;  %v473_v18 = vrot.slane %v469_v2, 4  ;;  %706 = vmatpush.bf16.msra.mxu1 %v697_v7  ;;  %v949_v25 = vsel %vm587_vm7, %v2031_v23, 0 }
  0x9c   : > { %491 = vst [vmem:[#allocation2] sm:$0xf] %v490_v8  ;;  %v451_v39 = vshrl.u32 %v423_v32, 16  ;;  %v454_v41 = vshll.u32 %v423_v32, 16  ;;  %v435_v20 = vshrl.u32 %v421_v33, 16  ;;  %v438_v52 = vshll.u32 %v421_v33, 16  ;;  %958 = vmatpush.bf16.msrb.mxu0 %v949_v25 }
  0x9d   : > { %497 = vst [vmem:[#allocation2 + $0x4] sm:$0x1] %v496_v16  ;;  %v523_v26 = vsel %vm2368_vm4, %v472_v12, %v522_v11  ;;  %v526_v27 = vsel %vm2374_vm5, %v473_v18, %v525_v22  ;;  %v1029_v8 = vsel %vm587_vm7, %v2038_v15, 0  ;;  %v2052_v12 = vld [vmem:[%s2784_s1 + $0xe] sm:$0x3] }
  0x9e   : > { %v453_v45 = vrot.slane %v451_v39, 7  ;;  %v437_v46 = vrot.slane %v435_v20, 7  ;;  %524 = vst [vmem:[#allocation2 + $0x28] sm:$0xf] %v523_v26  ;;  %v1198_v15 = vsel %vm587_vm7, %v2052_v12, 0 }
  0x9f   : > { %527 = vst [vmem:[#allocation2 + $0x2c] sm:$0x1] %v526_v27  ;;  %1038 = vmatpush.bf16.msrb.mxu1 %v1029_v8  ;;  %1207 = vmatpush.bf16.msrb.mxu3 %v1198_v15 }
  0xa0   : > { %v456_v51 = vor.u32 %v454_v41, %v453_v45  ;;  %v457_v54 = vrot.slane %v453_v45, 4  ;;  %v440_v61 = vor.u32 %v438_v52, %v437_v46  ;;  %v441_v62 = vrot.slane %v437_v46, 4 }
  0xa1   : > { %v534_v53 = vld [vmem:[#allocation2 + $0x10] sm:$0x1]  ;;  %v2472_v46 = vld [vmem:[#allocation2 + $0x10] sm:$0xe] }
  0xa2   : > { %v535_v58 = vsel %vm2374_vm5, 0, %v534_v53  ;;  %v553_v59 = vld [vmem:[#allocation2 + $0x14] sm:$0x1]  ;;  %v511_v5 = vsel %vm2368_vm4, %v456_v51, %v510_v49  ;;  %v514_v10 = vsel %vm2374_vm5, %v457_v54, %v513_v50  ;;  %v499_v21 = vsel %vm2368_vm4, %v440_v61, %v498_v55  ;;  %vm2608_vm4 = vmand %vm1379_vm0, %vm487_vm1 }
  0xa3   : > { %536 = vst [vmem:[#allocation2 + $0x10] sm:$0x1] %v535_v58  ;;  %v554_v0 = vsel %vm2402_vm6, 0, %v553_v59  ;;  %v528_v1 = vld [vmem:[#allocation2] sm:$0x1]  ;;  %v502_v24 = vsel %vm2374_vm5, %v441_v62, %v501_v60  ;;  %v1086_v49 = vsel %vm587_vm7, %v2041_v43, 0 }
  0xa4   : > { %555 = vst [vmem:[#allocation2 + $0x14] sm:$0x1] %v554_v0  ;;  %v529_v3 = vsel %vm2374_vm5, 0, %v528_v1  ;;  %v547_v4 = vld [vmem:[#allocation2 + $0x4] sm:$0x1]  ;;  %1095 = vmatpush.bf16.msrb.mxu2 %v1086_v49 }
  0xa5   : > { %530 = vst [vmem:[#allocation2] sm:$0x1] %v529_v3  ;;  %v548_v9 = vsel %vm2402_vm6, 0, %v547_v4  ;;  %v543_v38 = vld [vmem:[#allocation2 + $0x28] sm:$0x1] }
  0xa6   : > { %549 = vst [vmem:[#allocation2 + $0x4] sm:$0x1] %v548_v9  ;;  %v544_v39 = vsel %vm2374_vm5, 0, %v543_v38  ;;  %v562_v41 = vld [vmem:[#allocation2 + $0x2c] sm:$0x1] }
  0xa7   : > { %512 = vst [vmem:[#allocation2 + $0x18] sm:$0xf] %v511_v5  ;;  %v563_v20 = vsel %vm2402_vm6, 0, %v562_v41  ;;  %v730_v14 = vld [vmem:[#allocation2] sm:$0xe]  ;;  %v2015_v5 = vrot.slane %v2472_v46, 9 }
  0xa8   : > { %515 = vst [vmem:[#allocation2 + $0x1c] sm:$0x1] %v514_v10  ;;  %v2013_v48 = vrot.slane %v730_v14, 9 }
  0xa9   : > { %500 = vst [vmem:[#allocation2 + $0x8] sm:$0xf] %v499_v21 }
  0xaa   : > { %503 = vst [vmem:[#allocation2 + $0xc] sm:$0x1] %v502_v24  ;;  %v2104_v17 = vld [vmem:[#allocation2 + $0xc] sm:$0xf0] }
  0xab   : > { %545 = vst [vmem:[#allocation2 + $0x28] sm:$0x1] %v544_v39  ;;  %v619_v53 = vld [vmem:[#allocation2 + $0x10] sm:$0xf] }
  0xac   : > { %v615_v28 = vld [vmem:[#allocation2] sm:$0xf]  ;;  %564 = vst [vmem:[#allocation2 + $0x2c] sm:$0x1] %v563_v20  ;;  %v655_v22 = vshrl.u32 %v619_v53, 16 }
  0xad   : > { %v627_v29 = vshrl.u32 %v615_v28, 16  ;;  %v630_v30 = vshll.u32 %v615_v28, 16  ;;  %v731_v33 = vld [vmem:[#allocation2 + $0x4] sm:$0x1]  ;;  %v2002_v47 = vld [vmem:[#allocation2] sm:$0xf] }
  0xae   : > { %v537_v31 = vld [vmem:[#allocation2 + $0x18] sm:$0x1]  ;;  %v751_v42 = vrot.slane %v731_v33, 5  ;;  %v616_v44 = vld [vmem:[#allocation2 + $0x4] sm:$0x1]  ;;  %v658_v28 = vshll.u32 %v619_v53, 16 }
  0xaf   : > { %v538_v40 = vsel %vm2374_vm5, 0, %v537_v31  ;;  %v556_v6 = vld [vmem:[#allocation2 + $0x1c] sm:$0x1]  ;;  %v629_v13 = vrot.slane %v627_v29, 4  ;;  %v632_v34 = vrot.slane %v630_v30, 5  ;;  %v636_v52 = vshll.u32 %v616_v44, 16 }
  0xb0   : > { %539 = vst [vmem:[#allocation2 + $0x18] sm:$0x1] %v538_v40  ;;  %v557_v16 = vsel %vm2402_vm6, 0, %v556_v6  ;;  %v531_v32 = vld [vmem:[#allocation2 + $0x8] sm:$0x1]  ;;  %v752_v57 = vsel %vm2468_vm12, %v2013_v48, %v751_v42  ;;  %v660_v38 = vrot.slane %v658_v28, 5 }
  0xb1   : > { %558 = vst [vmem:[#allocation2 + $0x1c] sm:$0x1] %v557_v16  ;;  %v532_v35 = vsel %vm2374_vm5, 0, %v531_v32  ;;  %v550_v36 = vld [vmem:[#allocation2 + $0xc] sm:$0x1]  ;;  %v633_v19 = vor.u32 %v632_v34, %v629_v13  ;;  %v638_v7 = vrot.slane %v636_v52, 5  ;;  %v767_v21 = vunpack.c.l.b16 %v752_v57  ;;  %vm2614_vm5 = vmand %vm1384_vm2, %vm493_vm3 }
  0xb2   : > { %533 = vst [vmem:[#allocation2 + $0x8] sm:$0x1] %v532_v35  ;;  %v551_v37 = vsel %vm2402_vm6, 0, %v550_v36  ;;  %v732_v50 = vld [vmem:[#allocation2 + $0x8] sm:$0xe]  ;;  %v657_v35 = vrot.slane %v655_v22, 4  ;;  %vm2630_vm3 = vmand %vm1384_vm2, %vm487_vm1 }
  0xb3   : > { %552 = vst [vmem:[#allocation2 + $0xc] sm:$0x1] %v551_v37  ;;  %v634_v51 = vrot.slane %v633_v19, 4  ;;  %v2014_v1 = vrot.slane %v732_v50, 9  ;;  %v736_v27 = vld [vmem:[#allocation2 + $0x18] sm:$0xe] }
  0xb4   : > { %v872_v40 = vld [vmem:[#allocation2 + $0x10] sm:$0xf]  ;;  %v2016_v34 = vrot.slane %v736_v27, 9  ;;  %v735_v19 = vld [vmem:[#allocation2 + $0x14] sm:$0x1] }
  0xb5   : > { %v639_v25 = vsel %vm2482_vm14, %v634_v51, %v638_v7  ;;  %v893_v41 = vshrl.u32 %v872_v40, 16  ;;  %v1119_v20 = vld [vmem:[#allocation2 + $0x10] sm:$0xf]  ;;  %v896_v43 = vshll.u32 %v872_v40, 16  ;;  %v2105_v53 = vld [vmem:[#allocation2 + $0x1c] sm:$0xf0] }
  0xb6   : > { %v684_v33 = vunpack.c.l.b16 %v639_v25  ;;  %v2006_v12 = vld [vmem:[#allocation2 + $0x10] sm:$0xf] }
  0xb7   : > { %v621_v54 = vld [vmem:[#allocation2 + $0x18] sm:$0xf] }
  0xb8   : > { %v669_v11 = vshrl.u32 %v621_v54, 16  ;;  %v672_v23 = vshll.u32 %v621_v54, 16  ;;  %v737_v31 = vld [vmem:[#allocation2 + $0x1c] sm:$0x1]  ;;  %v1121_v50 = vld [vmem:[#allocation2 + $0x18] sm:$0xf] }
  0xb9   : > { %v2102_v55 = vld [vmem:[#allocation2 + $0x4] sm:$0xf0]  ;;  %v622_v8 = vld [vmem:[#allocation2 + $0x1c] sm:$0x1]  ;;  %v763_v42 = vrot.slane %v737_v31, 5  ;;  %v895_v54 = vrot.slane %v893_v41, 4 }
  0xba   : > { %v2023_v56 = vld [vmem:[#allocation2 + $0x8] sm:$0xf]  ;;  %v2003_v59 = vor.u32 %v2102_v55, %v2002_v47  ;;  %v733_v61 = vld [vmem:[#allocation2 + $0xc] sm:$0x1]  ;;  %v671_v16 = vrot.slane %v669_v11, 4  ;;  %v674_v32 = vrot.slane %v672_v23, 5 }
  0xbb   : > { %v617_v58 = vld [vmem:[#allocation2 + $0x8] sm:$0xf]  ;;  %v2024_v60 = vor.u32 %v2104_v17, %v2023_v56  ;;  %v618_v62 = vld [vmem:[#allocation2 + $0xc] sm:$0x1]  ;;  %v755_v2 = vrot.slane %v733_v61, 5  ;;  %v678_v44 = vshll.u32 %v622_v8, 16 }
  0xbc   : > { %v641_v63 = vshrl.u32 %v617_v58, 16  ;;  %v644_v0 = vshll.u32 %v617_v58, 16  ;;  %v650_v4 = vshll.u32 %v618_v62, 16  ;;  %2008 = vmatmul.msk.bf16.vlgmr.msra.gmra.mxu0 %vm580_vm11, %v2003_v59  ;;  %v870_v29 = vld [vmem:[#allocation2 + $0x8] sm:$0xf]  ;;  %v675_v17 = vor.u32 %v674_v32, %v671_v16 }
  0xbd   : > { %2029 = vmatmul.msk.bf16.vlgmr.msra.gmra.mxu3 %vm580_vm11, %v2024_v60  ;;  %v756_v18 = vsel %vm2468_vm12, %v2014_v1, %v755_v2  ;;  %v879_v36 = vshrl.u32 %v870_v29, 16  ;;  %v882_v39 = vshll.u32 %v870_v29, 16  ;;  %v620_v47 = vld [vmem:[#allocation2 + $0x14] sm:$0x1]  ;;  %v2103_v52 = vld [vmem:[#allocation2 + $0x14] sm:$0xf0]  ;;  %v661_v59 = vor.u32 %v660_v38, %v657_v35 }
  0xbe   : > { %v643_v9 = vrot.slane %v641_v63, 4  ;;  %v646_v10 = vrot.slane %v644_v0, 5  ;;  %v768_v24 = vunpack.c.l.b16 %v756_v18  ;;  %v652_v30 = vrot.slane %v650_v4, 5  ;;  %v2027_v57 = vld [vmem:[#allocation2 + $0x18] sm:$0xf] }
  0xbf   : > { %v881_v48 = vrot.slane %v879_v36, 4  ;;  %v884_v49 = vrot.slane %v882_v39, 5  ;;  %v898_v55 = vrot.slane %v896_v43, 5  ;;  %v1128_v56 = vshrl.u32 %v1119_v20, 16  ;;  %v873_v60 = vld [vmem:[#allocation2 + $0x14] sm:$0x1] }
  0xc0   : > { %v647_v26 = vor.u32 %v646_v10, %v643_v9  ;;  %v771_v6 = vpack.c.b16 %v768_v24, %v767_v21  ;;  %v759_v58 = vrot.slane %v735_v19, 5  ;;  %v1131_v61 = vshll.u32 %v1119_v20, 16  ;;  %v871_v1 = vld [vmem:[#allocation2 + $0xc] sm:$0x1]  ;;  %v1122_v7 = vld [vmem:[#allocation2 + $0x1c] sm:$0x1] }
  0xc1   : > { %v764_v62 = vsel %vm2468_vm12, %v2016_v34, %v763_v42  ;;  %v664_v63 = vshll.u32 %v620_v47, 16  ;;  %v680_v0 = vrot.slane %v678_v44, 5  ;;  %v1142_v2 = vshrl.u32 %v1121_v50, 16  ;;  %v1120_v23 = vld [vmem:[#allocation2 + $0x14] sm:$0x1] }
  0xc2   : > { %v648_v13 = vrot.slane %v647_v26, 4  ;;  %2018 = vmatmul.msk.bf16.vlgmr.msra.gmra.mxu2 %vm580_vm11, %v771_v6  ;;  %v676_v4 = vrot.slane %v675_v17, 4  ;;  %v1130_v9 = vrot.slane %v1128_v56, 4  ;;  %v1133_v10 = vrot.slane %v1131_v61, 5  ;;  %v874_v34 = vld [vmem:[#allocation2 + $0x18] sm:$0xf] }
  0xc3   : > { %v1145_v11 = vshll.u32 %v1121_v50, 16  ;;  %v885_v18 = vor.u32 %v884_v49, %v881_v48  ;;  %v899_v21 = vor.u32 %v898_v55, %v895_v54  ;;  %v902_v22 = vshll.u32 %v873_v60, 16  ;;  %v876_v39 = vld [vmem:[#allocation2 + $0x20] sm:$0xf]  ;;  %v2059_v56 = vld [vmem:[%s2784_s1 + $0x10] sm:$0x3] }
  0xc4   : > { %v653_v37 = vsel %vm2482_vm14, %v648_v13, %v652_v30  ;;  %v1144_v24 = vrot.slane %v1142_v2, 4  ;;  %v2007_v25 = vor.u32 %v2103_v52, %v2006_v12  ;;  %v2028_v26 = vor.u32 %v2105_v53, %v2027_v57  ;;  %v1123_v42 = vld [vmem:[#allocation2 + $0x20] sm:$0xf]  ;;  %v984_v53 = vld [vmem:[#allocation2 + $0x10] sm:$0xe] }
  0xc5   : > { %v685_v14 = vunpack.c.l.b16 %v653_v37  ;;  %v760_v27 = vsel %vm2468_vm12, %v2015_v5, %v759_v58  ;;  %v1147_v28 = vrot.slane %v1145_v11, 5  ;;  %v662_v29 = vrot.slane %v661_v59, 4  ;;  %v982_v61 = vld [vmem:[#allocation2 + $0x8] sm:$0xe] }
  0xc6   : > { %v666_v30 = vrot.slane %v664_v63, 5  ;;  %v888_v31 = vshll.u32 %v871_v1, 16  ;;  %v1151_v15 = vshll.u32 %v1122_v7, 16  ;;  %v770_v40 = vunpack.c.l.b16 %v764_v62  ;;  %v983_v62 = vld [vmem:[#allocation2 + $0xc] sm:$0x1] }
  0xc7   : > { %v688_v51 = vpack.c.b16 %v685_v14, %v684_v33  ;;  %v1134_v6 = vor.u32 %v1133_v10, %v1130_v9  ;;  %v1137_v13 = vshll.u32 %v1120_v23, 16  ;;  %v1148_v8 = vor.u32 %v1147_v28, %v1144_v24  ;;  %v985_v63 = vld [vmem:[#allocation2 + $0x14] sm:$0x1]  ;;  %v877_v10 = vld [vmem:[#allocation2 + $0x24] sm:$0x1] }
  0xc8   : > { %v681_v16 = vsel %vm2482_vm14, %v676_v4, %v680_v0  ;;  %v886_v46 = vrot.slane %v885_v18, 4  ;;  %v900_v32 = vrot.slane %v899_v21, 4  ;;  %v904_v33 = vrot.slane %v902_v22, 5  ;;  %v875_v0 = vld [vmem:[#allocation2 + $0x1c] sm:$0x1] }
  0xc9   : > { %2011 = vmatmul.msk.bf16.vlgmr.msra.gmra.mxu1 %vm580_vm11, %v688_v51  ;;  %v769_v5 = vunpack.c.l.b16 %v760_v27  ;;  %v667_v35 = vsel %vm2482_vm14, %v662_v29, %v666_v30  ;;  %v890_v36 = vrot.slane %v888_v31, 5  ;;  %v1149_v37 = vrot.slane %v1148_v8, 4  ;;  %v1125_v51 = vld [vmem:[#allocation2 + $0x28] sm:$0xf]  ;;  %v1124_v21 = vld [vmem:[#allocation2 + $0x24] sm:$0x1] }
  0xca   : > { %v1153_v38 = vrot.slane %v1151_v15, 5  ;;  %v687_v20 = vunpack.c.l.b16 %v681_v16  ;;  %v1135_v14 = vrot.slane %v1134_v6, 4  ;;  %v1139_v19 = vrot.slane %v1137_v13, 5  ;;  %v1126_v29 = vld [vmem:[#allocation2 + $0x2c] sm:$0x1] }
  0xcb   : > { %v772_v41 = vpack.c.b16 %v770_v40, %v769_v5  ;;  %v891_v44 = vsel %vm2482_vm14, %v886_v46, %v890_v36  ;;  %v905_v43 = vsel %vm2482_vm14, %v900_v32, %v904_v33  ;;  %v907_v47 = vshrl.u32 %v874_v34, 16 }
  0xcc   : > { %2009 = vmatmul.msk.bf16.gmra.mxu0 %vm580_vm11, %v2007_v25  ;;  %v910_v17 = vshll.u32 %v874_v34, 16  ;;  %v686_v48 = vunpack.c.l.b16 %v667_v35  ;;  %v921_v49 = vshrl.u32 %v876_v39, 16  ;;  %v924_v50 = vshll.u32 %v876_v39, 16  ;;  %v2106_v34 = vld [vmem:[#allocation2 + $0x14] sm:$0xf0] }
  0xcd   : > { %2030 = vmatmul.msk.bf16.gmra.mxu3 %vm580_vm11, %v2028_v26  ;;  %v1154_v52 = vsel %vm2482_vm14, %v1149_v37, %v1153_v38  ;;  %v1156_v54 = vshrl.u32 %v1123_v42, 16  ;;  %v1159_v55 = vshll.u32 %v1123_v42, 16  ;;  %v936_v58 = vunpack.c.l.b16 %v891_v44 }
  0xce   : > { %v689_v57 = vpack.c.b16 %v687_v20, %v686_v48  ;;  %v937_v59 = vunpack.c.l.b16 %v905_v43  ;;  %v1140_v60 = vsel %vm2482_vm14, %v1135_v14, %v1139_v19  ;;  %v909_v1 = vrot.slane %v907_v47, 4  ;;  %v2044_v20 = vld [vmem:[#allocation2 + $0x10] sm:$0xf] }
  0xcf   : > { %v912_v2 = vrot.slane %v910_v17, 5  ;;  %v1170_v4 = vshrl.u32 %v1125_v51, 16  ;;  %v1173_v7 = vshll.u32 %v1125_v51, 16  ;;  %v1186_v9 = vunpack.c.l.b16 %v1154_v52 }
  0xd0   : > { %v923_v11 = vrot.slane %v921_v49, 4  ;;  %v926_v12 = vrot.slane %v924_v50, 5  ;;  %v1278_v18 = vsel %vm587_vm7, %v2059_v56, 0  ;;  %v1158_v22 = vrot.slane %v1156_v54, 4 }
  0xd1   : > { %v1161_v23 = vrot.slane %v1159_v55, 5  ;;  %v1172_v24 = vrot.slane %v1170_v4, 4  ;;  %v1175_v25 = vrot.slane %v1173_v7, 5  ;;  %1287 = vmatpush.bf16.msra.mxu0 %v1278_v18  ;;  %v1185_v26 = vunpack.c.l.b16 %v1140_v60  ;;  %v989_v60 = vld [vmem:[#allocation2 + $0x24] sm:$0x1] }
  0xd2   : > { %2019 = vmatmul.msk.bf16.gmra.mxu2 %vm580_vm11, %v772_v41  ;;  %v2034_v27 = vrot.slane %v982_v61, 9  ;;  %v2035_v28 = vrot.slane %v984_v53, 9  ;;  %v940_v30 = vpack.c.b16 %v937_v59, %v936_v58  ;;  %v1000_v31 = vrot.slane %v983_v62, 5  ;;  %v987_v58 = vld [vmem:[#allocation2 + $0x1c] sm:$0x1] }
  0xd3   : > { %v1004_v15 = vrot.slane %v985_v63, 5  ;;  %v916_v40 = vshll.u32 %v875_v0, 16  ;;  %v1189_v6 = vpack.c.b16 %v1186_v9, %v1185_v26  ;;  %v913_v13 = vor.u32 %v912_v2, %v909_v1  ;;  %v988_v59 = vld [vmem:[#allocation2 + $0x20] sm:$0xe]  ;;  %v1233_v4 = vld [vmem:[#allocation2 + $0x18] sm:$0xe] }
  0xd4   : > { %v930_v8 = vshll.u32 %v877_v10, 16  ;;  %v1165_v16 = vshll.u32 %v1124_v21, 16  ;;  %v927_v46 = vor.u32 %v926_v12, %v923_v11  ;;  %v1162_v32 = vor.u32 %v1161_v23, %v1158_v22  ;;  %v1234_v7 = vld [vmem:[#allocation2 + $0x1c] sm:$0x1]  ;;  %v2048_v9 = vld [vmem:[#allocation2 + $0x20] sm:$0xf] }
  0xd5   : > { %v1176_v33 = vor.u32 %v1175_v25, %v1172_v24  ;;  %v1179_v5 = vshll.u32 %v1126_v29, 16  ;;  %v1001_v35 = vsel %vm2468_vm12, %v2034_v27, %v1000_v31  ;;  %v1005_v36 = vsel %vm2468_vm12, %v2035_v28, %v1004_v15  ;;  %v2107_v10 = vld [vmem:[#allocation2 + $0x24] sm:$0xf0]  ;;  %v1231_v18 = vld [vmem:[#allocation2 + $0x10] sm:$0xe] }
  0xd6   : > { %v914_v37 = vrot.slane %v913_v13, 4  ;;  %v918_v38 = vrot.slane %v916_v40, 5  ;;  %v932_v39 = vrot.slane %v930_v8, 5  ;;  %v1167_v41 = vrot.slane %v1165_v16, 5  ;;  %v1232_v21 = vld [vmem:[#allocation2 + $0x14] sm:$0x1] }
  0xd7   : > { %v928_v14 = vrot.slane %v927_v46, 4  ;;  %v1163_v19 = vrot.slane %v1162_v32, 4  ;;  %v1177_v42 = vrot.slane %v1176_v33, 4  ;;  %v1181_v44 = vrot.slane %v1179_v5, 5  ;;  %v1235_v13 = vld [vmem:[#allocation2 + $0x20] sm:$0xe] }
  0xd8   : > { %v2045_v43 = vor.u32 %v2106_v34, %v2044_v20  ;;  %v1016_v47 = vunpack.c.l.b16 %v1001_v35  ;;  %v1017_v17 = vunpack.c.l.b16 %v1005_v36  ;;  %v919_v48 = vsel %vm2482_vm14, %v914_v37, %v918_v38  ;;  %v1236_v8 = vld [vmem:[#allocation2 + $0x24] sm:$0x1]  ;;  %v1237_v16 = vld [vmem:[#allocation2 + $0x28] sm:$0xe]  ;;  %v1238_v46 = vld [vmem:[#allocation2 + $0x2c] sm:$0x1] }
  0xd9   : > { %2012 = vmatmul.msk.bf16.gmra.mxu1 %vm580_vm11, %v689_v57  ;;  %v933_v49 = vsel %vm2482_vm14, %v928_v14, %v932_v39  ;;  %v1168_v50 = vsel %vm2482_vm14, %v1163_v19, %v1167_v41  ;;  %v1182_v51 = vsel %vm2482_vm14, %v1177_v42, %v1181_v44  ;;  %v938_v53 = vunpack.c.l.b16 %v919_v48  ;;  %v986_v57 = vld [vmem:[#allocation2 + $0x18] sm:$0xe] }
  0xda   : > { %v1020_v52 = vpack.c.b16 %v1017_v17, %v1016_v47  ;;  %v939_v54 = vunpack.c.l.b16 %v933_v49  ;;  %v1187_v55 = vunpack.c.l.b16 %v1168_v50  ;;  %v1188_v56 = vunpack.c.l.b16 %v1182_v51 }
  0xdb   : > { %v2036_v61 = vrot.slane %v986_v57, 9  ;;  %v1008_v62 = vrot.slane %v987_v58, 5  ;;  %v2037_v1 = vrot.slane %v988_v59, 9  ;;  %v1012_v2 = vrot.slane %v989_v60, 5 }
  0xdc   : > { %2032 = vmatmul.msk.bf16.vlgmr.msrb.gmra.mxu0 %vm580_vm11, %v940_v30  ;;  %v941_v63 = vpack.c.b16 %v939_v54, %v938_v53  ;;  %v1190_v0 = vpack.c.b16 %v1188_v56, %v1187_v55  ;;  %v2056_v22 = vrot.slane %v1233_v4, 9  ;;  %v1253_v23 = vrot.slane %v1234_v7, 5 }
  0xdd   : > { %2053 = vmatmul.msk.bf16.vlgmr.msrb.gmra.mxu3 %vm580_vm11, %v1189_v6  ;;  %v1009_v11 = vsel %vm2468_vm12, %v2036_v61, %v1008_v62  ;;  %v1013_v12 = vsel %vm2468_vm12, %v2037_v1, %v1012_v2  ;;  %v2049_v24 = vor.u32 %v2107_v10, %v2048_v9  ;;  %v2055_v27 = vrot.slane %v1231_v18, 9 }
  0xde   : > { %v1018_v25 = vunpack.c.l.b16 %v1009_v11  ;;  %v1019_v26 = vunpack.c.l.b16 %v1013_v12  ;;  %v1249_v28 = vrot.slane %v1232_v21, 5  ;;  %v1254_v29 = vsel %vm2468_vm12, %v2056_v22, %v1253_v23 }
  0xdf   : > { %v1266_v15 = vunpack.c.l.b16 %v1254_v29  ;;  %v2057_v32 = vrot.slane %v1235_v13, 9  ;;  %v1257_v33 = vrot.slane %v1236_v8, 5  ;;  %v2058_v5 = vrot.slane %v1237_v16, 9 }
  0xe0   : > { %v1021_v30 = vpack.c.b16 %v1019_v26, %v1018_v25  ;;  %v1250_v31 = vsel %vm2468_vm12, %v2055_v27, %v1249_v28  ;;  %v1261_v34 = vrot.slane %v1238_v46, 5 }
  0xe1   : > { %v1265_v40 = vunpack.c.l.b16 %v1250_v31  ;;  %v1258_v35 = vsel %vm2468_vm12, %v2057_v32, %v1257_v33 }
  0xe2   : > { %2050 = vmatmul.msk.bf16.vlgmr.msrb.gmra.mxu2 %vm580_vm11, %v2045_v43  ;;  %v1262_v36 = vsel %vm2468_vm12, %v2058_v5, %v1261_v34  ;;  %v1267_v37 = vunpack.c.l.b16 %v1258_v35 }
  0xe3   : > { %v1269_v6 = vpack.c.b16 %v1266_v15, %v1265_v40  ;;  %v1268_v38 = vunpack.c.l.b16 %v1262_v36 }
  0xe5   : > { %v1270_v39 = vpack.c.b16 %v1268_v38, %v1267_v37 }
  0xe9   : > { %2039 = vmatmul.msk.bf16.vlgmr.msrb.gmra.mxu1 %vm580_vm11, %v1020_v52 }
  0xec   : > { %2033 = vmatmul.msk.bf16.gmra.mxu0 %vm580_vm11, %v941_v63 }
  0xed   : > { %2054 = vmatmul.msk.bf16.gmra.mxu3 %vm580_vm11, %v1190_v0 }
  0xf2   : > { %2051 = vmatmul.msk.bf16.gmra.mxu2 %vm580_vm11, %v2049_v24 }
  0xf9   : > { %2040 = vmatmul.msk.bf16.gmra.mxu1 %vm580_vm11, %v1021_v30 }
  0xfc   : > { %2060 = vmatmul.msk.bf16.vlgmr.msra.gmra.mxu0 %vm580_vm11, %v1269_v6 }
 0x10c   : > { %2061 = vmatmul.msk.bf16.gmra.mxu0 %vm580_vm11, %v1270_v39 }
 0x139   : > { %v600_v41 = vpop.f32.mrf.mxu0 }
 0x13a   : > { %611 = vst.msk [vmem:[#allocation4] sm:$0xff] %vm610_vm15, %v600_v41 }
 0x140   : > { %v848_v51 = vpop.f32.mrf.mxu3 }
 0x141   : > { %v602_v20 = vpop.f32.mrf.mxu0  ;;  %v718_v19 = vld [vmem:[#allocation4] sm:$0xff] }
 0x142   : > { %612 = vst.msk [vmem:[#allocation4 + $0x8] sm:$0xff] %vm610_vm15, %v602_v20 }
 0x145   : > { %v791_v44 = vpop.f32.mrf.mxu2 }
 0x146   : > { %v708_v14 = vpop.f32.mrf.mxu1 }
 0x147   : > { %v722_v42 = vadd.f32 %v718_v19, %v708_v14 }
 0x148   : > { %v850_v61 = vpop.f32.mrf.mxu3 }
 0x149   : > { %726 = vst.msk [vmem:[#allocation4] sm:$0xff] %vm610_vm15, %v722_v42  ;;  %v605_v43 = vpop.f32.mrf.mxu0  ;;  %v719_v17 = vld [vmem:[#allocation4 + $0x8] sm:$0xff] }
 0x14a   : > { %613 = vst.msk [vmem:[#allocation4 + $0x10] sm:$0xff] %vm610_vm15, %v605_v43 }
 0x14d   : > { %v793_v52 = vpop.f32.mrf.mxu2 }
 0x14e   : > { %v710_v47 = vpop.f32.mrf.mxu1 }
 0x14f   : > { %v723_v48 = vadd.f32 %v719_v17, %v710_v47 }
 0x150   : > { %v801_v49 = vld [vmem:[#allocation4] sm:$0xff]  ;;  %v853_v18 = vpop.f32.mrf.mxu3 }
 0x151   : > { %v805_v50 = vadd.f32 %v801_v49, %v791_v44  ;;  %727 = vst.msk [vmem:[#allocation4 + $0x8] sm:$0xff] %vm610_vm15, %v723_v48  ;;  %v607_v53 = vpop.f32.mrf.mxu0  ;;  %v720_v55 = vld [vmem:[#allocation4 + $0x10] sm:$0xff] }
 0x152   : > { %614 = vst.msk [vmem:[#allocation4 + $0x18] sm:$0xff] %vm610_vm15, %v607_v53 }
 0x153   : > { %809 = vst.msk [vmem:[#allocation4] sm:$0xff] %vm610_vm15, %v805_v50 }
 0x155   : > { %v796_v62 = vpop.f32.mrf.mxu2 }
 0x156   : > { %v713_v54 = vpop.f32.mrf.mxu1 }
 0x157   : > { %v724_v56 = vadd.f32 %v720_v55, %v713_v54 }
 0x158   : > { %v802_v57 = vld [vmem:[#allocation4 + $0x8] sm:$0xff]  ;;  %v855_v15 = vpop.f32.mrf.mxu3 }
 0x159   : > { %v806_v58 = vadd.f32 %v802_v57, %v793_v52  ;;  %728 = vst.msk [vmem:[#allocation4 + $0x10] sm:$0xff] %vm610_vm15, %v724_v56  ;;  %v960_v63 = vpop.f32.mrf.mxu0  ;;  %v721_v1 = vld [vmem:[#allocation4 + $0x18] sm:$0xff] }
 0x15a   : > { %v858_v59 = vld [vmem:[#allocation4] sm:$0xff] }
 0x15b   : > { %810 = vst.msk [vmem:[#allocation4 + $0x8] sm:$0xff] %vm610_vm15, %v806_v58  ;;  %v862_v60 = vadd.f32 %v858_v59, %v848_v51 }
 0x15d   : > { %866 = vst.msk [vmem:[#allocation4] sm:$0xff] %vm610_vm15, %v862_v60  ;;  %v798_v21 = vpop.f32.mrf.mxu2  ;;  %v2594_v60 = vld [vmem:[%s2785_s2] ss:$0 sm:$0xff] }
 0x15e   : > { %v715_v0 = vpop.f32.mrf.mxu1 }
 0x15f   : > { %v725_v2 = vadd.f32 %v721_v1, %v715_v0  ;;  %v2599_v0 = vld [vmem:[%s2786_s3] ss:$0 sm:$0xff] }
 0x160   : > { %v803_v4 = vld [vmem:[#allocation4 + $0x10] sm:$0xff]  ;;  %v1209_v14 = vpop.f32.mrf.mxu3 }
 0x161   : > { %v807_v7 = vadd.f32 %v803_v4, %v796_v62  ;;  %729 = vst.msk [vmem:[#allocation4 + $0x18] sm:$0xff] %vm610_vm15, %v725_v2  ;;  %v962_v23 = vpop.f32.mrf.mxu0 }
 0x162   : > { %v859_v9 = vld [vmem:[#allocation4 + $0x8] sm:$0xff] }
 0x163   : > { %811 = vst.msk [vmem:[#allocation4 + $0x10] sm:$0xff] %vm610_vm15, %v807_v7  ;;  %v863_v10 = vadd.f32 %v859_v9, %v850_v61 }
 0x164   : > { %v970_v11 = vld [vmem:[#allocation4] sm:$0xff] }
 0x165   : > { %v974_v12 = vadd.f32 %v970_v11, %v960_v63  ;;  %867 = vst.msk [vmem:[#allocation4 + $0x8] sm:$0xff] %vm610_vm15, %v863_v10  ;;  %v1097_v8 = vpop.f32.mrf.mxu2 }
 0x166   : > { %v1040_v25 = vpop.f32.mrf.mxu1 }
 0x167   : > { %978 = vst.msk [vmem:[#allocation4] sm:$0xff] %vm610_vm15, %v974_v12 }
 0x168   : > { %v804_v22 = vld [vmem:[#allocation4 + $0x18] sm:$0xff]  ;;  %v1211_v49 = vpop.f32.mrf.mxu3 }
 0x169   : > { %v808_v24 = vadd.f32 %v804_v22, %v798_v21  ;;  %v965_v40 = vpop.f32.mrf.mxu0 }
 0x16a   : > { %v860_v26 = vld [vmem:[#allocation4 + $0x10] sm:$0xff] }
 0x16b   : > { %812 = vst.msk [vmem:[#allocation4 + $0x18] sm:$0xff] %vm610_vm15, %v808_v24  ;;  %v864_v27 = vadd.f32 %v860_v26, %v853_v18 }
 0x16c   : > { %v971_v28 = vld [vmem:[#allocation4 + $0x8] sm:$0xff] }
 0x16d   : > { %v975_v29 = vadd.f32 %v971_v28, %v962_v23  ;;  %868 = vst.msk [vmem:[#allocation4 + $0x10] sm:$0xff] %vm610_vm15, %v864_v27  ;;  %v1099_v39 = vpop.f32.mrf.mxu2 }
 0x16e   : > { %v1050_v30 = vld [vmem:[#allocation4] sm:$0xff]  ;;  %v1042_v46 = vpop.f32.mrf.mxu1 }
 0x16f   : > { %979 = vst.msk [vmem:[#allocation4 + $0x8] sm:$0xff] %vm610_vm15, %v975_v29  ;;  %v1054_v31 = vadd.f32 %v1050_v30, %v1040_v25 }
 0x170   : > { %v1214_v59 = vpop.f32.mrf.mxu3 }
 0x171   : > { %1058 = vst.msk [vmem:[#allocation4] sm:$0xff] %vm610_vm15, %v1054_v31  ;;  %v967_v36 = vpop.f32.mrf.mxu0 }
 0x172   : > { %v861_v6 = vld [vmem:[#allocation4 + $0x18] sm:$0xff] }
 0x173   : > { %v865_v13 = vadd.f32 %v861_v6, %v855_v15  ;;  %v1386_v6 = vld [vmem:[#allocation3 + $0x4] sm:$0x1] }
 0x174   : > { %v972_v16 = vld [vmem:[#allocation4 + $0x10] sm:$0xff] }
 0x175   : > { %v976_v32 = vadd.f32 %v972_v16, %v965_v40  ;;  %869 = vst.msk [vmem:[#allocation4 + $0x18] sm:$0xff] %vm610_vm15, %v865_v13  ;;  %v1102_v17 = vpop.f32.mrf.mxu2  ;;  %v1381_v40 = vld [vmem:[#allocation3] sm:$0xf] }
 0x176   : > { %v1051_v33 = vld [vmem:[#allocation4 + $0x8] sm:$0xff]  ;;  %v1045_v41 = vpop.f32.mrf.mxu1 }
 0x177   : > { %980 = vst.msk [vmem:[#allocation4 + $0x10] sm:$0xff] %vm610_vm15, %v976_v32  ;;  %v1055_v5 = vadd.f32 %v1051_v33, %v1042_v46 }
 0x178   : > { %v1107_v34 = vld [vmem:[#allocation4] sm:$0xff]  ;;  %v1216_v22 = vpop.f32.mrf.mxu3 }
 0x179   : > { %v1111_v35 = vadd.f32 %v1107_v34, %v1097_v8  ;;  %1059 = vst.msk [vmem:[#allocation4 + $0x8] sm:$0xff] %vm610_vm15, %v1055_v5  ;;  %v1289_v51 = vpop.f32.mrf.mxu0 }
 0x17b   : > { %1115 = vst.msk [vmem:[#allocation4] sm:$0xff] %vm610_vm15, %v1111_v35 }
 0x17c   : > { %v973_v37 = vld [vmem:[#allocation4 + $0x18] sm:$0xff] }
 0x17d   : > { %v977_v38 = vadd.f32 %v973_v37, %v967_v36  ;;  %v1104_v61 = vpop.f32.mrf.mxu2 }
 0x17e   : > { %v1052_v20 = vld [vmem:[#allocation4 + $0x10] sm:$0xff]  ;;  %v1047_v52 = vpop.f32.mrf.mxu1 }
 0x17f   : > { %981 = vst.msk [vmem:[#allocation4 + $0x18] sm:$0xff] %vm610_vm15, %v977_v38  ;;  %v1056_v19 = vadd.f32 %v1052_v20, %v1045_v41 }
 0x180   : > { %v1108_v42 = vld [vmem:[#allocation4 + $0x8] sm:$0xff] }
 0x181   : > { %v1112_v44 = vadd.f32 %v1108_v42, %v1099_v39  ;;  %1060 = vst.msk [vmem:[#allocation4 + $0x10] sm:$0xff] %vm610_vm15, %v1056_v19  ;;  %v1291_v63 = vpop.f32.mrf.mxu0 }
 0x182   : > { %v1219_v43 = vld [vmem:[#allocation4] sm:$0xff] }
 0x183   : > { %1116 = vst.msk [vmem:[#allocation4 + $0x8] sm:$0xff] %vm610_vm15, %v1112_v44  ;;  %v1223_v47 = vadd.f32 %v1219_v43, %v1209_v14  ;;  %v1389_v43 = vld [vmem:[#allocation3 + $0x8] sm:$0xf] }
 0x185   : > { %1227 = vst.msk [vmem:[#allocation4] sm:$0xff] %vm610_vm15, %v1223_v47 }
 0x186   : > { %v1053_v53 = vld [vmem:[#allocation4 + $0x18] sm:$0xff] }
 0x187   : > { %v1057_v54 = vadd.f32 %v1053_v53, %v1047_v52 }
 0x188   : > { %v1109_v48 = vld [vmem:[#allocation4 + $0x10] sm:$0xff] }
 0x189   : > { %v1113_v50 = vadd.f32 %v1109_v48, %v1102_v17  ;;  %1061 = vst.msk [vmem:[#allocation4 + $0x18] sm:$0xff] %vm610_vm15, %v1057_v54  ;;  %v1294_v23 = vpop.f32.mrf.mxu0 }
 0x18a   : > { %v1220_v57 = vld [vmem:[#allocation4 + $0x8] sm:$0xff] }
 0x18b   : > { %1117 = vst.msk [vmem:[#allocation4 + $0x10] sm:$0xff] %vm610_vm15, %v1113_v50  ;;  %v1224_v58 = vadd.f32 %v1220_v57, %v1211_v49  ;;  %v1392_v49 = vld [vmem:[#allocation3 + $0xc] sm:$0x1] }
 0x18c   : > { %v1299_v55 = vld [vmem:[#allocation4] sm:$0xff] }
 0x18d   : > { %v1303_v56 = vadd.f32 %v1299_v55, %v1289_v51  ;;  %1228 = vst.msk [vmem:[#allocation4 + $0x8] sm:$0xff] %vm610_vm15, %v1224_v58 }
 0x18f   : > { %1307 = vst.msk [vmem:[#allocation4] sm:$0xff] %vm610_vm15, %v1303_v56 }
 0x190   : > { %v1110_v62 = vld [vmem:[#allocation4 + $0x18] sm:$0xff] }
 0x191   : > { %v1114_v1 = vadd.f32 %v1110_v62, %v1104_v61  ;;  %v1296_v35 = vpop.f32.mrf.mxu0 }
 0x192   : > { %v1221_v4 = vld [vmem:[#allocation4 + $0x10] sm:$0xff] }
 0x193   : > { %1118 = vst.msk [vmem:[#allocation4 + $0x18] sm:$0xff] %vm610_vm15, %v1114_v1  ;;  %v1225_v9 = vadd.f32 %v1221_v4, %v1214_v59  ;;  %v1395_v1 = vld [vmem:[#allocation3 + $0x10] sm:$0xf] }
 0x194   : > { %v1300_v10 = vld [vmem:[#allocation4 + $0x8] sm:$0xff] }
 0x195   : > { %v1304_v12 = vadd.f32 %v1300_v10, %v1291_v63  ;;  %1229 = vst.msk [vmem:[#allocation4 + $0x10] sm:$0xff] %vm610_vm15, %v1225_v9 }
 0x196   : > { %v1311_v2 = vld [vmem:[#allocation4] sm:$0xff] }
 0x197   : > { %v1319_v7 = vmul.f32 %v2594_v60, %v1311_v2  ;;  %1308 = vst.msk [vmem:[#allocation4 + $0x8] sm:$0xff] %vm610_vm15, %v1304_v12 }
 0x199   : > { %v1327_v11 = vadd.f32 %v2599_v0, %v1319_v7  ;;  %v1398_v7 = vld [vmem:[#allocation3 + $0x14] sm:$0x1] }
 0x19a   : > { %v1222_v24 = vld [vmem:[#allocation4 + $0x18] sm:$0xff] }
 0x19b   : > { %v1331_v18 = vmax.f32 %v1327_v11, 0.0  ;;  %v1226_v26 = vadd.f32 %v1222_v24, %v1216_v22 }
 0x19c   : > { %v1301_v28 = vld [vmem:[#allocation4 + $0x10] sm:$0xff] }
 0x19d   : > { %v1335_v21 = vpack.c.bf16 %v1331_v18, %v1331_v18  ;;  %v1305_v15 = vadd.f32 %v1301_v28, %v1294_v23  ;;  %1230 = vst.msk [vmem:[#allocation4 + $0x18] sm:$0xff] %vm610_vm15, %v1226_v26  ;;  %v1404_v26 = vld [vmem:[#allocation3 + $0x1c] sm:$0x1] }
 0x19e   : > { %v1312_v13 = vld [vmem:[#allocation4 + $0x8] sm:$0xff] }
 0x19f   : > { %v1340_v25 = vshrl.u32 %v1335_v21, 16  ;;  %v1343_v31 = vshll.u32 %v1335_v21, 16  ;;  %v1320_v46 = vmul.f32 %v2594_v60, %v1312_v13  ;;  %1309 = vst.msk [vmem:[#allocation4 + $0x10] sm:$0xff] %vm610_vm15, %v1305_v15 }
 0x1a1   : > { %v1342_v30 = vrot.slane %v1340_v25, 7  ;;  %v1328_v5 = vadd.f32 %v2599_v0, %v1320_v46  ;;  %v1401_v25 = vld [vmem:[#allocation3 + $0x18] sm:$0xf] }
 0x1a3   : > { %v1345_v8 = vor.u32 %v1343_v31, %v1342_v30  ;;  %v1346_v16 = vrot.slane %v1342_v30, 4  ;;  %v1332_v34 = vmax.f32 %v1328_v5, 0.0 }
 0x1a4   : > { %v1302_v36 = vld [vmem:[#allocation4 + $0x18] sm:$0xff] }
 0x1a5   : > { %v1382_v32 = vsel %vm2608_vm4, %v1345_v8, %v1381_v40  ;;  %v1387_v33 = vsel %vm2614_vm5, %v1346_v16, %v1386_v6  ;;  %v1336_v37 = vpack.c.bf16 %v1332_v34, %v1332_v34  ;;  %v1306_v38 = vadd.f32 %v1302_v36, %v1296_v35 }
 0x1a6   : > { %1383 = vst [vmem:[#allocation3] sm:$0xf] %v1382_v32  ;;  %v1313_v39 = vld [vmem:[#allocation4 + $0x10] sm:$0xff] }
 0x1a7   : > { %1388 = vst [vmem:[#allocation3 + $0x4] sm:$0x1] %v1387_v33  ;;  %v1348_v41 = vshrl.u32 %v1336_v37, 16  ;;  %v1321_v20 = vmul.f32 %v2594_v60, %v1313_v39  ;;  %v1351_v44 = vshll.u32 %v1336_v37, 16 }
 0x1a8   : > { %1310 = vst.msk [vmem:[#allocation4 + $0x18] sm:$0xff] %vm610_vm15, %v1306_v38 }
 0x1a9   : > { %v1350_v42 = vrot.slane %v1348_v41, 7  ;;  %v1329_v47 = vadd.f32 %v2599_v0, %v1321_v20 }
 0x1ab   : > { %v1353_v51 = vor.u32 %v1351_v44, %v1350_v42  ;;  %v1354_v52 = vrot.slane %v1350_v42, 4  ;;  %v1333_v53 = vmax.f32 %v1329_v47, 0.0 }
 0x1ad   : > { %v1407_v19 = vld [vmem:[#allocation3] sm:$0x1]  ;;  %v1390_v54 = vsel %vm2608_vm4, %v1353_v51, %v1389_v43  ;;  %v1393_v55 = vsel %vm2614_vm5, %v1354_v52, %v1392_v49  ;;  %v1337_v56 = vpack.c.bf16 %v1333_v53, %v1333_v53 }
 0x1ae   : > { %v1408_v17 = vsel %vm2614_vm5, 0, %v1407_v19  ;;  %v1420_v48 = vld [vmem:[#allocation3 + $0x4] sm:$0x1]  ;;  %1391 = vst [vmem:[#allocation3 + $0x8] sm:$0xf] %v1390_v54 }
 0x1af   : > { %1409 = vst [vmem:[#allocation3] sm:$0x1] %v1408_v17  ;;  %v1421_v50 = vsel %vm2630_vm3, 0, %v1420_v48  ;;  %v1314_v57 = vld [vmem:[#allocation4 + $0x18] sm:$0xff]  ;;  %v1356_v58 = vshrl.u32 %v1337_v56, 16  ;;  %v1359_v62 = vshll.u32 %v1337_v56, 16 }
 0x1b0   : > { %1422 = vst [vmem:[#allocation3 + $0x4] sm:$0x1] %v1421_v50  ;;  %v1322_v59 = vmul.f32 %v2594_v60, %v1314_v57 }
 0x1b1   : > { %1394 = vst [vmem:[#allocation3 + $0xc] sm:$0x1] %v1393_v55  ;;  %v1358_v61 = vrot.slane %v1356_v58, 7 }
 0x1b2   : > { %v1330_v63 = vadd.f32 %v2599_v0, %v1322_v59 }
 0x1b3   : > { %v1361_v2 = vor.u32 %v1359_v62, %v1358_v61  ;;  %v1362_v4 = vrot.slane %v1358_v61, 4 }
 0x1b4   : > { %v1334_v9 = vmax.f32 %v1330_v63, 0.0 }
 0x1b5   : > { %v1410_v10 = vld [vmem:[#allocation3 + $0x8] sm:$0x1]  ;;  %v1396_v11 = vsel %vm2608_vm4, %v1361_v2, %v1395_v1  ;;  %v1399_v60 = vsel %vm2614_vm5, %v1362_v4, %v1398_v7 }
 0x1b6   : > { %v1338_v12 = vpack.c.bf16 %v1334_v9, %v1334_v9  ;;  %v1411_v18 = vsel %vm2614_vm5, 0, %v1410_v10  ;;  %1397 = vst [vmem:[#allocation3 + $0x10] sm:$0xf] %v1396_v11 }
 0x1b7   : > { %1412 = vst [vmem:[#allocation3 + $0x8] sm:$0x1] %v1411_v18 }
 0x1b8   : > { %v1423_v21 = vld [vmem:[#allocation3 + $0xc] sm:$0x1]  ;;  %v1364_v22 = vshrl.u32 %v1338_v12, 16  ;;  %1400 = vst [vmem:[#allocation3 + $0x14] sm:$0x1] %v1399_v60  ;;  %v1367_v24 = vshll.u32 %v1338_v12, 16 }
 0x1b9   : > { %v1424_v0 = vsel %vm2630_vm3, 0, %v1423_v21 }
 0x1ba   : > { %1425 = vst [vmem:[#allocation3 + $0xc] sm:$0x1] %v1424_v0  ;;  %v1366_v23 = vrot.slane %v1364_v22, 7 }
 0x1bc   : > { %v1369_v28 = vor.u32 %v1367_v24, %v1366_v23  ;;  %v1370_v30 = vrot.slane %v1366_v23, 4 }
 0x1bd   : > { %v1413_v31 = vld [vmem:[#allocation3 + $0x10] sm:$0x1] }
 0x1be   : > { %v1402_v15 = vsel %vm2608_vm4, %v1369_v28, %v1401_v25  ;;  %v1405_v40 = vsel %vm2614_vm5, %v1370_v30, %v1404_v26  ;;  %v1414_v6 = vsel %vm2614_vm5, 0, %v1413_v31 }
 0x1bf   : > { %1403 = vst [vmem:[#allocation3 + $0x18] sm:$0xf] %v1402_v15  ;;  %v1426_v13 = vld [vmem:[#allocation3 + $0x14] sm:$0x1] }
 0x1c0   : > { %1415 = vst [vmem:[#allocation3 + $0x10] sm:$0x1] %v1414_v6  ;;  %v1427_v8 = vsel %vm2630_vm3, 0, %v1426_v13 }
 0x1c1   : > { %1406 = vst [vmem:[#allocation3 + $0x1c] sm:$0x1] %v1405_v40 }
 0x1c2   : > { %1428 = vst [vmem:[#allocation3 + $0x14] sm:$0x1] %v1427_v8 }
 0x1c6   : > { %v1416_v16 = vld [vmem:[#allocation3 + $0x18] sm:$0x1]  ;;  %1435 = sbr.rel (%p2062_p7) target bundleno = 462 (0x1ce), region = 52 }
 0x1c7   : > { %v1417_v46 = vsel %vm2614_vm5, 0, %v1416_v16 }
 0x1c8   : > { %1418 = vst [vmem:[#allocation3 + $0x18] sm:$0x1] %v1417_v46  ;;  %v1429_v27 = vld [vmem:[#allocation3 + $0x1c] sm:$0x1] }
 0x1c9   : > { %v1430_v32 = vsel %vm2630_vm3, 0, %v1429_v27 }
 0x1ca   : > { %1431 = vst [vmem:[#allocation3 + $0x1c] sm:$0x1] %v1430_v32 }
 0x1cb   : > { %v2259_v33 = vmov 0  }
 0x1cc   : > { %1437 = vst.msk [vmem:[#allocation3] sm:$0xf] %vm1379_vm0, %v2259_v33 }
 0x1cd   : > { %1439 = vst.msk [vmem:[#allocation3 + $0x4] sm:$0x1] %vm1384_vm2, %v2259_v33 }
 0x1ce PF: > { %p2063_p8 = scmp.ne.s32.totalorder %s2240_s24, 3 }
 0x1d0   : > { %1443 = sbr.rel (%p2063_p8) target bundleno = 472 (0x1d8), region = 56 }
 0x1d5   : > { %v2260_v29 = vmov 0  }
 0x1d6   : > { %1446 = vst.msk [vmem:[#allocation3 + $0x18] sm:$0xf] %vm1379_vm0, %v2260_v29 }
 0x1d7   : > { %1448 = vst.msk [vmem:[#allocation3 + $0x1c] sm:$0x1] %vm1384_vm2, %v2260_v29 }
 0x1d8 PF: > { %v1451_v5 = vld [vmem:[%s2787_s4] sm:$0xf]  ;;  %vm1460_vm1 = vcmask 1043456   ;;  %v2066_v34 = vld [vmem:[#allocation3] sm:$0xf] }
 0x1d9   : > { %v1462_v35 = vsel %vm1460_vm1, %v1451_v5, 0  ;;  %v2108_v36 = vld [vmem:[#allocation3 + $0x4] sm:$0xf0]  ;;  %v2069_v37 = vld [vmem:[%s2787_s4 + $0x4] sm:$0xf] }
 0x1da   : > { %1471 = vmatpush.bf16.msra.mxu1 %v1462_v35  ;;  %v2067_v38 = vor.u32 %v2108_v36, %v2066_v34  ;;  %v1521_v39 = vsel %vm1460_vm1, %v2069_v37, 0  ;;  %v2073_v41 = vld [vmem:[%s2787_s4 + $0x8] sm:$0xf]  ;;  %v1480_v20 = vld [vmem:[#allocation3] sm:$0xf] }
 0x1db   : > { %1530 = vmatpush.bf16.msra.mxu2 %v1521_v39  ;;  %v1568_v14 = vsel %vm1460_vm1, %v2073_v41, 0  ;;  %v1481_v19 = vld [vmem:[#allocation3 + $0x4] sm:$0x1]  ;;  %v1482_v42 = vld [vmem:[#allocation3 + $0x8] sm:$0xf]  ;;  %v1485_v44 = vshrl.u32 %v1480_v20, 16 }
 0x1dc   : > { %1577 = vmatpush.bf16.msra.mxu3 %v1568_v14  ;;  %v1483_v43 = vld [vmem:[#allocation3 + $0xc] sm:$0x1]  ;;  %v1488_v47 = vshll.u32 %v1480_v20, 16  ;;  %v1494_v17 = vshll.u32 %v1481_v19, 16  ;;  %v1499_v48 = vshrl.u32 %v1482_v42, 16  ;;  %v1502_v49 = vshll.u32 %v1482_v42, 16 }
 0x1dd   : > { %2068 = vmatmul.msk.bf16.vlgmr.msra.gmra.mxu1 %vm610_vm15, %v2067_v38  ;;  %v1487_v50 = vrot.slane %v1485_v44, 4  ;;  %v1508_v51 = vshll.u32 %v1483_v43, 16  ;;  %v1543_v52 = vld [vmem:[#allocation3] sm:$0xe]  ;;  %v1544_v53 = vld [vmem:[#allocation3 + $0x4] sm:$0x1] }
 0x1de   : > { %v1490_v54 = vrot.slane %v1488_v47, 5  ;;  %v1501_v55 = vrot.slane %v1499_v48, 4  ;;  %v1504_v56 = vrot.slane %v1502_v49, 5  ;;  %v1545_v57 = vld [vmem:[#allocation3 + $0x8] sm:$0xe]  ;;  %v1496_v58 = vrot.slane %v1494_v17, 5 }
 0x1df   : > { %v1546_v59 = vld [vmem:[#allocation3 + $0xc] sm:$0x1]  ;;  %v2071_v61 = vrot.slane %v1543_v52, 9  ;;  %v1553_v62 = vrot.slane %v1544_v53, 5  ;;  %v2072_v63 = vrot.slane %v1545_v57, 9  ;;  %v1510_v4 = vrot.slane %v1508_v51, 5 }
 0x1e0   : > { %v1491_v1 = vor.u32 %v1490_v54, %v1487_v50  ;;  %v1505_v2 = vor.u32 %v1504_v56, %v1501_v55  ;;  %v1557_v7 = vrot.slane %v1546_v59, 5  ;;  %v2075_v9 = vld [vmem:[%s2787_s4 + $0xc] sm:$0xf]  ;;  %v2081_v10 = vld [vmem:[%s2787_s4 + $0x10] sm:$0xf] }
 0x1e1   : > { %v1554_v11 = vsel %vm2468_vm12, %v2071_v61, %v1553_v62  ;;  %v1604_v12 = vsel %vm1460_vm1, %v2075_v9, 0  ;;  %v1667_v18 = vsel %vm1460_vm1, %v2081_v10, 0  ;;  %v1626_v23 = vld [vmem:[#allocation3 + $0x8] sm:$0xf]  ;;  %v1627_v24 = vld [vmem:[#allocation3 + $0xc] sm:$0x1] }
 0x1e2   : > { %v1492_v21 = vrot.slane %v1491_v1, 4  ;;  %v1506_v60 = vrot.slane %v1505_v2, 4  ;;  %v1558_v0 = vsel %vm2468_vm12, %v2072_v63, %v1557_v7  ;;  %v1561_v22 = vunpack.c.l.b16 %v1554_v11  ;;  %1613 = vmatpush.bf16.msrb.mxu1 %v1604_v12  ;;  %1676 = vmatpush.bf16.msrb.mxu2 %v1667_v18  ;;  %v1628_v26 = vld [vmem:[#allocation3 + $0x10] sm:$0xf]  ;;  %v1629_v28 = vld [vmem:[#allocation3 + $0x14] sm:$0x1] }
 0x1e3   : > { %v1562_v25 = vunpack.c.l.b16 %v1558_v0  ;;  %v1631_v30 = vshrl.u32 %v1626_v23, 16  ;;  %v1634_v31 = vshll.u32 %v1626_v23, 16  ;;  %v2078_v6 = vld [vmem:[#allocation3 + $0x8] sm:$0xf]  ;;  %v2109_v13 = vld [vmem:[#allocation3 + $0xc] sm:$0xf0] }
 0x1e4   : > { %v1497_v15 = vsel %vm2482_vm14, %v1492_v21, %v1496_v58  ;;  %v1511_v40 = vsel %vm2482_vm14, %v1506_v60, %v1510_v4  ;;  %v1640_v8 = vshll.u32 %v1627_v24, 16  ;;  %v1645_v16 = vshrl.u32 %v1628_v26, 16  ;;  %v2085_v46 = vld [vmem:[%s2787_s4 + $0x14] sm:$0xf]  ;;  %v1689_v27 = vld [vmem:[#allocation3 + $0x8] sm:$0xe] }
 0x1e5   : > { %v1514_v32 = vunpack.c.l.b16 %v1497_v15  ;;  %v1515_v33 = vunpack.c.l.b16 %v1511_v40  ;;  %v1563_v29 = vpack.c.b16 %v1562_v25, %v1561_v22  ;;  %v1633_v5 = vrot.slane %v1631_v30, 4  ;;  %v1690_v34 = vld [vmem:[#allocation3 + $0xc] sm:$0x1]  ;;  %v1691_v35 = vld [vmem:[#allocation3 + $0x10] sm:$0xe] }
 0x1e6   : > { %v1636_v36 = vrot.slane %v1634_v31, 5  ;;  %v1647_v37 = vrot.slane %v1645_v16, 4  ;;  %v1648_v38 = vshll.u32 %v1628_v26, 16  ;;  %v1692_v39 = vld [vmem:[#allocation3 + $0x14] sm:$0x1]  ;;  %v1654_v20 = vshll.u32 %v1629_v28, 16 }
 0x1e7   : > { %v1516_v41 = vpack.c.b16 %v1515_v33, %v1514_v32  ;;  %2074 = vmatmul.msk.bf16.vlgmr.msra.gmra.mxu3 %vm610_vm15, %v1563_v29  ;;  %v1714_v14 = vsel %vm1460_vm1, %v2085_v46, 0  ;;  %v2083_v19 = vrot.slane %v1689_v27, 9  ;;  %v2087_v42 = vld [vmem:[%s2787_s4 + $0x18] sm:$0xf]  ;;  %v1699_v47 = vrot.slane %v1690_v34, 5 }
 0x1e8   : > { %v1637_v44 = vor.u32 %v1636_v36, %v1633_v5  ;;  %v1650_v43 = vrot.slane %v1648_v38, 5  ;;  %1723 = vmatpush.bf16.msrb.mxu3 %v1714_v14  ;;  %v2084_v17 = vrot.slane %v1691_v35, 9  ;;  %v2090_v48 = vld [vmem:[#allocation3 + $0x10] sm:$0xf]  ;;  %v2079_v49 = vor.u32 %v2109_v13, %v2078_v6  ;;  %v2110_v53 = vld [vmem:[#allocation3 + $0x14] sm:$0xf0] }
 0x1e9   : > { %2070 = vmatmul.msk.bf16.vlgmr.msra.gmra.mxu2 %vm610_vm15, %v1516_v41  ;;  %v1642_v50 = vrot.slane %v1640_v8, 5  ;;  %v1703_v51 = vrot.slane %v1692_v39, 5  ;;  %v1750_v52 = vsel %vm1460_vm1, %v2087_v42, 0  ;;  %v1656_v56 = vrot.slane %v1654_v20, 5  ;;  %v2093_v58 = vld [vmem:[%s2787_s4 + $0x1c] sm:$0xf] }
 0x1ea   : > { %v1638_v54 = vrot.slane %v1637_v44, 4  ;;  %v1651_v55 = vor.u32 %v1650_v43, %v1647_v37  ;;  %1759 = vmatpush.bf16.msrb.mxu0 %v1750_v52  ;;  %v2091_v57 = vor.u32 %v2110_v53, %v2090_v48  ;;  %v2097_v59 = vld [vmem:[%s2787_s4 + $0x20] sm:$0xf]  ;;  %v1813_v61 = vsel %vm1460_vm1, %v2093_v58, 0  ;;  %v1773_v1 = vld [vmem:[#allocation3 + $0x14] sm:$0x1] }
 0x1eb   : > { %v1860_v62 = vsel %vm1460_vm1, %v2097_v59, 0  ;;  %v1772_v63 = vld [vmem:[#allocation3 + $0x10] sm:$0xf]  ;;  %v1700_v4 = vsel %vm2468_vm12, %v2083_v19, %v1699_v47  ;;  %v1704_v7 = vsel %vm2468_vm12, %v2084_v17, %v1703_v51  ;;  %1822 = vmatpush.bf16.msra.mxu1 %v1813_v61  ;;  %v1774_v9 = vld [vmem:[#allocation3 + $0x18] sm:$0xf]  ;;  %v1786_v18 = vshll.u32 %v1773_v1, 16 }
 0x1ec   : > { %v1652_v2 = vrot.slane %v1651_v55, 4  ;;  %1869 = vmatpush.bf16.msra.mxu2 %v1860_v62  ;;  %v1777_v10 = vshrl.u32 %v1772_v63, 16  ;;  %v1775_v11 = vld [vmem:[#allocation3 + $0x1c] sm:$0x1]  ;;  %v1780_v12 = vshll.u32 %v1772_v63, 16  ;;  %v1791_v21 = vshrl.u32 %v1774_v9, 16 }
 0x1ed   : > { %2080 = vmatmul.msk.bf16.vlgmr.msrb.gmra.mxu1 %vm610_vm15, %v2079_v49  ;;  %2092 = vmatmul.msk.bf16.vlgmr.msrb.gmra.mxu0 %vm610_vm15, %v2091_v57  ;;  %v1643_v60 = vsel %vm2482_vm14, %v1638_v54, %v1642_v50  ;;  %v1794_v23 = vshll.u32 %v1774_v9, 16  ;;  %v1707_v24 = vunpack.c.l.b16 %v1700_v4  ;;  %v1708_v25 = vunpack.c.l.b16 %v1704_v7  ;;  %v1835_v35 = vld [vmem:[#allocation3 + $0x10] sm:$0xe]  ;;  %v1836_v37 = vld [vmem:[#allocation3 + $0x14] sm:$0x1] }
 0x1ee   : > { %v1657_v0 = vsel %vm2482_vm14, %v1652_v2, %v1656_v56  ;;  %v1779_v22 = vrot.slane %v1777_v10, 4  ;;  %v1782_v26 = vrot.slane %v1780_v12, 5  ;;  %v1793_v28 = vrot.slane %v1791_v21, 4  ;;  %v1837_v38 = vld [vmem:[#allocation3 + $0x18] sm:$0xe] }
 0x1ef   : > { %v1796_v30 = vrot.slane %v1794_v23, 5  ;;  %v1800_v31 = vshll.u32 %v1775_v11, 16  ;;  %v1660_v15 = vunpack.c.l.b16 %v1643_v60  ;;  %v1661_v40 = vunpack.c.l.b16 %v1657_v0  ;;  %v1838_v39 = vld [vmem:[#allocation3 + $0x1c] sm:$0x1] }
 0x1f0   : > { %v1783_v6 = vor.u32 %v1782_v26, %v1779_v22  ;;  %v1788_v13 = vrot.slane %v1786_v18, 5  ;;  %v1709_v46 = vpack.c.b16 %v1708_v25, %v1707_v24  ;;  %v2095_v20 = vrot.slane %v1835_v35, 9 }
 0x1f1   : > { %v1797_v8 = vor.u32 %v1796_v30, %v1793_v28  ;;  %v1802_v16 = vrot.slane %v1800_v31, 5  ;;  %v1662_v33 = vpack.c.b16 %v1661_v40, %v1660_v15  ;;  %v1845_v14 = vrot.slane %v1836_v37, 5 }
 0x1f2   : > { %v1784_v27 = vrot.slane %v1783_v6, 4  ;;  %v2096_v19 = vrot.slane %v1837_v38, 9  ;;  %v1849_v42 = vrot.slane %v1838_v39, 5 }
 0x1f3   : > { %v1798_v32 = vrot.slane %v1797_v8, 4  ;;  %v1846_v3 = vsel %vm2468_vm12, %v2095_v20, %v1845_v14 }
 0x1f4   : > { %v1789_v29 = vsel %vm2482_vm14, %v1784_v27, %v1788_v13  ;;  %v1850_v44 = vsel %vm2468_vm12, %v2096_v19, %v1849_v42  ;;  %v1853_v43 = vunpack.c.l.b16 %v1846_v3 }
 0x1f5   : > { %v1803_v5 = vsel %vm2482_vm14, %v1798_v32, %v1802_v16  ;;  %v1806_v34 = vunpack.c.l.b16 %v1789_v29  ;;  %v1854_v47 = vunpack.c.l.b16 %v1850_v44 }
 0x1f6   : > { %v1807_v36 = vunpack.c.l.b16 %v1803_v5  ;;  %v2216_v5 = vld [vmem:[%s2788_s5] ss:$0 sm:$0xff] }
 0x1f7   : > { %2086 = vmatmul.msk.bf16.vlgmr.msrb.gmra.mxu3 %vm610_vm15, %v1709_v46  ;;  %v1855_v17 = vpack.c.b16 %v1854_v47, %v1853_v43 }
 0x1f8   : > { %v1808_v41 = vpack.c.b16 %v1807_v36, %v1806_v34  ;;  %v2217_v36 = vld [vmem:[%s2789_s6] ss:$0 sm:$0xff] }
 0x1f9   : > { %2082 = vmatmul.msk.bf16.vlgmr.msrb.gmra.mxu2 %vm610_vm15, %v1662_v33 }
 0x1fd   : > { %2094 = vmatmul.msk.bf16.vlgmr.msra.gmra.mxu1 %vm610_vm15, %v1808_v41 }
 0x209   : > { %2098 = vmatmul.msk.bf16.vlgmr.msra.gmra.mxu2 %vm610_vm15, %v1855_v17 }
 0x25a   : > { %v1473_v48 = vpop.f32.mrf.mxu1 }
 0x25b   : > { %1478 = vst.msk [vmem:[#allocation4] sm:$0xff] %vm610_vm15, %v1473_v48 }
 0x262   : > { %v1475_v49 = vpop.f32.mrf.mxu1  ;;  %v1537_v50 = vld [vmem:[#allocation4] sm:$0xff] }
 0x263   : > { %1479 = vst.msk [vmem:[#allocation4 + $0x8] sm:$0xff] %vm610_vm15, %v1475_v49 }
 0x26a   : > { %v1579_v53 = vpop.f32.mrf.mxu3  ;;  %v1538_v45 = vld [vmem:[#allocation4 + $0x8] sm:$0xff]  ;;  %v1615_v61 = vpop.f32.mrf.mxu1 }
 0x26b   : > { %v1761_v25 = vpop.f32.mrf.mxu0 }
 0x26c   : > { %v1532_v51 = vpop.f32.mrf.mxu2 }
 0x26d   : > { %v1539_v52 = vadd.f32 %v1537_v50, %v1532_v51 }
 0x26f   : > { %1541 = vst.msk [vmem:[#allocation4] sm:$0xff] %vm610_vm15, %v1539_v52 }
 0x272   : > { %v1581_v58 = vpop.f32.mrf.mxu3  ;;  %v1617_v2 = vpop.f32.mrf.mxu1 }
 0x273   : > { %v1763_v31 = vpop.f32.mrf.mxu0 }
 0x274   : > { %v1534_v54 = vpop.f32.mrf.mxu2 }
 0x275   : > { %v1540_v55 = vadd.f32 %v1538_v45, %v1534_v54 }
 0x276   : > { %v1584_v56 = vld [vmem:[#allocation4] sm:$0xff] }
 0x277   : > { %v1586_v57 = vadd.f32 %v1584_v56, %v1579_v53  ;;  %1542 = vst.msk [vmem:[#allocation4 + $0x8] sm:$0xff] %vm610_vm15, %v1540_v55 }
 0x279   : > { %1588 = vst.msk [vmem:[#allocation4] sm:$0xff] %vm610_vm15, %v1586_v57 }
 0x27a   : > { %v1725_v21 = vpop.f32.mrf.mxu3  ;;  %v1824_v40 = vpop.f32.mrf.mxu1 }
 0x27c   : > { %v1678_v7 = vpop.f32.mrf.mxu2 }
 0x27e   : > { %v1585_v59 = vld [vmem:[#allocation4 + $0x8] sm:$0xff] }
 0x27f   : > { %v1587_v62 = vadd.f32 %v1585_v59, %v1581_v58 }
 0x280   : > { %v1620_v63 = vld [vmem:[#allocation4] sm:$0xff] }
 0x281   : > { %1589 = vst.msk [vmem:[#allocation4 + $0x8] sm:$0xff] %vm610_vm15, %v1587_v62  ;;  %v1622_v1 = vadd.f32 %v1620_v63, %v1615_v61 }
 0x282   : > { %v1727_v23 = vpop.f32.mrf.mxu3  ;;  %v1826_v16 = vpop.f32.mrf.mxu1 }
 0x283   : > { %1624 = vst.msk [vmem:[#allocation4] sm:$0xff] %vm610_vm15, %v1622_v1 }
 0x284   : > { %v1680_v12 = vpop.f32.mrf.mxu2 }
 0x288   : > { %v1621_v4 = vld [vmem:[#allocation4 + $0x8] sm:$0xff] }
 0x289   : > { %v1623_v9 = vadd.f32 %v1621_v4, %v1617_v2 }
 0x28a   : > { %v1683_v10 = vld [vmem:[#allocation4] sm:$0xff] }
 0x28b   : > { %1625 = vst.msk [vmem:[#allocation4 + $0x8] sm:$0xff] %vm610_vm15, %v1623_v9  ;;  %v1685_v11 = vadd.f32 %v1683_v10, %v1678_v7 }
 0x28c   : > { %v1871_v27 = vpop.f32.mrf.mxu2 }
 0x28d   : > { %1687 = vst.msk [vmem:[#allocation4] sm:$0xff] %vm610_vm15, %v1685_v11 }
 0x292   : > { %v1684_v18 = vld [vmem:[#allocation4 + $0x8] sm:$0xff] }
 0x293   : > { %v1686_v60 = vadd.f32 %v1684_v18, %v1680_v12 }
 0x294   : > { %v1730_v0 = vld [vmem:[#allocation4] sm:$0xff]  ;;  %v1873_v34 = vpop.f32.mrf.mxu2 }
 0x295   : > { %1688 = vst.msk [vmem:[#allocation4 + $0x8] sm:$0xff] %vm610_vm15, %v1686_v60  ;;  %v1732_v22 = vadd.f32 %v1730_v0, %v1725_v21 }
 0x297   : > { %1734 = vst.msk [vmem:[#allocation4] sm:$0xff] %vm610_vm15, %v1732_v22 }
 0x29c   : > { %v1731_v24 = vld [vmem:[#allocation4 + $0x8] sm:$0xff] }
 0x29d   : > { %v1733_v26 = vadd.f32 %v1731_v24, %v1727_v23 }
 0x29e   : > { %v1766_v28 = vld [vmem:[#allocation4] sm:$0xff] }
 0x29f   : > { %1735 = vst.msk [vmem:[#allocation4 + $0x8] sm:$0xff] %vm610_vm15, %v1733_v26  ;;  %v1768_v30 = vadd.f32 %v1766_v28, %v1761_v25 }
 0x2a1   : > { %1770 = vst.msk [vmem:[#allocation4] sm:$0xff] %vm610_vm15, %v1768_v30 }
 0x2a6   : > { %v1767_v15 = vld [vmem:[#allocation4 + $0x8] sm:$0xff] }
 0x2a7   : > { %v1769_v6 = vadd.f32 %v1767_v15, %v1763_v31 }
 0x2a8   : > { %v1829_v13 = vld [vmem:[#allocation4] sm:$0xff] }
 0x2a9   : > { %1771 = vst.msk [vmem:[#allocation4 + $0x8] sm:$0xff] %vm610_vm15, %v1769_v6  ;;  %v1831_v8 = vadd.f32 %v1829_v13, %v1824_v40 }
 0x2ab   : > { %1833 = vst.msk [vmem:[#allocation4] sm:$0xff] %vm610_vm15, %v1831_v8 }
 0x2b0   : > { %v1830_v46 = vld [vmem:[#allocation4 + $0x8] sm:$0xff] }
 0x2b1   : > { %v1832_v32 = vadd.f32 %v1830_v46, %v1826_v16 }
 0x2b2   : > { %v1876_v33 = vld [vmem:[#allocation4] sm:$0xff] }
 0x2b3   : > { %1834 = vst.msk [vmem:[#allocation4 + $0x8] sm:$0xff] %vm610_vm15, %v1832_v32  ;;  %v1878_v29 = vadd.f32 %v1876_v33, %v1871_v27 }
 0x2b5   : > { %1880 = vst.msk [vmem:[#allocation4] sm:$0xff] %vm610_vm15, %v1878_v29 }
 0x2ba   : > { %v1877_v35 = vld [vmem:[#allocation4 + $0x8] sm:$0xff] }
 0x2bb   : > { %v1879_v37 = vadd.f32 %v1877_v35, %v1873_v34 }
 0x2bc   : > { %v1882_v38 = vld [vmem:[#allocation4] sm:$0xff] }
 0x2bd   : > { %v1888_v39 = vmul.f32 %v2216_v5, %v1882_v38  ;;  %1881 = vst.msk [vmem:[#allocation4 + $0x8] sm:$0xff] %vm610_vm15, %v1879_v37 }
 0x2bf   : > { %v1894_v41 = vadd.f32 %v2217_v36, %v1888_v39 }
 0x2c1   : > { %v1896_v20 = vmax.f32 %v1894_v41, 0.0 }
 0x2c3   : > { %v1898_v14 = vpack.c.bf16 %v1896_v20, %v1896_v20 }
 0x2c4   : > { %v1883_v19 = vld [vmem:[#allocation4 + $0x8] sm:$0xff] }
 0x2c5   : > { %1901 = vst.msk [vmem:[%s2341_s19] sm:$0xf] %vm1379_vm0, %v1898_v14  ;;  %v1889_v42 = vmul.f32 %v2216_v5, %v1883_v19 }
 0x2c7   : > { %v1895_v3 = vadd.f32 %v2217_v36, %v1889_v42 }
 0x2c9   : > { %v1897_v44 = vmax.f32 %v1895_v3, 0.0 }
 0x2cb   : > { %v1899_v43 = vpack.c.bf16 %v1897_v44, %v1897_v44 }
 0x2cd   : > { %1902 = vst.msk [vmem:[%s2341_s19 + $0x4] sm:$0xf] %vm1379_vm0, %v1899_v43 }
 0x2ce PF: > { %s17_s28 = sadd.s32 1, %s2256_s28   ;;  %s2807_s24 = smov %s2248_s26 }
 0x2cf   : > { %p14_p9 = scmp.ge.s32.totalorder %s17_s28, 10   ;;  %s2808_s25 = smov %s2252_s27 }
 0x2d0   : > { %s2809_s26 = smov %s2812_s29  ;;  %s2810_s27 = smov %s2816_s30 }
 0x2d1   :  { %16 = sbr.rel (!%p14_p9) target bundleno = 3 (0x3), region = 108 }

</bundles_post_ra>
